<compile_context>
chip_gen: v5e
topology: v5e:2x2
jax: 0.10.0
libtpu: 0.0.40
codegen_flags: <defaults>
</compile_context>

<pallas_src>
import numpy as np
import jax
import jax.numpy as jnp
from jax.experimental import pallas as pl
from jax.experimental.pallas import tpu as pltpu

# ----------------------------- model dims -----------------------------------
D = 128          # sim_dim (d_model)  -> lane axis
H = 8            # nhead
DH = D // H      # head dim
FF = 2048        # TransformerEncoderLayer default dim_feedforward
FC = 1024        # feed-forward lane chunk (h1 chunk is n x FC f32)
L = 2            # num_layers
EPS = 1e-5       # LayerNorm eps (PyTorch default)


def _layer_norm(x, gamma, beta):
    # x: (N, D) f32, gamma/beta: (1, D) f32
    mu = jnp.mean(x, axis=-1, keepdims=True)
    xc = x - mu
    var = jnp.mean(xc * xc, axis=-1, keepdims=True)
    return xc * jax.lax.rsqrt(var + EPS) * gamma + beta


def _encoder_kernel(x_ref, mask_ref,
                    ln0_g_ref, ln0_b_ref,
                    wqkv_ref, bqkv_ref,
                    wo_ref, bo_ref,
                    w1_ref, b1_ref,
                    w2_ref, b2_ref,
                    ln1g_ref, ln1b_ref,
                    ln2g_ref, ln2b_ref,
                    o_ref):
    bb, s, d = x_ref.shape          # batch tile, seq, d_model
    n = bb * s

    x = x_ref[...].reshape(n, d).astype(jnp.float32)

    # initial self.normalize
    x = _layer_norm(x, ln0_g_ref[...], ln0_b_ref[...])

    # (H*bb, 1, D) bf16; group g = h*bb + b keeps only head h's channels.
    mask = mask_ref[...]

    for l in range(L):  # static unroll over the 2 encoder layers
        # ---------------- multi-head self-attention ----------------
        xb = x.astype(jnp.bfloat16)                                 # bf16 at MXU only
        qkv = jnp.dot(xb, wqkv_ref[l],
                      preferred_element_type=jnp.float32) + bqkv_ref[l]   # (n, 3D) f32

        def head_rep(t):
            # (n, D) f32 -> (H*bb, s, D) bf16, head-major replication along
            # the leading axis (full-width row copies, no lane slicing).
            t3 = t.astype(jnp.bfloat16).reshape(bb, s, D)
            return jnp.concatenate([t3] * H, axis=0)

        q_rep = head_rep(qkv[:, 0 * D:1 * D])          # q pre-scaled via wqkv at init
        k_rep = head_rep(qkv[:, 1 * D:2 * D]) * mask   # zero all non-head-h channels
        v_rep = head_rep(qkv[:, 2 * D:3 * D]) * mask

        # per-head scores: contraction over all 128 channels, but k_rep is zero
        # outside head h for group h, so this equals the exact per-head Q_h K_h^T.
        sc = jnp.einsum('bqd,bkd->bqk', q_rep, k_rep,
                        preferred_element_type=jnp.float32)         # (H*bb, s, s)
        sc = sc - jnp.max(sc, axis=-1, keepdims=True)
        p = jnp.exp(sc)
        p = p * pl.reciprocal(jnp.sum(p, axis=-1, keepdims=True), approx=True)

        oh = jnp.einsum('bqk,bkd->bqd', p.astype(jnp.bfloat16), v_rep,
                        preferred_element_type=jnp.float32)         # (H*bb, s, D)

        # head merge: group h only contributes head-h channels, so the sum over
        # the 8 leading slabs reassembles the concatenated-heads layout exactly.
        attn = oh[0:bb]
        for h in range(1, H):
            attn = attn + oh[h * bb:(h + 1) * bb]
        attn = attn.reshape(n, D)
        attn = jnp.dot(attn.astype(jnp.bfloat16), wo_ref[l],
                       preferred_element_type=jnp.float32) + bo_ref[l]

        # residual + norm1   (dropout is identity in eval mode)
        x = _layer_norm(x + attn, ln1g_ref[l], ln1b_ref[l])

        # ---------------- feed-forward (chunked over FF lanes) ----------------
        xb = x.astype(jnp.bfloat16)
        ff = b2_ref[l]                                              # (1, D) f32
        for c in range(FF // FC):
            h1 = jnp.dot(xb, w1_ref[l, :, c * FC:(c + 1) * FC],
                         preferred_element_type=jnp.float32) + b1_ref[l, :, c * FC:(c + 1) * FC]
            h1 = jnp.maximum(h1, 0.0)                               # relu (f32)
            ff = ff + jnp.dot(h1.astype(jnp.bfloat16),
                              w2_ref[l, c * FC:(c + 1) * FC, :],
                              preferred_element_type=jnp.float32)

        # residual + norm2
        x = _layer_norm(x + ff, ln2g_ref[l], ln2b_ref[l])

    o_ref[...] = x.reshape(bb, s, d).astype(o_ref.dtype)


def _pick_block_batch(batch, seq, target_tokens=1024):
    """Largest divisor of `batch` whose tile holds <= target_tokens tokens,
    preferring a choice that leaves >= 2 grid steps (v7x has 2 TensorCores)."""
    fitting = [c for c in range(1, batch + 1)
               if batch % c == 0 and c * seq <= target_tokens]
    if not fitting:
        return 1
    multi = [c for c in fitting if batch // c >= 2]
    return max(multi) if multi else max(fitting)


def ner_tr_encoder(x, params):
    batch, seq, d = x.shape
    assert d == D
    bb = _pick_block_batch(batch, seq)
    grid = (batch // bb,)

    # per-(head, sample) channel mask: group g = h*bb + b keeps head h's channels
    head_of_col = np.arange(D) // DH                      # (D,)
    group_head = np.repeat(np.arange(H), bb)              # (H*bb,)
    mask_np = (group_head[:, None] == head_of_col[None, :]).astype(np.float32)
    mask = jnp.asarray(mask_np.reshape(H * bb, 1, D), jnp.bfloat16)

    weight_args = (
        params['ln0_g'], params['ln0_b'],
        params['wqkv'], params['bqkv'],
        params['wo'], params['bo'],
        params['w1'], params['b1'],
        params['w2'], params['b2'],
        params['ln1_g'], params['ln1_b'],
        params['ln2_g'], params['ln2_b'],
    )

    x_spec = pl.BlockSpec((bb, seq, d), lambda i: (i, 0, 0))
    # constant index_map => mask/weights are DMA'd once and stay resident in VMEM
    const_specs = [
        pl.BlockSpec(a.shape, lambda i, nd=a.ndim: (0,) * nd)
        for a in (mask,) + weight_args
    ]

    return pl.pallas_call(
        _encoder_kernel,
        out_shape=jax.ShapeDtypeStruct((batch, seq, d), jnp.float32),
        grid=grid,
        in_specs=[x_spec] + const_specs,
        out_specs=x_spec,
        compiler_params=pltpu.CompilerParams(
            dimension_semantics=("parallel",),
            # 48 MiB: above the default scoped limits on v5e (16 MiB) / v6e (32
            # MiB), below v7x's 64 MiB/TC physical VMEM.
            vmem_limit_bytes=48 * 1024 * 1024),
    )(x, mask, *weight_args)


def init_params(key):
    """Deterministic synthetic parameters. Linear weights stored as (in, out).
    Big matmul weights are bf16 (halved HBM->VMEM traffic); biases/LN stay f32.
    The 1/sqrt(head_dim) attention scale is folded into the q part of in_proj."""
    keys = jax.random.split(key, 8)

    def wgen(k, shape):
        return 0.05 * jax.random.normal(k, shape, dtype=jnp.float32)

    qkv_scale = jnp.concatenate([
        jnp.full((D,), 1.0 / (DH ** 0.5), jnp.float32),   # q columns
        jnp.ones((2 * D,), jnp.float32)])                 # k, v columns

    params = {
        # initial LayerNorm (self.normalize)
        'ln0_g': jnp.ones((1, D), jnp.float32),
        'ln0_b': jnp.zeros((1, D), jnp.float32),
        # per-layer attention: in_proj (D, 3D) [pre-transposed, q pre-scaled],
        # out_proj (D, D)
        'wqkv': (wgen(keys[0], (L, D, 3 * D)) * qkv_scale).astype(jnp.bfloat16),
        'bqkv': jnp.zeros((L, 1, 3 * D), jnp.float32) * qkv_scale,
        'wo':   wgen(keys[1], (L, D, D)).astype(jnp.bfloat16),
        'bo':   jnp.zeros((L, 1, D), jnp.float32),
        # per-layer feed-forward
        'w1':   wgen(keys[2], (L, D, FF)).astype(jnp.bfloat16),
        'b1':   0.01 * jnp.ones((L, 1, FF), jnp.float32),
        'w2':   wgen(keys[3], (L, FF, D)).astype(jnp.bfloat16),
        'b2':   0.01 * jnp.ones((L, 1, D), jnp.float32),
        # per-layer norms
        'ln1_g': jnp.ones((L, 1, D), jnp.float32),
        'ln1_b': jnp.zeros((L, 1, D), jnp.float32),
        'ln2_g': jnp.ones((L, 1, D), jnp.float32),
        'ln2_b': jnp.zeros((L, 1, D), jnp.float32),
    }
    return params


if __name__ == "__main__":
    B, S = 2, 8  # small demo shapes (d_model = 128)
    key = jax.random.PRNGKey(0)
    k_x, k_p = jax.random.split(key)
    x = jax.random.normal(k_x, (B, S, D), dtype=jnp.float32)
    params = init_params(k_p)

    out = ner_tr_encoder(x, params)
    out = jax.block_until_ready(out)

    assert out.shape == (B, S, D)
    assert bool(jnp.all(jnp.isfinite(out)))
    print("KERNEL_OK")
</pallas_src>

<mosaic_0001>
module attributes {stable_mosaic.version = 11 : i64} {
  func.func @_encoder_kernel(%arg0: i32, %arg1: memref<1x8x128xf32, #tpu.memory_space<vmem>>, %arg2: memref<8x1x128xbf16, #tpu.memory_space<vmem>>, %arg3: memref<1x128xf32, #tpu.memory_space<vmem>>, %arg4: memref<1x128xf32, #tpu.memory_space<vmem>>, %arg5: memref<2x128x384xbf16, #tpu.memory_space<vmem>>, %arg6: memref<2x1x384xf32, #tpu.memory_space<vmem>>, %arg7: memref<2x128x128xbf16, #tpu.memory_space<vmem>>, %arg8: memref<2x1x128xf32, #tpu.memory_space<vmem>>, %arg9: memref<2x128x2048xbf16, #tpu.memory_space<vmem>>, %arg10: memref<2x1x2048xf32, #tpu.memory_space<vmem>>, %arg11: memref<2x2048x128xbf16, #tpu.memory_space<vmem>>, %arg12: memref<2x1x128xf32, #tpu.memory_space<vmem>>, %arg13: memref<2x1x128xf32, #tpu.memory_space<vmem>>, %arg14: memref<2x1x128xf32, #tpu.memory_space<vmem>>, %arg15: memref<2x1x128xf32, #tpu.memory_space<vmem>>, %arg16: memref<2x1x128xf32, #tpu.memory_space<vmem>>, %arg17: memref<1x8x128xf32, #tpu.memory_space<vmem>>) attributes {dimension_semantics = [#tpu.dimension_semantics<parallel>], iteration_bounds = array<i64: 2>, scalar_prefetch = 0 : i64, scratch_operands = 0 : i64, tpu.core_type = #tpu.core_type<tc>, window_params = [{transform_indices = @transform_0, window_bounds = array<i64: 1, 8, 128>}, {pipeline_mode = #tpu.pipeline_mode<synchronous>, transform_indices = @transform_1, window_bounds = array<i64: 8, 1, 128>}, {pipeline_mode = #tpu.pipeline_mode<synchronous>, transform_indices = @transform_2, window_bounds = array<i64: 1, 128>}, {pipeline_mode = #tpu.pipeline_mode<synchronous>, transform_indices = @transform_3, window_bounds = array<i64: 1, 128>}, {pipeline_mode = #tpu.pipeline_mode<synchronous>, transform_indices = @transform_4, window_bounds = array<i64: 2, 128, 384>}, {pipeline_mode = #tpu.pipeline_mode<synchronous>, transform_indices = @transform_5, window_bounds = array<i64: 2, 1, 384>}, {pipeline_mode = #tpu.pipeline_mode<synchronous>, transform_indices = @transform_6, window_bounds = array<i64: 2, 128, 128>}, {pipeline_mode = #tpu.pipeline_mode<synchronous>, transform_indices = @transform_7, window_bounds = array<i64: 2, 1, 128>}, {pipeline_mode = #tpu.pipeline_mode<synchronous>, transform_indices = @transform_8, window_bounds = array<i64: 2, 128, 2048>}, {pipeline_mode = #tpu.pipeline_mode<synchronous>, transform_indices = @transform_9, window_bounds = array<i64: 2, 1, 2048>}, {pipeline_mode = #tpu.pipeline_mode<synchronous>, transform_indices = @transform_10, window_bounds = array<i64: 2, 2048, 128>}, {pipeline_mode = #tpu.pipeline_mode<synchronous>, transform_indices = @transform_11, window_bounds = array<i64: 2, 1, 128>}, {pipeline_mode = #tpu.pipeline_mode<synchronous>, transform_indices = @transform_12, window_bounds = array<i64: 2, 1, 128>}, {pipeline_mode = #tpu.pipeline_mode<synchronous>, transform_indices = @transform_13, window_bounds = array<i64: 2, 1, 128>}, {pipeline_mode = #tpu.pipeline_mode<synchronous>, transform_indices = @transform_14, window_bounds = array<i64: 2, 1, 128>}, {pipeline_mode = #tpu.pipeline_mode<synchronous>, transform_indices = @transform_15, window_bounds = array<i64: 2, 1, 128>}, {transform_indices = @transform_16, window_bounds = array<i64: 1, 8, 128>}]} {
    %c0 = arith.constant 0 : index
    %c0_0 = arith.constant 0 : index
    %c0_1 = arith.constant 0 : index
    %0 = vector.load %arg1[%c0, %c0_0, %c0_1] : memref<1x8x128xf32, #tpu.memory_space<vmem>>, vector<1x8x128xf32>
    %1 = vector.shape_cast %0 : vector<1x8x128xf32> to vector<8x128xf32>
    %c0_2 = arith.constant 0 : index
    %c0_3 = arith.constant 0 : index
    %2 = vector.load %arg3[%c0_2, %c0_3] : memref<1x128xf32, #tpu.memory_space<vmem>>, vector<1x128xf32>
    %c0_4 = arith.constant 0 : index
    %c0_5 = arith.constant 0 : index
    %3 = vector.load %arg4[%c0_4, %c0_5] : memref<1x128xf32, #tpu.memory_space<vmem>>, vector<1x128xf32>
    %cst = arith.constant dense<0.000000e+00> : vector<8xf32>
    %4 = vector.multi_reduction <add>, %1, %cst [1] : vector<8x128xf32> to vector<8xf32>
    %5 = vector.shape_cast %4 : vector<8xf32> to vector<8x1xf32>
    %cst_6 = arith.constant 1.280000e+02 : f32
    %6 = vector.broadcast %cst_6 : f32 to vector<8x1xf32>
    %7 = arith.divf %5, %6 : vector<8x1xf32>
    %8 = vector.broadcast %7 : vector<8x1xf32> to vector<8x128xf32>
    %9 = arith.subf %1, %8 : vector<8x128xf32>
    %10 = arith.mulf %9, %9 : vector<8x128xf32>
    %cst_7 = arith.constant dense<0.000000e+00> : vector<8xf32>
    %11 = vector.multi_reduction <add>, %10, %cst_7 [1] : vector<8x128xf32> to vector<8xf32>
    %12 = vector.shape_cast %11 : vector<8xf32> to vector<8x1xf32>
    %cst_8 = arith.constant 1.280000e+02 : f32
    %13 = vector.broadcast %cst_8 : f32 to vector<8x1xf32>
    %14 = arith.divf %12, %13 : vector<8x1xf32>
    %cst_9 = arith.constant 9.99999974E-6 : f32
    %15 = vector.broadcast %cst_9 : f32 to vector<8x1xf32>
    %16 = arith.addf %14, %15 : vector<8x1xf32>
    %17 = math.rsqrt %16 : vector<8x1xf32>
    %18 = vector.broadcast %17 : vector<8x1xf32> to vector<8x128xf32>
    %19 = arith.mulf %9, %18 : vector<8x128xf32>
    %20 = vector.broadcast %2 : vector<1x128xf32> to vector<8x128xf32>
    %21 = arith.mulf %19, %20 : vector<8x128xf32>
    %22 = vector.broadcast %3 : vector<1x128xf32> to vector<8x128xf32>
    %23 = arith.addf %21, %22 : vector<8x128xf32>
    %c0_10 = arith.constant 0 : index
    %c0_11 = arith.constant 0 : index
    %c0_12 = arith.constant 0 : index
    %24 = vector.load %arg2[%c0_10, %c0_11, %c0_12] : memref<8x1x128xbf16, #tpu.memory_space<vmem>>, vector<8x1x128xbf16>
    %25 = arith.truncf %23 : vector<8x128xf32> to vector<8x128xbf16>
    %c0_13 = arith.constant 0 : index
    %c0_14 = arith.constant 0 : index
    %c0_15 = arith.constant 0 : index
    %26 = vector.load %arg5[%c0_13, %c0_14, %c0_15] : memref<2x128x384xbf16, #tpu.memory_space<vmem>>, vector<1x128x384xbf16>
    %27 = vector.shape_cast %26 : vector<1x128x384xbf16> to vector<128x384xbf16>
    %cst_16 = arith.constant dense<0.000000e+00> : vector<8x384xf32>
    %28 = tpu.matmul %25, %27, %cst_16 {dimension_numbers = #tpu.dot_dimension_numbers<[1], [0], [0], [1], [0, 0, 1, 1], [], []>} : vector<8x128xbf16>, vector<128x384xbf16>, vector<8x384xf32> -> vector<8x384xf32>
    %c0_17 = arith.constant 0 : index
    %c0_18 = arith.constant 0 : index
    %c0_19 = arith.constant 0 : index
    %29 = vector.load %arg6[%c0_17, %c0_18, %c0_19] : memref<2x1x384xf32, #tpu.memory_space<vmem>>, vector<1x1x384xf32>
    %30 = vector.shape_cast %29 : vector<1x1x384xf32> to vector<1x384xf32>
    %31 = vector.broadcast %30 : vector<1x384xf32> to vector<8x384xf32>
    %32 = arith.addf %28, %31 : vector<8x384xf32>
    %33 = vector.extract_strided_slice %32 {offsets = [0, 0], sizes = [8, 128], strides = [1, 1]} : vector<8x384xf32> to vector<8x128xf32>
    %34 = arith.truncf %33 : vector<8x128xf32> to vector<8x128xbf16>
    %35 = vector.shape_cast %34 : vector<8x128xbf16> to vector<1x8x128xbf16>
    %36 = tpu.concatenate %35, %35, %35, %35, %35, %35, %35, %35 in 0 : vector<1x8x128xbf16>, vector<1x8x128xbf16>, vector<1x8x128xbf16>, vector<1x8x128xbf16>, vector<1x8x128xbf16>, vector<1x8x128xbf16>, vector<1x8x128xbf16>, vector<1x8x128xbf16> -> vector<8x8x128xbf16>
    %37 = vector.extract_strided_slice %32 {offsets = [0, 128], sizes = [8, 128], strides = [1, 1]} : vector<8x384xf32> to vector<8x128xf32>
    %38 = arith.truncf %37 : vector<8x128xf32> to vector<8x128xbf16>
    %39 = vector.shape_cast %38 : vector<8x128xbf16> to vector<1x8x128xbf16>
    %40 = tpu.concatenate %39, %39, %39, %39, %39, %39, %39, %39 in 0 : vector<1x8x128xbf16>, vector<1x8x128xbf16>, vector<1x8x128xbf16>, vector<1x8x128xbf16>, vector<1x8x128xbf16>, vector<1x8x128xbf16>, vector<1x8x128xbf16>, vector<1x8x128xbf16> -> vector<8x8x128xbf16>
    %41 = vector.broadcast %24 : vector<8x1x128xbf16> to vector<8x8x128xbf16>
    %42 = arith.mulf %40, %41 : vector<8x8x128xbf16>
    %43 = vector.extract_strided_slice %32 {offsets = [0, 256], sizes = [8, 128], strides = [1, 1]} : vector<8x384xf32> to vector<8x128xf32>
    %44 = arith.truncf %43 : vector<8x128xf32> to vector<8x128xbf16>
    %45 = vector.shape_cast %44 : vector<8x128xbf16> to vector<1x8x128xbf16>
    %46 = tpu.concatenate %45, %45, %45, %45, %45, %45, %45, %45 in 0 : vector<1x8x128xbf16>, vector<1x8x128xbf16>, vector<1x8x128xbf16>, vector<1x8x128xbf16>, vector<1x8x128xbf16>, vector<1x8x128xbf16>, vector<1x8x128xbf16>, vector<1x8x128xbf16> -> vector<8x8x128xbf16>
    %47 = vector.broadcast %24 : vector<8x1x128xbf16> to vector<8x8x128xbf16>
    %48 = arith.mulf %46, %47 : vector<8x8x128xbf16>
    "tpu.trace_start"() <{level = 10 : i32, message = "bqd,bkd->bqk"}> : () -> ()
    %cst_20 = arith.constant dense<0.000000e+00> : vector<8x8x8xf32>
    %49 = tpu.matmul %36, %42, %cst_20 {dimension_numbers = #tpu.dot_dimension_numbers<[2], [2], [1], [1], [0, 0, 0, 1, 1, 1], [0], [0]>} : vector<8x8x128xbf16>, vector<8x8x128xbf16>, vector<8x8x8xf32> -> vector<8x8x8xf32>
    "tpu.trace_stop"() : () -> ()
    %cst_21 = arith.constant dense<0xFF800000> : vector<8x8xf32>
    %50 = vector.multi_reduction <maximumf>, %49, %cst_21 [2] : vector<8x8x8xf32> to vector<8x8xf32>
    %51 = vector.shape_cast %50 : vector<8x8xf32> to vector<8x8x1xf32>
    %52 = vector.broadcast %51 : vector<8x8x1xf32> to vector<8x8x8xf32>
    %53 = arith.subf %49, %52 : vector<8x8x8xf32>
    %54 = math.exp %53 : vector<8x8x8xf32>
    %cst_22 = arith.constant dense<0.000000e+00> : vector<8x8xf32>
    %55 = vector.multi_reduction <add>, %54, %cst_22 [2] : vector<8x8x8xf32> to vector<8x8xf32>
    %56 = vector.shape_cast %55 : vector<8x8xf32> to vector<8x8x1xf32>
    %57 = tpu.reciprocal %56 {approx = true} : vector<8x8x1xf32> -> vector<8x8x1xf32>
    %58 = vector.broadcast %57 : vector<8x8x1xf32> to vector<8x8x8xf32>
    %59 = arith.mulf %54, %58 : vector<8x8x8xf32>
    %60 = arith.truncf %59 : vector<8x8x8xf32> to vector<8x8x8xbf16>
    "tpu.trace_start"() <{level = 10 : i32, message = "bqk,bkd->bqd"}> : () -> ()
    %cst_23 = arith.constant dense<0.000000e+00> : vector<8x8x128xf32>
    %61 = tpu.matmul %60, %48, %cst_23 {dimension_numbers = #tpu.dot_dimension_numbers<[2], [1], [1], [2], [0, 0, 0, 1, 1, 2], [0], [0]>} : vector<8x8x8xbf16>, vector<8x8x128xbf16>, vector<8x8x128xf32> -> vector<8x8x128xf32>
    "tpu.trace_stop"() : () -> ()
    %62 = vector.extract_strided_slice %61 {offsets = [0, 0, 0], sizes = [1, 8, 128], strides = [1, 1, 1]} : vector<8x8x128xf32> to vector<1x8x128xf32>
    %63 = vector.extract_strided_slice %61 {offsets = [1, 0, 0], sizes = [1, 8, 128], strides = [1, 1, 1]} : vector<8x8x128xf32> to vector<1x8x128xf32>
    %64 = arith.addf %62, %63 : vector<1x8x128xf32>
    %65 = vector.extract_strided_slice %61 {offsets = [2, 0, 0], sizes = [1, 8, 128], strides = [1, 1, 1]} : vector<8x8x128xf32> to vector<1x8x128xf32>
    %66 = arith.addf %64, %65 : vector<1x8x128xf32>
    %67 = vector.extract_strided_slice %61 {offsets = [3, 0, 0], sizes = [1, 8, 128], strides = [1, 1, 1]} : vector<8x8x128xf32> to vector<1x8x128xf32>
    %68 = arith.addf %66, %67 : vector<1x8x128xf32>
    %69 = vector.extract_strided_slice %61 {offsets = [4, 0, 0], sizes = [1, 8, 128], strides = [1, 1, 1]} : vector<8x8x128xf32> to vector<1x8x128xf32>
    %70 = arith.addf %68, %69 : vector<1x8x128xf32>
    %71 = vector.extract_strided_slice %61 {offsets = [5, 0, 0], sizes = [1, 8, 128], strides = [1, 1, 1]} : vector<8x8x128xf32> to vector<1x8x128xf32>
    %72 = arith.addf %70, %71 : vector<1x8x128xf32>
    %73 = vector.extract_strided_slice %61 {offsets = [6, 0, 0], sizes = [1, 8, 128], strides = [1, 1, 1]} : vector<8x8x128xf32> to vector<1x8x128xf32>
    %74 = arith.addf %72, %73 : vector<1x8x128xf32>
    %75 = vector.extract_strided_slice %61 {offsets = [7, 0, 0], sizes = [1, 8, 128], strides = [1, 1, 1]} : vector<8x8x128xf32> to vector<1x8x128xf32>
    %76 = arith.addf %74, %75 : vector<1x8x128xf32>
    %77 = vector.shape_cast %76 : vector<1x8x128xf32> to vector<8x128xf32>
    %78 = arith.truncf %77 : vector<8x128xf32> to vector<8x128xbf16>
    %c0_24 = arith.constant 0 : index
    %c0_25 = arith.constant 0 : index
    %c0_26 = arith.constant 0 : index
    %79 = vector.load %arg7[%c0_24, %c0_25, %c0_26] : memref<2x128x128xbf16, #tpu.memory_space<vmem>>, vector<1x128x128xbf16>
    %80 = vector.shape_cast %79 : vector<1x128x128xbf16> to vector<128x128xbf16>
    %cst_27 = arith.constant dense<0.000000e+00> : vector<8x128xf32>
    %81 = tpu.matmul %78, %80, %cst_27 {dimension_numbers = #tpu.dot_dimension_numbers<[1], [0], [0], [1], [0, 0, 1, 1], [], []>} : vector<8x128xbf16>, vector<128x128xbf16>, vector<8x128xf32> -> vector<8x128xf32>
    %c0_28 = arith.constant 0 : index
    %c0_29 = arith.constant 0 : index
    %c0_30 = arith.constant 0 : index
    %82 = vector.load %arg8[%c0_28, %c0_29, %c0_30] : memref<2x1x128xf32, #tpu.memory_space<vmem>>, vector<1x1x128xf32>
    %83 = vector.shape_cast %82 : vector<1x1x128xf32> to vector<1x128xf32>
    %84 = vector.broadcast %83 : vector<1x128xf32> to vector<8x128xf32>
    %85 = arith.addf %81, %84 : vector<8x128xf32>
    %86 = arith.addf %23, %85 : vector<8x128xf32>
    %c0_31 = arith.constant 0 : index
    %c0_32 = arith.constant 0 : index
    %c0_33 = arith.constant 0 : index
    %87 = vector.load %arg13[%c0_31, %c0_32, %c0_33] : memref<2x1x128xf32, #tpu.memory_space<vmem>>, vector<1x1x128xf32>
    %88 = vector.shape_cast %87 : vector<1x1x128xf32> to vector<1x128xf32>
    %c0_34 = arith.constant 0 : index
    %c0_35 = arith.constant 0 : index
    %c0_36 = arith.constant 0 : index
    %89 = vector.load %arg14[%c0_34, %c0_35, %c0_36] : memref<2x1x128xf32, #tpu.memory_space<vmem>>, vector<1x1x128xf32>
    %90 = vector.shape_cast %89 : vector<1x1x128xf32> to vector<1x128xf32>
    %cst_37 = arith.constant dense<0.000000e+00> : vector<8xf32>
    %91 = vector.multi_reduction <add>, %86, %cst_37 [1] : vector<8x128xf32> to vector<8xf32>
    %92 = vector.shape_cast %91 : vector<8xf32> to vector<8x1xf32>
    %cst_38 = arith.constant 1.280000e+02 : f32
    %93 = vector.broadcast %cst_38 : f32 to vector<8x1xf32>
    %94 = arith.divf %92, %93 : vector<8x1xf32>
    %95 = vector.broadcast %94 : vector<8x1xf32> to vector<8x128xf32>
    %96 = arith.subf %86, %95 : vector<8x128xf32>
    %97 = arith.mulf %96, %96 : vector<8x128xf32>
    %cst_39 = arith.constant dense<0.000000e+00> : vector<8xf32>
    %98 = vector.multi_reduction <add>, %97, %cst_39 [1] : vector<8x128xf32> to vector<8xf32>
    %99 = vector.shape_cast %98 : vector<8xf32> to vector<8x1xf32>
    %cst_40 = arith.constant 1.280000e+02 : f32
    %100 = vector.broadcast %cst_40 : f32 to vector<8x1xf32>
    %101 = arith.divf %99, %100 : vector<8x1xf32>
    %cst_41 = arith.constant 9.99999974E-6 : f32
    %102 = vector.broadcast %cst_41 : f32 to vector<8x1xf32>
    %103 = arith.addf %101, %102 : vector<8x1xf32>
    %104 = math.rsqrt %103 : vector<8x1xf32>
    %105 = vector.broadcast %104 : vector<8x1xf32> to vector<8x128xf32>
    %106 = arith.mulf %96, %105 : vector<8x128xf32>
    %107 = vector.broadcast %88 : vector<1x128xf32> to vector<8x128xf32>
    %108 = arith.mulf %106, %107 : vector<8x128xf32>
    %109 = vector.broadcast %90 : vector<1x128xf32> to vector<8x128xf32>
    %110 = arith.addf %108, %109 : vector<8x128xf32>
    %111 = arith.truncf %110 : vector<8x128xf32> to vector<8x128xbf16>
    %c0_42 = arith.constant 0 : index
    %c0_43 = arith.constant 0 : index
    %c0_44 = arith.constant 0 : index
    %112 = vector.load %arg12[%c0_42, %c0_43, %c0_44] : memref<2x1x128xf32, #tpu.memory_space<vmem>>, vector<1x1x128xf32>
    %113 = vector.shape_cast %112 : vector<1x1x128xf32> to vector<1x128xf32>
    %c0_45 = arith.constant 0 : index
    %c0_46 = arith.constant 0 : index
    %c0_47 = arith.constant 0 : index
    %114 = vector.load %arg9[%c0_45, %c0_46, %c0_47] : memref<2x128x2048xbf16, #tpu.memory_space<vmem>>, vector<1x128x1024xbf16>
    %115 = vector.shape_cast %114 : vector<1x128x1024xbf16> to vector<128x1024xbf16>
    %cst_48 = arith.constant dense<0.000000e+00> : vector<8x1024xf32>
    %116 = tpu.matmul %111, %115, %cst_48 {dimension_numbers = #tpu.dot_dimension_numbers<[1], [0], [0], [1], [0, 0, 1, 1], [], []>} : vector<8x128xbf16>, vector<128x1024xbf16>, vector<8x1024xf32> -> vector<8x1024xf32>
    %c0_49 = arith.constant 0 : index
    %c0_50 = arith.constant 0 : index
    %c0_51 = arith.constant 0 : index
    %117 = vector.load %arg10[%c0_49, %c0_50, %c0_51] : memref<2x1x2048xf32, #tpu.memory_space<vmem>>, vector<1x1x1024xf32>
    %118 = vector.shape_cast %117 : vector<1x1x1024xf32> to vector<1x1024xf32>
    %119 = vector.broadcast %118 : vector<1x1024xf32> to vector<8x1024xf32>
    %120 = arith.addf %116, %119 : vector<8x1024xf32>
    %cst_52 = arith.constant 0.000000e+00 : f32
    %121 = vector.broadcast %cst_52 : f32 to vector<8x1024xf32>
    %122 = arith.maximumf %120, %121 : vector<8x1024xf32>
    %123 = arith.truncf %122 : vector<8x1024xf32> to vector<8x1024xbf16>
    %c0_53 = arith.constant 0 : index
    %c0_54 = arith.constant 0 : index
    %c0_55 = arith.constant 0 : index
    %124 = vector.load %arg11[%c0_53, %c0_54, %c0_55] : memref<2x2048x128xbf16, #tpu.memory_space<vmem>>, vector<1x1024x128xbf16>
    %125 = vector.shape_cast %124 : vector<1x1024x128xbf16> to vector<1024x128xbf16>
    %cst_56 = arith.constant dense<0.000000e+00> : vector<8x128xf32>
    %126 = tpu.matmul %123, %125, %cst_56 {dimension_numbers = #tpu.dot_dimension_numbers<[1], [0], [0], [1], [0, 0, 1, 1], [], []>} : vector<8x1024xbf16>, vector<1024x128xbf16>, vector<8x128xf32> -> vector<8x128xf32>
    %127 = vector.broadcast %113 : vector<1x128xf32> to vector<8x128xf32>
    %128 = arith.addf %127, %126 : vector<8x128xf32>
    %c0_57 = arith.constant 0 : index
    %c0_58 = arith.constant 0 : index
    %c1024 = arith.constant 1024 : index
    %129 = vector.load %arg9[%c0_57, %c0_58, %c1024] : memref<2x128x2048xbf16, #tpu.memory_space<vmem>>, vector<1x128x1024xbf16>
    %130 = vector.shape_cast %129 : vector<1x128x1024xbf16> to vector<128x1024xbf16>
    %cst_59 = arith.constant dense<0.000000e+00> : vector<8x1024xf32>
    %131 = tpu.matmul %111, %130, %cst_59 {dimension_numbers = #tpu.dot_dimension_numbers<[1], [0], [0], [1], [0, 0, 1, 1], [], []>} : vector<8x128xbf16>, vector<128x1024xbf16>, vector<8x1024xf32> -> vector<8x1024xf32>
    %c0_60 = arith.constant 0 : index
    %c0_61 = arith.constant 0 : index
    %c1024_62 = arith.constant 1024 : index
    %132 = vector.load %arg10[%c0_60, %c0_61, %c1024_62] : memref<2x1x2048xf32, #tpu.memory_space<vmem>>, vector<1x1x1024xf32>
    %133 = vector.shape_cast %132 : vector<1x1x1024xf32> to vector<1x1024xf32>
    %134 = vector.broadcast %133 : vector<1x1024xf32> to vector<8x1024xf32>
    %135 = arith.addf %131, %134 : vector<8x1024xf32>
    %cst_63 = arith.constant 0.000000e+00 : f32
    %136 = vector.broadcast %cst_63 : f32 to vector<8x1024xf32>
    %137 = arith.maximumf %135, %136 : vector<8x1024xf32>
    %138 = arith.truncf %137 : vector<8x1024xf32> to vector<8x1024xbf16>
    %c0_64 = arith.constant 0 : index
    %c1024_65 = arith.constant 1024 : index
    %c0_66 = arith.constant 0 : index
    %139 = vector.load %arg11[%c0_64, %c1024_65, %c0_66] : memref<2x2048x128xbf16, #tpu.memory_space<vmem>>, vector<1x1024x128xbf16>
    %140 = vector.shape_cast %139 : vector<1x1024x128xbf16> to vector<1024x128xbf16>
    %cst_67 = arith.constant dense<0.000000e+00> : vector<8x128xf32>
    %141 = tpu.matmul %138, %140, %cst_67 {dimension_numbers = #tpu.dot_dimension_numbers<[1], [0], [0], [1], [0, 0, 1, 1], [], []>} : vector<8x1024xbf16>, vector<1024x128xbf16>, vector<8x128xf32> -> vector<8x128xf32>
    %142 = arith.addf %128, %141 : vector<8x128xf32>
    %143 = arith.addf %110, %142 : vector<8x128xf32>
    %c0_68 = arith.constant 0 : index
    %c0_69 = arith.constant 0 : index
    %c0_70 = arith.constant 0 : index
    %144 = vector.load %arg15[%c0_68, %c0_69, %c0_70] : memref<2x1x128xf32, #tpu.memory_space<vmem>>, vector<1x1x128xf32>
    %145 = vector.shape_cast %144 : vector<1x1x128xf32> to vector<1x128xf32>
    %c0_71 = arith.constant 0 : index
    %c0_72 = arith.constant 0 : index
    %c0_73 = arith.constant 0 : index
    %146 = vector.load %arg16[%c0_71, %c0_72, %c0_73] : memref<2x1x128xf32, #tpu.memory_space<vmem>>, vector<1x1x128xf32>
    %147 = vector.shape_cast %146 : vector<1x1x128xf32> to vector<1x128xf32>
    %cst_74 = arith.constant dense<0.000000e+00> : vector<8xf32>
    %148 = vector.multi_reduction <add>, %143, %cst_74 [1] : vector<8x128xf32> to vector<8xf32>
    %149 = vector.shape_cast %148 : vector<8xf32> to vector<8x1xf32>
    %cst_75 = arith.constant 1.280000e+02 : f32
    %150 = vector.broadcast %cst_75 : f32 to vector<8x1xf32>
    %151 = arith.divf %149, %150 : vector<8x1xf32>
    %152 = vector.broadcast %151 : vector<8x1xf32> to vector<8x128xf32>
    %153 = arith.subf %143, %152 : vector<8x128xf32>
    %154 = arith.mulf %153, %153 : vector<8x128xf32>
    %cst_76 = arith.constant dense<0.000000e+00> : vector<8xf32>
    %155 = vector.multi_reduction <add>, %154, %cst_76 [1] : vector<8x128xf32> to vector<8xf32>
    %156 = vector.shape_cast %155 : vector<8xf32> to vector<8x1xf32>
    %cst_77 = arith.constant 1.280000e+02 : f32
    %157 = vector.broadcast %cst_77 : f32 to vector<8x1xf32>
    %158 = arith.divf %156, %157 : vector<8x1xf32>
    %cst_78 = arith.constant 9.99999974E-6 : f32
    %159 = vector.broadcast %cst_78 : f32 to vector<8x1xf32>
    %160 = arith.addf %158, %159 : vector<8x1xf32>
    %161 = math.rsqrt %160 : vector<8x1xf32>
    %162 = vector.broadcast %161 : vector<8x1xf32> to vector<8x128xf32>
    %163 = arith.mulf %153, %162 : vector<8x128xf32>
    %164 = vector.broadcast %145 : vector<1x128xf32> to vector<8x128xf32>
    %165 = arith.mulf %163, %164 : vector<8x128xf32>
    %166 = vector.broadcast %147 : vector<1x128xf32> to vector<8x128xf32>
    %167 = arith.addf %165, %166 : vector<8x128xf32>
    %168 = arith.truncf %167 : vector<8x128xf32> to vector<8x128xbf16>
    %c1 = arith.constant 1 : index
    %c0_79 = arith.constant 0 : index
    %c0_80 = arith.constant 0 : index
    %169 = vector.load %arg5[%c1, %c0_79, %c0_80] : memref<2x128x384xbf16, #tpu.memory_space<vmem>>, vector<1x128x384xbf16>
    %170 = vector.shape_cast %169 : vector<1x128x384xbf16> to vector<128x384xbf16>
    %cst_81 = arith.constant dense<0.000000e+00> : vector<8x384xf32>
    %171 = tpu.matmul %168, %170, %cst_81 {dimension_numbers = #tpu.dot_dimension_numbers<[1], [0], [0], [1], [0, 0, 1, 1], [], []>} : vector<8x128xbf16>, vector<128x384xbf16>, vector<8x384xf32> -> vector<8x384xf32>
    %c1_82 = arith.constant 1 : index
    %c0_83 = arith.constant 0 : index
    %c0_84 = arith.constant 0 : index
    %172 = vector.load %arg6[%c1_82, %c0_83, %c0_84] : memref<2x1x384xf32, #tpu.memory_space<vmem>>, vector<1x1x384xf32>
    %173 = vector.shape_cast %172 : vector<1x1x384xf32> to vector<1x384xf32>
    %174 = vector.broadcast %173 : vector<1x384xf32> to vector<8x384xf32>
    %175 = arith.addf %171, %174 : vector<8x384xf32>
    %176 = vector.extract_strided_slice %175 {offsets = [0, 0], sizes = [8, 128], strides = [1, 1]} : vector<8x384xf32> to vector<8x128xf32>
    %177 = arith.truncf %176 : vector<8x128xf32> to vector<8x128xbf16>
    %178 = vector.shape_cast %177 : vector<8x128xbf16> to vector<1x8x128xbf16>
    %179 = tpu.concatenate %178, %178, %178, %178, %178, %178, %178, %178 in 0 : vector<1x8x128xbf16>, vector<1x8x128xbf16>, vector<1x8x128xbf16>, vector<1x8x128xbf16>, vector<1x8x128xbf16>, vector<1x8x128xbf16>, vector<1x8x128xbf16>, vector<1x8x128xbf16> -> vector<8x8x128xbf16>
    %180 = vector.extract_strided_slice %175 {offsets = [0, 128], sizes = [8, 128], strides = [1, 1]} : vector<8x384xf32> to vector<8x128xf32>
    %181 = arith.truncf %180 : vector<8x128xf32> to vector<8x128xbf16>
    %182 = vector.shape_cast %181 : vector<8x128xbf16> to vector<1x8x128xbf16>
    %183 = tpu.concatenate %182, %182, %182, %182, %182, %182, %182, %182 in 0 : vector<1x8x128xbf16>, vector<1x8x128xbf16>, vector<1x8x128xbf16>, vector<1x8x128xbf16>, vector<1x8x128xbf16>, vector<1x8x128xbf16>, vector<1x8x128xbf16>, vector<1x8x128xbf16> -> vector<8x8x128xbf16>
    %184 = vector.broadcast %24 : vector<8x1x128xbf16> to vector<8x8x128xbf16>
    %185 = arith.mulf %183, %184 : vector<8x8x128xbf16>
    %186 = vector.extract_strided_slice %175 {offsets = [0, 256], sizes = [8, 128], strides = [1, 1]} : vector<8x384xf32> to vector<8x128xf32>
    %187 = arith.truncf %186 : vector<8x128xf32> to vector<8x128xbf16>
    %188 = vector.shape_cast %187 : vector<8x128xbf16> to vector<1x8x128xbf16>
    %189 = tpu.concatenate %188, %188, %188, %188, %188, %188, %188, %188 in 0 : vector<1x8x128xbf16>, vector<1x8x128xbf16>, vector<1x8x128xbf16>, vector<1x8x128xbf16>, vector<1x8x128xbf16>, vector<1x8x128xbf16>, vector<1x8x128xbf16>, vector<1x8x128xbf16> -> vector<8x8x128xbf16>
    %190 = vector.broadcast %24 : vector<8x1x128xbf16> to vector<8x8x128xbf16>
    %191 = arith.mulf %189, %190 : vector<8x8x128xbf16>
    "tpu.trace_start"() <{level = 10 : i32, message = "bqd,bkd->bqk"}> : () -> ()
    %cst_85 = arith.constant dense<0.000000e+00> : vector<8x8x8xf32>
    %192 = tpu.matmul %179, %185, %cst_85 {dimension_numbers = #tpu.dot_dimension_numbers<[2], [2], [1], [1], [0, 0, 0, 1, 1, 1], [0], [0]>} : vector<8x8x128xbf16>, vector<8x8x128xbf16>, vector<8x8x8xf32> -> vector<8x8x8xf32>
    "tpu.trace_stop"() : () -> ()
    %cst_86 = arith.constant dense<0xFF800000> : vector<8x8xf32>
    %193 = vector.multi_reduction <maximumf>, %192, %cst_86 [2] : vector<8x8x8xf32> to vector<8x8xf32>
    %194 = vector.shape_cast %193 : vector<8x8xf32> to vector<8x8x1xf32>
    %195 = vector.broadcast %194 : vector<8x8x1xf32> to vector<8x8x8xf32>
    %196 = arith.subf %192, %195 : vector<8x8x8xf32>
    %197 = math.exp %196 : vector<8x8x8xf32>
    %cst_87 = arith.constant dense<0.000000e+00> : vector<8x8xf32>
    %198 = vector.multi_reduction <add>, %197, %cst_87 [2] : vector<8x8x8xf32> to vector<8x8xf32>
    %199 = vector.shape_cast %198 : vector<8x8xf32> to vector<8x8x1xf32>
    %200 = tpu.reciprocal %199 {approx = true} : vector<8x8x1xf32> -> vector<8x8x1xf32>
    %201 = vector.broadcast %200 : vector<8x8x1xf32> to vector<8x8x8xf32>
    %202 = arith.mulf %197, %201 : vector<8x8x8xf32>
    %203 = arith.truncf %202 : vector<8x8x8xf32> to vector<8x8x8xbf16>
    "tpu.trace_start"() <{level = 10 : i32, message = "bqk,bkd->bqd"}> : () -> ()
    %cst_88 = arith.constant dense<0.000000e+00> : vector<8x8x128xf32>
    %204 = tpu.matmul %203, %191, %cst_88 {dimension_numbers = #tpu.dot_dimension_numbers<[2], [1], [1], [2], [0, 0, 0, 1, 1, 2], [0], [0]>} : vector<8x8x8xbf16>, vector<8x8x128xbf16>, vector<8x8x128xf32> -> vector<8x8x128xf32>
    "tpu.trace_stop"() : () -> ()
    %205 = vector.extract_strided_slice %204 {offsets = [0, 0, 0], sizes = [1, 8, 128], strides = [1, 1, 1]} : vector<8x8x128xf32> to vector<1x8x128xf32>
    %206 = vector.extract_strided_slice %204 {offsets = [1, 0, 0], sizes = [1, 8, 128], strides = [1, 1, 1]} : vector<8x8x128xf32> to vector<1x8x128xf32>
    %207 = arith.addf %205, %206 : vector<1x8x128xf32>
    %208 = vector.extract_strided_slice %204 {offsets = [2, 0, 0], sizes = [1, 8, 128], strides = [1, 1, 1]} : vector<8x8x128xf32> to vector<1x8x128xf32>
    %209 = arith.addf %207, %208 : vector<1x8x128xf32>
    %210 = vector.extract_strided_slice %204 {offsets = [3, 0, 0], sizes = [1, 8, 128], strides = [1, 1, 1]} : vector<8x8x128xf32> to vector<1x8x128xf32>
    %211 = arith.addf %209, %210 : vector<1x8x128xf32>
    %212 = vector.extract_strided_slice %204 {offsets = [4, 0, 0], sizes = [1, 8, 128], strides = [1, 1, 1]} : vector<8x8x128xf32> to vector<1x8x128xf32>
    %213 = arith.addf %211, %212 : vector<1x8x128xf32>
    %214 = vector.extract_strided_slice %204 {offsets = [5, 0, 0], sizes = [1, 8, 128], strides = [1, 1, 1]} : vector<8x8x128xf32> to vector<1x8x128xf32>
    %215 = arith.addf %213, %214 : vector<1x8x128xf32>
    %216 = vector.extract_strided_slice %204 {offsets = [6, 0, 0], sizes = [1, 8, 128], strides = [1, 1, 1]} : vector<8x8x128xf32> to vector<1x8x128xf32>
    %217 = arith.addf %215, %216 : vector<1x8x128xf32>
    %218 = vector.extract_strided_slice %204 {offsets = [7, 0, 0], sizes = [1, 8, 128], strides = [1, 1, 1]} : vector<8x8x128xf32> to vector<1x8x128xf32>
    %219 = arith.addf %217, %218 : vector<1x8x128xf32>
    %220 = vector.shape_cast %219 : vector<1x8x128xf32> to vector<8x128xf32>
    %221 = arith.truncf %220 : vector<8x128xf32> to vector<8x128xbf16>
    %c1_89 = arith.constant 1 : index
    %c0_90 = arith.constant 0 : index
    %c0_91 = arith.constant 0 : index
    %222 = vector.load %arg7[%c1_89, %c0_90, %c0_91] : memref<2x128x128xbf16, #tpu.memory_space<vmem>>, vector<1x128x128xbf16>
    %223 = vector.shape_cast %222 : vector<1x128x128xbf16> to vector<128x128xbf16>
    %cst_92 = arith.constant dense<0.000000e+00> : vector<8x128xf32>
    %224 = tpu.matmul %221, %223, %cst_92 {dimension_numbers = #tpu.dot_dimension_numbers<[1], [0], [0], [1], [0, 0, 1, 1], [], []>} : vector<8x128xbf16>, vector<128x128xbf16>, vector<8x128xf32> -> vector<8x128xf32>
    %c1_93 = arith.constant 1 : index
    %c0_94 = arith.constant 0 : index
    %c0_95 = arith.constant 0 : index
    %225 = vector.load %arg8[%c1_93, %c0_94, %c0_95] : memref<2x1x128xf32, #tpu.memory_space<vmem>>, vector<1x1x128xf32>
    %226 = vector.shape_cast %225 : vector<1x1x128xf32> to vector<1x128xf32>
    %227 = vector.broadcast %226 : vector<1x128xf32> to vector<8x128xf32>
    %228 = arith.addf %224, %227 : vector<8x128xf32>
    %229 = arith.addf %167, %228 : vector<8x128xf32>
    %c1_96 = arith.constant 1 : index
    %c0_97 = arith.constant 0 : index
    %c0_98 = arith.constant 0 : index
    %230 = vector.load %arg13[%c1_96, %c0_97, %c0_98] : memref<2x1x128xf32, #tpu.memory_space<vmem>>, vector<1x1x128xf32>
    %231 = vector.shape_cast %230 : vector<1x1x128xf32> to vector<1x128xf32>
    %c1_99 = arith.constant 1 : index
    %c0_100 = arith.constant 0 : index
    %c0_101 = arith.constant 0 : index
    %232 = vector.load %arg14[%c1_99, %c0_100, %c0_101] : memref<2x1x128xf32, #tpu.memory_space<vmem>>, vector<1x1x128xf32>
    %233 = vector.shape_cast %232 : vector<1x1x128xf32> to vector<1x128xf32>
    %cst_102 = arith.constant dense<0.000000e+00> : vector<8xf32>
    %234 = vector.multi_reduction <add>, %229, %cst_102 [1] : vector<8x128xf32> to vector<8xf32>
    %235 = vector.shape_cast %234 : vector<8xf32> to vector<8x1xf32>
    %cst_103 = arith.constant 1.280000e+02 : f32
    %236 = vector.broadcast %cst_103 : f32 to vector<8x1xf32>
    %237 = arith.divf %235, %236 : vector<8x1xf32>
    %238 = vector.broadcast %237 : vector<8x1xf32> to vector<8x128xf32>
    %239 = arith.subf %229, %238 : vector<8x128xf32>
    %240 = arith.mulf %239, %239 : vector<8x128xf32>
    %cst_104 = arith.constant dense<0.000000e+00> : vector<8xf32>
    %241 = vector.multi_reduction <add>, %240, %cst_104 [1] : vector<8x128xf32> to vector<8xf32>
    %242 = vector.shape_cast %241 : vector<8xf32> to vector<8x1xf32>
    %cst_105 = arith.constant 1.280000e+02 : f32
    %243 = vector.broadcast %cst_105 : f32 to vector<8x1xf32>
    %244 = arith.divf %242, %243 : vector<8x1xf32>
    %cst_106 = arith.constant 9.99999974E-6 : f32
    %245 = vector.broadcast %cst_106 : f32 to vector<8x1xf32>
    %246 = arith.addf %244, %245 : vector<8x1xf32>
    %247 = math.rsqrt %246 : vector<8x1xf32>
    %248 = vector.broadcast %247 : vector<8x1xf32> to vector<8x128xf32>
    %249 = arith.mulf %239, %248 : vector<8x128xf32>
    %250 = vector.broadcast %231 : vector<1x128xf32> to vector<8x128xf32>
    %251 = arith.mulf %249, %250 : vector<8x128xf32>
    %252 = vector.broadcast %233 : vector<1x128xf32> to vector<8x128xf32>
    %253 = arith.addf %251, %252 : vector<8x128xf32>
    %254 = arith.truncf %253 : vector<8x128xf32> to vector<8x128xbf16>
    %c1_107 = arith.constant 1 : index
    %c0_108 = arith.constant 0 : index
    %c0_109 = arith.constant 0 : index
    %255 = vector.load %arg12[%c1_107, %c0_108, %c0_109] : memref<2x1x128xf32, #tpu.memory_space<vmem>>, vector<1x1x128xf32>
    %256 = vector.shape_cast %255 : vector<1x1x128xf32> to vector<1x128xf32>
    %c1_110 = arith.constant 1 : index
    %c0_111 = arith.constant 0 : index
    %c0_112 = arith.constant 0 : index
    %257 = vector.load %arg9[%c1_110, %c0_111, %c0_112] : memref<2x128x2048xbf16, #tpu.memory_space<vmem>>, vector<1x128x1024xbf16>
    %258 = vector.shape_cast %257 : vector<1x128x1024xbf16> to vector<128x1024xbf16>
    %cst_113 = arith.constant dense<0.000000e+00> : vector<8x1024xf32>
    %259 = tpu.matmul %254, %258, %cst_113 {dimension_numbers = #tpu.dot_dimension_numbers<[1], [0], [0], [1], [0, 0, 1, 1], [], []>} : vector<8x128xbf16>, vector<128x1024xbf16>, vector<8x1024xf32> -> vector<8x1024xf32>
    %c1_114 = arith.constant 1 : index
    %c0_115 = arith.constant 0 : index
    %c0_116 = arith.constant 0 : index
    %260 = vector.load %arg10[%c1_114, %c0_115, %c0_116] : memref<2x1x2048xf32, #tpu.memory_space<vmem>>, vector<1x1x1024xf32>
    %261 = vector.shape_cast %260 : vector<1x1x1024xf32> to vector<1x1024xf32>
    %262 = vector.broadcast %261 : vector<1x1024xf32> to vector<8x1024xf32>
    %263 = arith.addf %259, %262 : vector<8x1024xf32>
    %cst_117 = arith.constant 0.000000e+00 : f32
    %264 = vector.broadcast %cst_117 : f32 to vector<8x1024xf32>
    %265 = arith.maximumf %263, %264 : vector<8x1024xf32>
    %266 = arith.truncf %265 : vector<8x1024xf32> to vector<8x1024xbf16>
    %c1_118 = arith.constant 1 : index
    %c0_119 = arith.constant 0 : index
    %c0_120 = arith.constant 0 : index
    %267 = vector.load %arg11[%c1_118, %c0_119, %c0_120] : memref<2x2048x128xbf16, #tpu.memory_space<vmem>>, vector<1x1024x128xbf16>
    %268 = vector.shape_cast %267 : vector<1x1024x128xbf16> to vector<1024x128xbf16>
    %cst_121 = arith.constant dense<0.000000e+00> : vector<8x128xf32>
    %269 = tpu.matmul %266, %268, %cst_121 {dimension_numbers = #tpu.dot_dimension_numbers<[1], [0], [0], [1], [0, 0, 1, 1], [], []>} : vector<8x1024xbf16>, vector<1024x128xbf16>, vector<8x128xf32> -> vector<8x128xf32>
    %270 = vector.broadcast %256 : vector<1x128xf32> to vector<8x128xf32>
    %271 = arith.addf %270, %269 : vector<8x128xf32>
    %c1_122 = arith.constant 1 : index
    %c0_123 = arith.constant 0 : index
    %c1024_124 = arith.constant 1024 : index
    %272 = vector.load %arg9[%c1_122, %c0_123, %c1024_124] : memref<2x128x2048xbf16, #tpu.memory_space<vmem>>, vector<1x128x1024xbf16>
    %273 = vector.shape_cast %272 : vector<1x128x1024xbf16> to vector<128x1024xbf16>
    %cst_125 = arith.constant dense<0.000000e+00> : vector<8x1024xf32>
    %274 = tpu.matmul %254, %273, %cst_125 {dimension_numbers = #tpu.dot_dimension_numbers<[1], [0], [0], [1], [0, 0, 1, 1], [], []>} : vector<8x128xbf16>, vector<128x1024xbf16>, vector<8x1024xf32> -> vector<8x1024xf32>
    %c1_126 = arith.constant 1 : index
    %c0_127 = arith.constant 0 : index
    %c1024_128 = arith.constant 1024 : index
    %275 = vector.load %arg10[%c1_126, %c0_127, %c1024_128] : memref<2x1x2048xf32, #tpu.memory_space<vmem>>, vector<1x1x1024xf32>
    %276 = vector.shape_cast %275 : vector<1x1x1024xf32> to vector<1x1024xf32>
    %277 = vector.broadcast %276 : vector<1x1024xf32> to vector<8x1024xf32>
    %278 = arith.addf %274, %277 : vector<8x1024xf32>
    %cst_129 = arith.constant 0.000000e+00 : f32
    %279 = vector.broadcast %cst_129 : f32 to vector<8x1024xf32>
    %280 = arith.maximumf %278, %279 : vector<8x1024xf32>
    %281 = arith.truncf %280 : vector<8x1024xf32> to vector<8x1024xbf16>
    %c1_130 = arith.constant 1 : index
    %c1024_131 = arith.constant 1024 : index
    %c0_132 = arith.constant 0 : index
    %282 = vector.load %arg11[%c1_130, %c1024_131, %c0_132] : memref<2x2048x128xbf16, #tpu.memory_space<vmem>>, vector<1x1024x128xbf16>
    %283 = vector.shape_cast %282 : vector<1x1024x128xbf16> to vector<1024x128xbf16>
    %cst_133 = arith.constant dense<0.000000e+00> : vector<8x128xf32>
    %284 = tpu.matmul %281, %283, %cst_133 {dimension_numbers = #tpu.dot_dimension_numbers<[1], [0], [0], [1], [0, 0, 1, 1], [], []>} : vector<8x1024xbf16>, vector<1024x128xbf16>, vector<8x128xf32> -> vector<8x128xf32>
    %285 = arith.addf %271, %284 : vector<8x128xf32>
    %286 = arith.addf %253, %285 : vector<8x128xf32>
    %c1_134 = arith.constant 1 : index
    %c0_135 = arith.constant 0 : index
    %c0_136 = arith.constant 0 : index
    %287 = vector.load %arg15[%c1_134, %c0_135, %c0_136] : memref<2x1x128xf32, #tpu.memory_space<vmem>>, vector<1x1x128xf32>
    %288 = vector.shape_cast %287 : vector<1x1x128xf32> to vector<1x128xf32>
    %c1_137 = arith.constant 1 : index
    %c0_138 = arith.constant 0 : index
    %c0_139 = arith.constant 0 : index
    %289 = vector.load %arg16[%c1_137, %c0_138, %c0_139] : memref<2x1x128xf32, #tpu.memory_space<vmem>>, vector<1x1x128xf32>
    %290 = vector.shape_cast %289 : vector<1x1x128xf32> to vector<1x128xf32>
    %cst_140 = arith.constant dense<0.000000e+00> : vector<8xf32>
    %291 = vector.multi_reduction <add>, %286, %cst_140 [1] : vector<8x128xf32> to vector<8xf32>
    %292 = vector.shape_cast %291 : vector<8xf32> to vector<8x1xf32>
    %cst_141 = arith.constant 1.280000e+02 : f32
    %293 = vector.broadcast %cst_141 : f32 to vector<8x1xf32>
    %294 = arith.divf %292, %293 : vector<8x1xf32>
    %295 = vector.broadcast %294 : vector<8x1xf32> to vector<8x128xf32>
    %296 = arith.subf %286, %295 : vector<8x128xf32>
    %297 = arith.mulf %296, %296 : vector<8x128xf32>
    %cst_142 = arith.constant dense<0.000000e+00> : vector<8xf32>
    %298 = vector.multi_reduction <add>, %297, %cst_142 [1] : vector<8x128xf32> to vector<8xf32>
    %299 = vector.shape_cast %298 : vector<8xf32> to vector<8x1xf32>
    %cst_143 = arith.constant 1.280000e+02 : f32
    %300 = vector.broadcast %cst_143 : f32 to vector<8x1xf32>
    %301 = arith.divf %299, %300 : vector<8x1xf32>
    %cst_144 = arith.constant 9.99999974E-6 : f32
    %302 = vector.broadcast %cst_144 : f32 to vector<8x1xf32>
    %303 = arith.addf %301, %302 : vector<8x1xf32>
    %304 = math.rsqrt %303 : vector<8x1xf32>
    %305 = vector.broadcast %304 : vector<8x1xf32> to vector<8x128xf32>
    %306 = arith.mulf %296, %305 : vector<8x128xf32>
    %307 = vector.broadcast %288 : vector<1x128xf32> to vector<8x128xf32>
    %308 = arith.mulf %306, %307 : vector<8x128xf32>
    %309 = vector.broadcast %290 : vector<1x128xf32> to vector<8x128xf32>
    %310 = arith.addf %308, %309 : vector<8x128xf32>
    %311 = vector.shape_cast %310 : vector<8x128xf32> to vector<1x8x128xf32>
    %c0_145 = arith.constant 0 : index
    %c0_146 = arith.constant 0 : index
    %c0_147 = arith.constant 0 : index
    %312 = vector.load %arg17[%c0_145, %c0_146, %c0_147] : memref<1x8x128xf32, #tpu.memory_space<vmem>>, vector<1x8x128xf32>
    tpu.vector_store %arg17[%c0_145, %c0_146, %c0_147], %311 {strides = array<i32>} : memref<1x8x128xf32, #tpu.memory_space<vmem>>, vector<1x8x128xf32>,
    return
  }
  func.func @transform_0(%arg0: i32) -> (i32, i32, i32) {
    %c0_i32 = arith.constant 0 : i32
    %c0_i32_0 = arith.constant 0 : i32
    %c0_i32_1 = arith.constant 0 : i32
    return %arg0, %c0_i32, %c0_i32_0 : i32, i32, i32
  }
  func.func @transform_1(%arg0: i32) -> (i32, i32, i32) {
    %c0_i32 = arith.constant 0 : i32
    %c0_i32_0 = arith.constant 0 : i32
    %c0_i32_1 = arith.constant 0 : i32
    %c0_i32_2 = arith.constant 0 : i32
    return %c0_i32, %c0_i32_0, %c0_i32_1 : i32, i32, i32
  }
  func.func @transform_2(%arg0: i32) -> (i32, i32) {
    %c0_i32 = arith.constant 0 : i32
    %c0_i32_0 = arith.constant 0 : i32
    %c0_i32_1 = arith.constant 0 : i32
    return %c0_i32, %c0_i32_0 : i32, i32
  }
  func.func @transform_3(%arg0: i32) -> (i32, i32) {
    %c0_i32 = arith.constant 0 : i32
    %c0_i32_0 = arith.constant 0 : i32
    %c0_i32_1 = arith.constant 0 : i32
    return %c0_i32, %c0_i32_0 : i32, i32
  }
  func.func @transform_4(%arg0: i32) -> (i32, i32, i32) {
    %c0_i32 = arith.constant 0 : i32
    %c0_i32_0 = arith.constant 0 : i32
    %c0_i32_1 = arith.constant 0 : i32
    %c0_i32_2 = arith.constant 0 : i32
    return %c0_i32, %c0_i32_0, %c0_i32_1 : i32, i32, i32
  }
  func.func @transform_5(%arg0: i32) -> (i32, i32, i32) {
    %c0_i32 = arith.constant 0 : i32
    %c0_i32_0 = arith.constant 0 : i32
    %c0_i32_1 = arith.constant 0 : i32
    %c0_i32_2 = arith.constant 0 : i32
    return %c0_i32, %c0_i32_0, %c0_i32_1 : i32, i32, i32
  }
  func.func @transform_6(%arg0: i32) -> (i32, i32, i32) {
    %c0_i32 = arith.constant 0 : i32
    %c0_i32_0 = arith.constant 0 : i32
    %c0_i32_1 = arith.constant 0 : i32
    %c0_i32_2 = arith.constant 0 : i32
    return %c0_i32, %c0_i32_0, %c0_i32_1 : i32, i32, i32
  }
  func.func @transform_7(%arg0: i32) -> (i32, i32, i32) {
    %c0_i32 = arith.constant 0 : i32
    %c0_i32_0 = arith.constant 0 : i32
    %c0_i32_1 = arith.constant 0 : i32
    %c0_i32_2 = arith.constant 0 : i32
    return %c0_i32, %c0_i32_0, %c0_i32_1 : i32, i32, i32
  }
  func.func @transform_8(%arg0: i32) -> (i32, i32, i32) {
    %c0_i32 = arith.constant 0 : i32
    %c0_i32_0 = arith.constant 0 : i32
    %c0_i32_1 = arith.constant 0 : i32
    %c0_i32_2 = arith.constant 0 : i32
    return %c0_i32, %c0_i32_0, %c0_i32_1 : i32, i32, i32
  }
  func.func @transform_9(%arg0: i32) -> (i32, i32, i32) {
    %c0_i32 = arith.constant 0 : i32
    %c0_i32_0 = arith.constant 0 : i32
    %c0_i32_1 = arith.constant 0 : i32
    %c0_i32_2 = arith.constant 0 : i32
    return %c0_i32, %c0_i32_0, %c0_i32_1 : i32, i32, i32
  }
  func.func @transform_10(%arg0: i32) -> (i32, i32, i32) {
    %c0_i32 = arith.constant 0 : i32
    %c0_i32_0 = arith.constant 0 : i32
    %c0_i32_1 = arith.constant 0 : i32
    %c0_i32_2 = arith.constant 0 : i32
    return %c0_i32, %c0_i32_0, %c0_i32_1 : i32, i32, i32
  }
  func.func @transform_11(%arg0: i32) -> (i32, i32, i32) {
    %c0_i32 = arith.constant 0 : i32
    %c0_i32_0 = arith.constant 0 : i32
    %c0_i32_1 = arith.constant 0 : i32
    %c0_i32_2 = arith.constant 0 : i32
    return %c0_i32, %c0_i32_0, %c0_i32_1 : i32, i32, i32
  }
  func.func @transform_12(%arg0: i32) -> (i32, i32, i32) {
    %c0_i32 = arith.constant 0 : i32
    %c0_i32_0 = arith.constant 0 : i32
    %c0_i32_1 = arith.constant 0 : i32
    %c0_i32_2 = arith.constant 0 : i32
    return %c0_i32, %c0_i32_0, %c0_i32_1 : i32, i32, i32
  }
  func.func @transform_13(%arg0: i32) -> (i32, i32, i32) {
    %c0_i32 = arith.constant 0 : i32
    %c0_i32_0 = arith.constant 0 : i32
    %c0_i32_1 = arith.constant 0 : i32
    %c0_i32_2 = arith.constant 0 : i32
    return %c0_i32, %c0_i32_0, %c0_i32_1 : i32, i32, i32
  }
  func.func @transform_14(%arg0: i32) -> (i32, i32, i32) {
    %c0_i32 = arith.constant 0 : i32
    %c0_i32_0 = arith.constant 0 : i32
    %c0_i32_1 = arith.constant 0 : i32
    %c0_i32_2 = arith.constant 0 : i32
    return %c0_i32, %c0_i32_0, %c0_i32_1 : i32, i32, i32
  }
  func.func @transform_15(%arg0: i32) -> (i32, i32, i32) {
    %c0_i32 = arith.constant 0 : i32
    %c0_i32_0 = arith.constant 0 : i32
    %c0_i32_1 = arith.constant 0 : i32
    %c0_i32_2 = arith.constant 0 : i32
    return %c0_i32, %c0_i32_0, %c0_i32_1 : i32, i32, i32
  }
  func.func @transform_16(%arg0: i32) -> (i32, i32, i32) {
    %c0_i32 = arith.constant 0 : i32
    %c0_i32_0 = arith.constant 0 : i32
    %c0_i32_1 = arith.constant 0 : i32
    return %arg0, %c0_i32, %c0_i32_0 : i32, i32, i32
  }
}

</mosaic_0001>

<bundles_post_ra>
// kernel: tpu_custom_call.1
= control target key start
LH: loop header
LB: loop body
LE: loop exit
PB: predicated region body
PF: predicated region fallthrough
CT: control target
= control target key end

     0   :  { %s11069_s0 = inlined_call_operand.hbm [shape: f32[2,8,128], index: 0, kind: input, shape index: {}]   ;;  %s11070_s1 = inlined_call_operand.vmem [shape: bf16[8,1,128], index: 1, kind: input, shape index: {}]   ;;  %s11071_s2 = inlined_call_operand.hbm [shape: f32[1,128], index: 2, kind: input, shape index: {}]   ;;  %s11072_s3 = inlined_call_operand.hbm [shape: f32[1,128], index: 3, kind: input, shape index: {}]   ;;  %s11073_s4 = inlined_call_operand.hbm [shape: bf16[2,128,384], index: 4, kind: input, shape index: {}]   ;;  %s11074_s5 = inlined_call_operand.vmem [shape: f32[2,1,384], index: 5, kind: input, shape index: {}]   ;;  %s11075_s6 = inlined_call_operand.hbm [shape: bf16[2,128,128], index: 6, kind: input, shape index: {}]   ;;  %s11076_s7 = inlined_call_operand.vmem [shape: f32[2,1,128], index: 7, kind: input, shape index: {}]   ;;  %s11077_s8 = inlined_call_operand.hbm [shape: bf16[2,128,2048], index: 8, kind: input, shape index: {}]   ;;  %s11078_s9 = inlined_call_operand.hbm [shape: f32[2,1,2048], index: 9, kind: input, shape index: {}]   ;;  %s11079_s10 = inlined_call_operand.hbm [shape: bf16[2,2048,128], index: 10, kind: input, shape index: {}]   ;;  %s11080_s11 = inlined_call_operand.vmem [shape: f32[2,1,128], index: 11, kind: input, shape index: {}]   ;;  %s11081_s12 = inlined_call_operand.vmem [shape: f32[2,1,128], index: 12, kind: input, shape index: {}]   ;;  %s11082_s13 = inlined_call_operand.vmem [shape: f32[2,1,128], index: 13, kind: input, shape index: {}]   ;;  %s11083_s14 = inlined_call_operand.vmem [shape: f32[2,1,128], index: 14, kind: input, shape index: {}]   ;;  %s11084_s15 = inlined_call_operand.vmem [shape: f32[2,1,128], index: 15, kind: input, shape index: {}]   ;;  %s11085_s16 = inlined_call_operand.hbm [shape: f32[2,8,128], index: 16, kind: output, shape index: {}]  }
   0x1   :  { %11092 = sst [smem:[#allocation23_spill]] %s11069_s0 }
   0x2   :  { %11093 = sst [smem:[#allocation24_spill]] %s11070_s1 }
   0x3   :  { %11094 = sst [smem:[#allocation25_spill]] %s11071_s2 }
   0x4   :  { %11095 = sst [smem:[#allocation26_spill]] %s11072_s3 }
   0x5   :  { %11096 = sst [smem:[#allocation27_spill]] %s11073_s4 }
   0x6   :  { %11097 = sst [smem:[#allocation28_spill]] %s11075_s6 }
   0x7   :  { %11098 = sst [smem:[#allocation29_spill]] %s11077_s8 }
   0x8   :  { %11099 = sst [smem:[#allocation30_spill]] %s11078_s9 }
   0x9   :  { %11100 = sst [smem:[#allocation31_spill]] %s11080_s11 }
   0xa   :  { %11101 = sst [smem:[#allocation32_spill]] %s11082_s13 }
   0xb   :  { %11102 = sst [smem:[#allocation33_spill]] %s11083_s14 }
   0xc   :  { %11103 = sst [smem:[#allocation34_spill]] %s11084_s15 }
   0xd   :  { %11104 = sst [smem:[#allocation35_spill]] %s11085_s16 }
   0xe   :  { %21 = vsyncpa [#allocation3], 0 }
   0xf   :  { %23 = vsyncpa [#allocation3 + $0x1], 0 }
  0x10   :  { %24 = vsyncpa [#allocation6], 0 }
  0x11   :  { %25 = vsyncpa [#allocation9], 0 }
  0x12   :  { %26 = vsyncpa [#allocation12], 0 }
  0x13   :  { %27 = vsyncpa [#allocation15], 0 }
  0x14   :  { %28 = vsyncpa [#allocation4], 0 }
  0x15   :  { %30 = vsyncpa [#allocation4 + $0x1], 0  ;;  %s10536_s21 = smov 0   ;;  %s10538_s22 = smov 0  }
  0x16   :  { %s10540_s23 = smov 0   ;;  %s10542_s24 = smov 0  }
  0x17 LB: > { %s11105_s2 = sld [smem:[#allocation25_spill]]  ;;  %s10560_s28 = sadd.s32 4294967295, %s10434_s24   ;;  %s10434_s24 = sphi %s10542_s24, %s11129_s24   ;;  %s10430_s23 = sphi %s10540_s23, %s11128_s23   ;;  %s10426_s22 = sphi %s10538_s22, %s11127_s22   ;;  %s10422_s21 = sphi %s10536_s21, %s11126_s21  }
  0x18   : > { %p6969_p0 = scmp.ge.s32.totalorder %s10434_s24, 1  ;;  %p57_p1 = scmp.eq.s32.totalorder %s10560_s28, 0 }
  0x19   : > { %p408_p2 = scmp.lt.s32.totalorder %s10434_s24, 3  ;;  %s10436_s30 = smov [#allocation5]  }
  0x1a   : > { %s425_s0 = sshll.u32 %s10436_s30, 4  ;;  %s11107_s4 = sld [smem:[#allocation27_spill]]  ;;  %s426_s0 = int_to_ptr.vmem [resolvable:$true] %s425_s0 }
  0x1b   : > { %p10565_p3 = pnand %p6969_p0, %p408_p2  ;;  %s10437_s25 = smov [#allocation8]  }
  0x1c   : > { %s448_s26 = sshll.u32 %s10437_s25, 4  ;;  %s10438_s30 = smov 192   ;;  %s449_s26 = int_to_ptr.vmem [resolvable:$true] %s448_s26 }
  0x1d   : > { %s423_s27 = sshll.u32 %s11105_s2, 4  ;;  %p9929_p5 = pneg %p10565_p3  ;;  %s424_s27 = int_to_ptr.hbm [resolvable:$true] %s423_s27 }
  0x1e   : > { %s10439_s2 = smov 12   ;;  %s11109_s8 = sld [smem:[#allocation29_spill]] }
  0x1f   : > { %p10577_p6 = pnand %p9929_p5, %p57_p1  ;;  %s10440_s16 = smov [#allocation11]  }
  0x20   : > { %s446_s19 = sshll.u32 %s11107_s4, 4  ;;  %s482_s15 = sshll.u32 %s10440_s16, 4  ;;  %s447_s19 = int_to_ptr.hbm [resolvable:$true] %s446_s19  ;;  %s483_s15 = int_to_ptr.vmem [resolvable:$true] %s482_s15 }
  0x21   : > { %9932 = dma.hbm_to_vmem [thread:$0]  (!%p10577_p6), %s424_s27, 16, %s426_s0, [#allocation6]  }
  0x22   : > { %9938 = dma.hbm_to_vmem [thread:$0]  (!%p10577_p6), %s447_s19, 6144, %s449_s26, [#allocation9], %s10438_s30, %s10438_s30, %s10439_s2  }
  0x23   : > { %s11110_s3 = sld [smem:[#allocation26_spill]]  ;;  %s10441_s13 = smov 1024  }
  0x24   : > { %s480_s4 = sshll.u32 %s11109_s8, 4  ;;  %s10442_s27 = smov 64   ;;  %s481_s4 = int_to_ptr.hbm [resolvable:$true] %s480_s4 }
  0x25   : > { %9944 = dma.hbm_to_vmem [thread:$0]  (!%p10577_p6), %s481_s4, 32768, %s483_s15, [#allocation12], %s10441_s13, %s10441_s13, %s10442_s27  }
  0x26   : > { %s10443_s2 = smov [#allocation7]   ;;  %s11111_s6 = sld [smem:[#allocation28_spill]] }
  0x27   : > { %s437_s0 = sshll.u32 %s10443_s2, 4  ;;  %s10444_s11 = smov [#allocation10]   ;;  %s438_s0 = int_to_ptr.vmem [resolvable:$true] %s437_s0 }
  0x28   : > { %s465_s14 = sshll.u32 %s10444_s11, 4  ;;  %s11112_s9 = sld [smem:[#allocation30_spill]]  ;;  %s466_s14 = int_to_ptr.vmem [resolvable:$true] %s465_s14 }
  0x29   : > { %s435_s25 = sshll.u32 %s11110_s3, 4  ;;  %s10445_s4 = smov 4   ;;  %s436_s25 = int_to_ptr.hbm [resolvable:$true] %s435_s25 }
  0x2a   : > { %9935 = dma.hbm_to_vmem [thread:$0]  (!%p10577_p6), %s436_s25, 16, %s438_s0, [#allocation6]  }
  0x2b   : > { %s10446_s13 = smov [#allocation13]   ;;  %s508_s0 = sshll.u32 %s11079_s10, 4  ;;  %s509_s0 = int_to_ptr.hbm [resolvable:$true] %s508_s0 }
  0x2c   : > { %s463_s30 = sshll.u32 %s11111_s6, 4  ;;  %s496_s15 = sshll.u32 %s10446_s13, 4  ;;  %s464_s30 = int_to_ptr.hbm [resolvable:$true] %s463_s30  ;;  %s497_s15 = int_to_ptr.vmem [resolvable:$true] %s496_s15 }
  0x2d   : > { %9941 = dma.hbm_to_vmem [thread:$0]  (!%p10577_p6), %s464_s30, 2048, %s466_s14, [#allocation9], %s10442_s27, %s10442_s27, %s10445_s4  }
  0x2e   : > { %s494_s18 = sshll.u32 %s11112_s9, 4  ;;  %s10447_s19 = smov 256   ;;  %s495_s18 = int_to_ptr.hbm [resolvable:$true] %s494_s18 }
  0x2f   : > { %s10448_s26 = smov 16   ;;  %s10449_s30 = smov [#allocation14]  }
  0x30   : > { %9947 = dma.hbm_to_vmem [thread:$0]  (!%p10577_p6), %s495_s18, 512, %s497_s15, [#allocation12], %s10447_s19, %s10447_s19, %s10448_s26  }
  0x31   : > { %s510_s11 = sshll.u32 %s10449_s30, 4  ;;  %s6968_s14 = sadd.s32 4294967294, %s10434_s24   ;;  %s511_s11 = int_to_ptr.vmem [resolvable:$true] %s510_s11 }
  0x32   : > { %9950 = dma.hbm_to_vmem [thread:$0]  (!%p10577_p6), %s509_s0, 32768, %s511_s11, [#allocation15], %s10442_s27, %s10442_s27, %s10445_s4  }
  0x33   : > { %s10617_s16 = sadd.s32 1, %s10434_s24   ;;  %s43_s13 = sadd.s32 1, %s10430_s23 }
  0x34   : > { %s40_s17 = ssub.s32 %s10434_s24, %s10617_s16  ;;  %p50_p8 = scmp.ne.s32.totalorder %s10430_s23, %s10426_s22 }
  0x35   : > { %p41_p7 = scmp.eq.s32.totalorder %s40_s17, 0  ;;  %p51_p9 = scmp.eq.s32.totalorder %s10434_s24, 0 }
  0x36   : > { %p56_p10 = scmp.ne.s32.totalorder %s10426_s22, %s10422_s21  ;;  %p395_p13 = scmp.eq.s32.totalorder %s10560_s28, 1 }
  0x37   : > { %s10628_s18 = scalar_select %p41_p7, %s10430_s23, %s43_s13  }
  0x38   : > { %p10630_p11 = por %p51_p9, %p50_p8  ;;  %p10636_p12 = por %p57_p1, %p56_p10 }
  0x39   : > { %p401_p0 = scmp.eq.s32.totalorder %s6968_s14, 1  ;;  %p9966_p2 = scmp.lt.s32.totalorder %s10434_s24, 2 }
  0x3a   : > { %s539_s27 = sand.u32 1, %s10430_s23   ;;  %p10643_p5 = por %p395_p13, %p50_p8 }
  0x3b   : > { %p10647_p6 = por %p401_p0, %p56_p10  ;;  %s6978_s2 = sshll.u32 %s539_s27, 3 }
  0x3c   : > { %s6979_s0 = sshll.u32 %s10434_s24, 3  ;;  %s11117_s30 = sld [smem:[#allocation23_spill]] }
  0x3d   : > { %s543_s17 = scalar_lea.vmem [#allocation2], %s6978_s2  ;;  %p10657_p7 = pnand %p9966_p2, %p10630_p11 }
  0x3e   : > { %s551_s13 = sshll.u32 %s543_s17, 4  ;;  %s540_s6 = scalar_lea.sflag [#allocation3], %s539_s27  ;;  %s552_s13 = int_to_ptr.vmem [resolvable:$true] %s551_s13 }
  0x3f   : > { %p10326_p9 = pneg %p10657_p7 }
  0x42   : > { %s547_s11 = scalar_lea.hbm %s11117_s30, %s6979_s0  ;;  %s10329_s19 = scalar_lea.hbm %s11117_s30, 16 }
  0x43   : > { %s549_s3 = sshll.u32 %s547_s11, 4  ;;  %s550_s3 = int_to_ptr.hbm [resolvable:$true] %s549_s3 }
  0x44   : > { %s10322_s8 = sshra.s32 %s550_s3, 4  ;;  %s10323_s8 = int_to_ptr.hbm [resolvable:$true] %s10322_s8 }
  0x45   : > { %s10324_s9 = scalar_lea.hbm %s10323_s8, 8  ;;  %p10330_p11 = scmp.lt.s32.totalorder %s10323_s8, %s11117_s30 }
  0x46   : > { %p10325_p8 = scmp.ne.s32.totalorder %s10323_s8, %s10324_s9  ;;  %p10331_p0 = scmp.lt.s32.totalorder %s10329_s19, %s10324_s9 }
  0x48   : > { %p10327_p10 = pnand %p10326_p9, %p10325_p8  ;;  %p10332_p2 = por %p10331_p0, %p10330_p11 }
  0x4a   : > { %p10328_p13 = pneg %p10327_p10 }
  0x4c   : > { %p10333_p4 = pnand %p10332_p2, %p10328_p13 }
  0x4e   : > { %10336 = shalt.err (!%p10333_p4)
}
  0x4f   : > { %9954 = dma.hbm_to_vmem [thread:$0]  (!%p10657_p7), %s550_s3, 128, %s552_s13, %s540_s6  }
  0x50   : > { %560 = sbr.rel (%p10565_p3) target bundleno = 4078 (0xfee), region = 84  ;;  %s10674_s27 = sand.u32 (!%p10565_p3), 1, %s10426_s22  }
  0x51   : > { %s6981_s11 = sshll.u32 (!%p10565_p3), %s10674_s27, 3  ;;  %s563_s17 = scalar_lea.sflag (!%p10565_p3), [#allocation3], %s10674_s27 }
  0x52   : > { %s566_s8 = scalar_lea.vmem (!%p10565_p3), [#allocation2], %s6981_s11 }
  0x55   : > { %10397 = dma.done.wait (%p10636_p12), %s563_s17, 128  }
  0x56   : > { %10399 = vsyncadd (%p10636_p12), %s563_s17, 4294967168 }
  0x57   : > { %10401 = dma.done.wait (%p57_p1), [#allocation6], 32  }
  0x58   : > { %10403 = vsyncadd (%p57_p1), [#allocation6], 4294967264 }
  0x59   : > { %10405 = dma.done.wait (%p57_p1), [#allocation9], 8192  }
  0x5a   : > { %10407 = vsyncadd (%p57_p1), [#allocation9], 4294959104 }
  0x5b   : > { %10409 = dma.done.wait (%p57_p1), [#allocation12], 33280  }
  0x5c   : > { %10411 = vsyncadd (%p57_p1), [#allocation12], 4294934016 }
  0x5d   : > { %10413 = dma.done.wait (%p57_p1), [#allocation15], 32768  }
  0x5e   : > { %10415 = vsyncadd (%p57_p1), [#allocation15], 4294934528  ;;  %v652_v0 = vld [vmem:[%s566_s8] sm:$0xff]  ;;  %v10450_v1 = vmov 128.0   ;;  %v7076_v2 = vld [vmem:[#allocation8 + $0xa8] sm:$0xf] }
  0x5f   : > { %655 = vadd.xlane.f32.xlu0 %v652_v0  ;;  %10036 = vrcp.f32 %v10450_v1  ;;  %v9343_v3 = vld [vmem:[#allocation8 + $0xb0] sm:$0xf0]  ;;  %v9342_v4 = vld [vmem:[#allocation8 + $0xac] sm:$0xf]  ;;  %v7078_v6 = vld [vmem:[#allocation8 + $0xb4] sm:$0xf0] }
  0x60   : > { %v7077_v5 = vor.u32 %v9343_v3, %v7076_v2  ;;  %v7084_v7 = vld [vmem:[#allocation8 + $0xb0] sm:$0xf]  ;;  %v9344_v8 = vld [vmem:[#allocation8 + $0xb8] sm:$0xf0]  ;;  %v7081_v9 = vor.u32 %v9342_v4, %v7078_v6  ;;  %v9339_v23 = vld [vmem:[#allocation8 + $0x94] sm:$0xf] }
  0x61   : > { %v7085_v10 = vor.u32 %v9344_v8, %v7084_v7  ;;  %v7064_v21 = vld [vmem:[#allocation8 + $0x90] sm:$0xf]  ;;  %v9340_v22 = vld [vmem:[#allocation8 + $0x98] sm:$0xf0]  ;;  %v7066_v25 = vld [vmem:[#allocation8 + $0x9c] sm:$0xf0] }
  0x62   : > { %867 = vmatpush.bf16.msra.mxu0 %v7077_v5  ;;  %880 = vmatpush.bf16.msra.mxu1 %v7081_v9  ;;  %v7065_v24 = vor.u32 %v9340_v22, %v7064_v21  ;;  %v7072_v26 = vld [vmem:[#allocation8 + $0x98] sm:$0xf]  ;;  %v9341_v27 = vld [vmem:[#allocation8 + $0xa0] sm:$0xf0]  ;;  %v7069_v28 = vor.u32 %v9339_v23, %v7066_v25  ;;  %v9336_v32 = vld [vmem:[#allocation8 + $0x7c] sm:$0xf] }
  0x63   : > { %893 = vmatpush.bf16.msra.mxu2 %v7085_v10  ;;  %v7073_v29 = vor.u32 %v9341_v27, %v7072_v26  ;;  %v7052_v30 = vld [vmem:[#allocation8 + $0x78] sm:$0xf]  ;;  %v9337_v31 = vld [vmem:[#allocation8 + $0x80] sm:$0xf0]  ;;  %v7054_v34 = vld [vmem:[#allocation8 + $0x84] sm:$0xf0] }
  0x64   : > { %v7053_v33 = vor.u32 %v9337_v31, %v7052_v30  ;;  %v7060_v35 = vld [vmem:[#allocation8 + $0x80] sm:$0xf]  ;;  %v9338_v36 = vld [vmem:[#allocation8 + $0x88] sm:$0xf0]  ;;  %v7057_v37 = vor.u32 %v9336_v32, %v7054_v34  ;;  %v9333_v41 = vld [vmem:[#allocation8 + $0x64] sm:$0xf] }
  0x65   : > { %v10037_v11 = vpop.eup %10036  ;;  %v7061_v38 = vor.u32 %v9338_v36, %v7060_v35  ;;  %v7040_v39 = vld [vmem:[#allocation8 + $0x60] sm:$0xf]  ;;  %v9334_v40 = vld [vmem:[#allocation8 + $0x68] sm:$0xf0]  ;;  %v7042_v43 = vld [vmem:[#allocation8 + $0x6c] sm:$0xf0] }
  0x66   : > { %v658_v12 = vmul.f32 128.0, %v10037_v11  ;;  %vm662_vm0 = vweird.f32 %v10037_v11  ;;  %868 = vmatpush.bf16.msra.mxu0 %v7065_v24  ;;  %881 = vmatpush.bf16.msra.mxu1 %v7069_v28  ;;  %v7041_v42 = vor.u32 %v9334_v40, %v7040_v39  ;;  %v7048_v44 = vld [vmem:[#allocation8 + $0x68] sm:$0xf]  ;;  %v9335_v45 = vld [vmem:[#allocation8 + $0x70] sm:$0xf0]  ;;  %v7045_v46 = vor.u32 %v9333_v41, %v7042_v43  ;;  %s11119_s1 = sld [smem:[#allocation24_spill]] }
  0x67   : > { %894 = vmatpush.bf16.msra.mxu2 %v7073_v29  ;;  %v7049_v47 = vor.u32 %v9335_v45, %v7048_v44  ;;  %v7028_v48 = vld [vmem:[#allocation8 + $0x48] sm:$0xf]  ;;  %v9331_v49 = vld [vmem:[#allocation8 + $0x50] sm:$0xf0]  ;;  %v9330_v50 = vld [vmem:[#allocation8 + $0x4c] sm:$0xf] }
  0x68   : > { %v659_v13 = vsub.f32 1.0, %v658_v12  ;;  %v7029_v51 = vor.u32 %v9331_v49, %v7028_v48  ;;  %v7030_v52 = vld [vmem:[#allocation8 + $0x54] sm:$0xf0]  ;;  %v7036_v53 = vld [vmem:[#allocation8 + $0x50] sm:$0xf]  ;;  %vm1187_vm4 = vcmask 1043456  }
  0x69   : > { %v9332_v54 = vld [vmem:[#allocation8 + $0x58] sm:$0xf0]  ;;  %v7033_v55 = vor.u32 %v9330_v50, %v7030_v52  ;;  %v7016_v57 = vld [vmem:[#allocation8 + $0x30] sm:$0xf]  ;;  %v9327_v59 = vld [vmem:[#allocation8 + $0x34] sm:$0xf] }
  0x6a   : > { %v660_v14 = vmul.f32 %v10037_v11, %v659_v13  ;;  %869 = vmatpush.bf16.msra.mxu0 %v7053_v33  ;;  %882 = vmatpush.bf16.msra.mxu1 %v7057_v37  ;;  %v7037_v56 = vor.u32 %v9332_v54, %v7036_v53  ;;  %v9328_v58 = vld [vmem:[#allocation8 + $0x38] sm:$0xf0]  ;;  %v7018_v61 = vld [vmem:[#allocation8 + $0x3c] sm:$0xf0]  ;;  %v7024_v62 = vld [vmem:[#allocation8 + $0x38] sm:$0xf] }
  0x6b   : > { %895 = vmatpush.bf16.msra.mxu2 %v7061_v38  ;;  %v7017_v60 = vor.u32 %v9328_v58, %v7016_v57  ;;  %v9329_v63 = vld [vmem:[#allocation8 + $0x40] sm:$0xf0]  ;;  %v7004_v2 = vld [vmem:[#allocation8 + $0x18] sm:$0xf]  ;;  %v9324_v4 = vld [vmem:[#allocation8 + $0x1c] sm:$0xf] }
  0x6c   : > { %v661_v15 = vadd.f32 %v10037_v11, %v660_v14  ;;  %v7025_v1 = vor.u32 %v9329_v63, %v7024_v62  ;;  %v9325_v3 = vld [vmem:[#allocation8 + $0x20] sm:$0xf0]  ;;  %v7006_v6 = vld [vmem:[#allocation8 + $0x24] sm:$0xf0]  ;;  %v7012_v7 = vld [vmem:[#allocation8 + $0x20] sm:$0xf] }
  0x6d   : > { %v7005_v5 = vor.u32 %v9325_v3, %v7004_v2  ;;  %v9326_v8 = vld [vmem:[#allocation8 + $0x28] sm:$0xf0]  ;;  %v7009_v9 = vor.u32 %v9324_v4, %v7006_v6  ;;  %v9321_v13 = vld [vmem:[#allocation8 + $0x4] sm:$0xf]  ;;  %v10022_v31 = vld [vmem:[#allocation5] ss:$0 sm:$0xff] }
  0x6e   : > { %v10700_v16 = vsel %vm662_vm0, %v10037_v11, %v661_v15  ;;  %870 = vmatpush.bf16.msra.mxu0 %v7041_v42  ;;  %883 = vmatpush.bf16.msra.mxu1 %v7045_v46  ;;  %v7013_v10 = vor.u32 %v9326_v8, %v7012_v7  ;;  %v6992_v11 = vld [vmem:[#allocation8] sm:$0xf]  ;;  %v9322_v12 = vld [vmem:[#allocation8 + $0x8] sm:$0xf0]  ;;  %v6994_v15 = vld [vmem:[#allocation8 + $0xc] sm:$0xf0] }
  0x6f   : > { %896 = vmatpush.bf16.msra.mxu2 %v7049_v47  ;;  %v6993_v14 = vor.u32 %v9322_v12, %v6992_v11  ;;  %v10023_v34 = vld [vmem:[#allocation7] ss:$0 sm:$0xff]  ;;  %v690_v38 = vld [vmem:[%s11119_s1] sm:$0x1]  ;;  %v693_v39 = vld [vmem:[%s11119_s1 + $0x3] sm:$0x1] }
  0x70   : > { %v691_v40 = vld [vmem:[%s11119_s1 + $0x1] sm:$0x1]  ;;  %v695_v41 = vld [vmem:[%s11119_s1 + $0x5] sm:$0x1]  ;;  %v697_v42 = vld [vmem:[%s11119_s1 + $0x7] sm:$0x1]  ;;  %v909_v44 = vpack.i.b16 %v690_v38, %v690_v38  ;;  %v921_v45 = vpack.i.b16 %v693_v39, %v693_v39 }
  0x71   : > { %v731_v43 = vld [vmem:[%s11074_s5] sm:$0x7]  ;;  %v913_v47 = vpack.i.b16 %v691_v40, %v691_v40  ;;  %v929_v48 = vpack.i.b16 %v695_v41, %v695_v41  ;;  %v937_v49 = vpack.i.b16 %v697_v42, %v697_v42  ;;  %vm1087_vm5 = vcmask 64512   ;;  %s11120_s26 = sld [smem:[#allocation32_spill]]  ;;  %s9318_s14 = sshll.u32 %s10560_s28, 3 }
  0x72   : > { %871 = vmatpush.bf16.msra.mxu0 %v7029_v51  ;;  %884 = vmatpush.bf16.msra.mxu1 %v7033_v55  ;;  %v734_v50 = vperm.slane %v731_v43, 1  ;;  %v692_v51 = vld [vmem:[%s11119_s1 + $0x2] sm:$0x1]  ;;  %v911_v52 = vperm.slane %v909_v44, 0  ;;  %v923_v53 = vperm.slane %v921_v45, 0  ;;  %v735_v3 = vperm.slane %v731_v43, 2 }
  0x73   : > { %897 = vmatpush.bf16.msra.mxu2 %v7037_v56  ;;  %v915_v55 = vperm.slane %v913_v47, 0  ;;  %v931_v58 = vperm.slane %v929_v48, 0  ;;  %v733_v8 = vperm.slane %v731_v43, 0  ;;  %s11121_s8 = sld [smem:[#allocation31_spill]]  ;;  %s650_s28 = scalar_lea.vmem [#allocation16], %s6981_s11 }
  0x74   : > { %v10737_v62 = vunpack.c.l.bf16 %v911_v52  ;;  %s11122_s9 = sld [smem:[#allocation33_spill]]  ;;  %s6828_s20 = sshll.u32 %s650_s28, 4  ;;  %s6829_s20 = int_to_ptr.vmem [resolvable:$true] %s6828_s20 }
  0x75   : > { %v10743_v2 = vunpack.c.l.bf16 %v915_v55  ;;  %v10745_v4 = vunpack.c.l.bf16 %v931_v58  ;;  %s11123_s13 = sld [smem:[#allocation34_spill]]  ;;  %s6816_s2 = scalar_lea.sflag [#allocation4], %s10674_s27 }
  0x76   : > { %872 = vmatpush.bf16.msra.mxu0 %v7017_v60  ;;  %v917_v60 = vpack.i.b16 %v692_v51, %v692_v51  ;;  %s11124_s17 = sld [smem:[#allocation35_spill]] }
  0x77   : > { %898 = vmatpush.bf16.msra.mxu2 %v7025_v1 }
  0x78   : > { %v919_v6 = vperm.slane %v917_v60, 0 }
  0x7a   : > { %873 = vmatpush.bf16.msra.mxu0 %v7005_v5 }
  0x7b   : > { %899 = vmatpush.bf16.msra.mxu2 %v7013_v10 }
  0x7c   : > { %s6826_s3 = scalar_lea.hbm %s11124_s17, %s9318_s14  ;;  %s10372_s6 = scalar_lea.hbm %s11124_s17, 16 }
  0x7e   : > { %874 = vmatpush.bf16.msra.mxu0 %v6993_v14 }
  0xd2   : > { %v656_v17 = vpop.xlane.xlu0 %655 }
  0xd3   : > { %v664_v18 = vmul.f32 %v10700_v16, %v656_v17  ;;  %v7000_v17 = vld [vmem:[#allocation8 + $0x8] sm:$0xf] }
  0xd5   : > { %v10703_v19 = vsub.f32 %v652_v0, %v664_v18  ;;  %v7021_v0 = vor.u32 %v9327_v59, %v7018_v61  ;;  %v9323_v18 = vld [vmem:[#allocation8 + $0x10] sm:$0xf0]  ;;  %v939_v59 = vperm.slane %v937_v49, 0 }
  0xd6   : > { %v7001_v21 = vor.u32 %v9323_v18, %v7000_v17 }
  0xd7   : > { %v666_v20 = vmul.f32 %v10703_v19, %v10703_v19  ;;  %885 = vmatpush.bf16.msra.mxu1 %v7021_v0  ;;  %v10739_v0 = vunpack.c.l.bf16 %v923_v53  ;;  %v10747_v5 = vunpack.c.l.bf16 %v939_v59 }
  0xd8   : > { %900 = vmatpush.bf16.msra.mxu2 %v7001_v21  ;;  %v10755_v21 = vunpack.c.l.bf16 %v919_v6 }
  0xd9   : > { %667 = vadd.xlane.f32.xlu0 %v666_v20  ;;  %v6997_v20 = vor.u32 %v9321_v13, %v6994_v15 }
  0xdb   : > { %886 = vmatpush.bf16.msra.mxu1 %v7009_v9 }
  0xdf   : > { %887 = vmatpush.bf16.msra.mxu1 %v6997_v20 }
 0x14c   : > { %v668_v22 = vpop.xlane.xlu0 %667 }
 0x14d   : > { %v669_v23 = vmul.f32 %v668_v22, %v10700_v16 }
 0x14f   : > { %v670_v24 = vadd.f32 1e-05, %v669_v23 }
 0x151   : > { %10038 = vrsqrt.f32 %v670_v24  ;;  %vm677_vm2 = vweird.f32 %v670_v24 }
 0x157   : > { %v10039_v25 = vpop.eup %10038 }
 0x158   : > { %v672_v26 = vmul.f32 %v10039_v25, %v670_v24  ;;  %vm678_vm1 = vweird.f32 %v10039_v25 }
 0x159   : > { %vm679_vm3 = vmor %vm677_vm2, %vm678_vm1 }
 0x15a   : > { %v673_v27 = vmul.f32 %v10039_v25, %v672_v26 }
 0x15c   : > { %v674_v28 = vmul.f32 0.5, %v673_v27 }
 0x15e   : > { %v675_v29 = vsub.f32 1.5, %v674_v28 }
 0x160   : > { %v676_v30 = vmul.f32 %v10039_v25, %v675_v29 }
 0x162   : > { %v680_v32 = vsel %vm679_vm3, %v10039_v25, %v676_v30 }
 0x163   : > { %v681_v33 = vmul.f32 %v680_v32, %v10703_v19  ;;  %v694_v19 = vld [vmem:[%s11119_s1 + $0x4] sm:$0x1] }
 0x164   : > { %v925_v46 = vpack.i.b16 %v694_v19, %v694_v19 }
 0x165   : > { %v685_v35 = vmul.f32 %v10022_v31, %v681_v33 }
 0x166   : > { %v927_v54 = vperm.slane %v925_v46, 0 }
 0x167   : > { %v10709_v36 = vadd.f32 %v10023_v34, %v685_v35 }
 0x168   : > { %v10741_v1 = vunpack.c.l.bf16 %v927_v54 }
 0x169   : > { %v698_v37 = vpack.c.bf16 %v10709_v36, %v10709_v36 }
 0x16b   : > { %875 = vmatmul.bf16.vlgmr.msra.gmra.mxu0 %v698_v37  ;;  %888 = vmatmul.bf16.vlgmr.msra.gmra.mxu1 %v698_v37 }
 0x16c   : > { %901 = vmatmul.bf16.vlgmr.msra.gmra.mxu2 %v698_v37  ;;  %v696_v37 = vld [vmem:[%s11119_s1 + $0x6] sm:$0x1]  ;;  %s6830_s1 = sshll.u32 %s6826_s3, 4  ;;  %s6831_s1 = int_to_ptr.hbm [resolvable:$true] %s6830_s1 }
 0x16d   : > { %v933_v44 = vpack.i.b16 %v696_v37, %v696_v37  ;;  %s10366_s0 = sshra.s32 %s6831_s1, 4  ;;  %s10367_s0 = int_to_ptr.hbm [resolvable:$true] %s10366_s0 }
 0x16e   : > { %s10368_s14 = scalar_lea.hbm %s10367_s0, 8  ;;  %p10373_p12 = scmp.lt.s32.totalorder %s10367_s0, %s11124_s17 }
 0x16f   : > { %v935_v49 = vperm.slane %v933_v44, 0  ;;  %p10369_p1 = scmp.ne.s32.totalorder %s10367_s0, %s10368_s14  ;;  %p10374_p7 = scmp.lt.s32.totalorder %s10372_s6, %s10368_s14 }
 0x171   : > { %p10370_p3 = pnand %p10369_p1, %p10643_p5  ;;  %p10375_p8 = por %p10374_p7, %p10373_p12 }
 0x173   : > { %p10371_p4 = pneg %p10370_p3 }
 0x175   : > { %p10376_p9 = pnand %p10375_p8, %p10371_p4 }
 0x1e8   : > { %v876_v56 = vpop.f32.mrf.mxu0  ;;  %v889_v57 = vpop.f32.mrf.mxu1 }
 0x1e9   : > { %v890_v61 = vadd.f32 %v889_v57, %v734_v50  ;;  %v877_v29 = vadd.f32 %v876_v56, %v733_v8  ;;  %v10769_v50 = vunpack.c.l.bf16 %v935_v49 }
 0x1eb   : > { %v907_v63 = vpack.c.bf16 %v890_v61, %v890_v61  ;;  %v906_v38 = vpack.c.bf16 %v877_v29, %v877_v29 }
 0x1ed   : > { %v940_v7 = vunpack.c.l.bf16 %v907_v63 }
 0x1ef   : > { %v902_v9 = vpop.f32.mrf.mxu2  ;;  %v949_v10 = vmul.f32 %v10737_v62, %v940_v7  ;;  %v952_v11 = vmul.f32 %v10739_v0, %v940_v7  ;;  %v953_v12 = vmul.f32 %v10741_v1, %v940_v7  ;;  %v950_v13 = vmul.f32 %v10743_v2, %v940_v7 }
 0x1f0   : > { %v903_v14 = vadd.f32 %v902_v9, %v735_v3  ;;  %v878_v15 = vpop.f32.mrf.mxu0  ;;  %v891_v17 = vpop.f32.mrf.mxu1  ;;  %v954_v18 = vmul.f32 %v10745_v4, %v940_v7  ;;  %v956_v20 = vmul.f32 %v10747_v5, %v940_v7  ;;  %v951_v31 = vmul.f32 %v10755_v21, %v940_v7 }
 0x1f1   : > { %v957_v22 = vpack.c.bf16 %v949_v10, %v949_v10  ;;  %v960_v23 = vpack.c.bf16 %v952_v11, %v952_v11  ;;  %v961_v24 = vpack.c.bf16 %v953_v12, %v953_v12  ;;  %v958_v25 = vpack.c.bf16 %v950_v13, %v950_v13 }
 0x1f2   : > { %v965_v26 = vpack.c.bf16 %v903_v14, %v903_v14  ;;  %v962_v27 = vpack.c.bf16 %v954_v18, %v954_v18  ;;  %v964_v28 = vpack.c.bf16 %v956_v20, %v956_v20  ;;  %v959_v43 = vpack.c.bf16 %v951_v31, %v951_v31 }
 0x1f3   : > { %990 = vmatpush.bf16.xpose.msra.mxu3 %v957_v22  ;;  %1029 = vmatpush.bf16.xpose.msrb.mxu0 %v960_v23  ;;  %v955_v53 = vmul.f32 %v10769_v50, %v940_v7 }
 0x1f4   : > { %v966_v30 = vunpack.c.l.bf16 %v965_v26  ;;  %1042 = vmatpush.bf16.xpose.msrb.mxu2 %v961_v24 }
 0x1f5   : > { %v963_v56 = vpack.c.bf16 %v955_v53, %v955_v53 }
 0x1f6   : > { %v967_v32 = vmul.f32 %v966_v30, %v10737_v62  ;;  %v968_v33 = vmul.f32 %v966_v30, %v10743_v2  ;;  %v970_v34 = vmul.f32 %v966_v30, %v10739_v0  ;;  %v971_v35 = vmul.f32 %v966_v30, %v10741_v1 }
 0x1f7   : > { %v904_v39 = vpop.f32.mrf.mxu2  ;;  %v972_v51 = vmul.f32 %v966_v30, %v10745_v4  ;;  %v974_v52 = vmul.f32 %v966_v30, %v10747_v5  ;;  %v969_v59 = vmul.f32 %v966_v30, %v10755_v21  ;;  %v973_v63 = vmul.f32 %v966_v30, %v10769_v50 }
 0x1f8   : > { %v975_v19 = vpack.c.bf16 %v967_v32, %v967_v32  ;;  %v976_v40 = vpack.c.bf16 %v968_v33, %v968_v33  ;;  %v978_v41 = vpack.c.bf16 %v970_v34, %v970_v34  ;;  %v979_v42 = vpack.c.bf16 %v971_v35, %v971_v35 }
 0x1f9   : > { %v980_v54 = vpack.c.bf16 %v972_v51, %v972_v51  ;;  %v982_v55 = vpack.c.bf16 %v974_v52, %v974_v52  ;;  %v977_v60 = vpack.c.bf16 %v969_v59, %v969_v59  ;;  %v981_v3 = vpack.c.bf16 %v973_v63, %v973_v63 }
 0x1fa   : > { %991 = vmatmul.bf16.vlgmr.msra.gmra.mxu3 %v906_v38  ;;  %1030 = vmatmul.bf16.vlgmr.msrb.gmra.mxu0 %v906_v38  ;;  %v1189_v45 = vsel %vm1187_vm4, %v975_v19, 0  ;;  %v1208_v46 = vsel %vm1187_vm4, %v976_v40, 0  ;;  %v1246_v47 = vsel %vm1187_vm4, %v978_v41, 0  ;;  %v1265_v48 = vsel %vm1187_vm4, %v979_v42, 0 }
 0x1fb   : > { %1003 = vmatpush.bf16.xpose.msrb.mxu3 %v958_v25  ;;  %1081 = vmatpush.bf16.xpose.msra.mxu0 %v964_v28  ;;  %v1284_v57 = vsel %vm1187_vm4, %v980_v54, 0  ;;  %v1322_v58 = vsel %vm1187_vm4, %v982_v55, 0  ;;  %v1227_v61 = vsel %vm1187_vm4, %v977_v60, 0  ;;  %v1303_v6 = vsel %vm1187_vm4, %v981_v3, 0 }
 0x1fc   : > { %1055 = vmatpush.bf16.xpose.msra.mxu2 %v962_v27  ;;  %1198 = vmatpush.bf16.msrb.mxu1 %v1189_v45 }
 0x1fd   : > { %1043 = vmatmul.bf16.vlgmr.msrb.gmra.mxu2 %v906_v38 }
 0x200   : > { %1274 = vmatpush.bf16.msra.mxu1 %v1265_v48 }
 0x203   : > { %1016 = vmatpush.bf16.xpose.msra.mxu3 %v959_v43  ;;  %1255 = vmatpush.bf16.msrb.mxu0 %v1246_v47 }
 0x204   : > { %1217 = vmatpush.bf16.msrb.mxu2 %v1208_v46 }
 0x20a   : > { %1004 = vmatmul.bf16.vlgmr.msrb.gmra.mxu3 %v906_v38  ;;  %1082 = vmatmul.bf16.vlgmr.msra.gmra.mxu0 %v906_v38 }
 0x20b   : > { %1068 = vmatpush.bf16.xpose.msrb.mxu3 %v963_v56  ;;  %1331 = vmatpush.bf16.msra.mxu0 %v1322_v58 }
 0x20d   : > { %1056 = vmatmul.bf16.vlgmr.msra.gmra.mxu2 %v906_v38 }
 0x20e   : > { %1293 = vmatpush.bf16.msra.mxu2 %v1284_v57 }
 0x21a   : > { %1017 = vmatmul.bf16.vlgmr.msra.gmra.mxu3 %v906_v38 }
 0x21b   : > { %1236 = vmatpush.bf16.msra.mxu3 %v1227_v61 }
 0x22a   : > { %1069 = vmatmul.bf16.vlgmr.msrb.gmra.mxu3 %v906_v38 }
 0x22b   : > { %1312 = vmatpush.bf16.msrb.mxu3 %v1303_v6 }
 0x277   : > { %v1031_v7 = vpop.f32.mrf.mxu0 }
 0x278   : > { %v1097_v14 = vsel %vm1087_vm5, %v1031_v7, -inf }
 0x27d   : > { %v992_v8 = vpop.f32.mrf.mxu3 }
 0x27e   : > { %v1088_v10 = vsel %vm1087_vm5, %v992_v8, -inf }
 0x27f   : > { %v1033_v11 = vpop.f32.mrf.mxu0  ;;  %1089 = vmax.xlane.f32.xlu2 %v1088_v10 }
 0x280   : > { %v1044_v9 = vpop.f32.mrf.mxu2 }
 0x281   : > { %v1100_v20 = vsel %vm1087_vm5, %v1044_v9, -inf }
 0x285   : > { %v994_v12 = vpop.f32.mrf.mxu3 }
 0x287   : > { %v10782_v15 = vpop.f32.mrf.mxu0  ;;  %1098 = vmax.xlane.f32.xlu2 %v1097_v14 }
 0x288   : > { %v1046_v13 = vpop.f32.mrf.mxu2  ;;  %v1109_v27 = vsel %vm1087_vm5, %v10782_v15, -inf }
 0x28d   : > { %v1005_v17 = vpop.f32.mrf.mxu3 }
 0x28e   : > { %v1091_v22 = vsel %vm1087_vm5, %v1005_v17, -inf }
 0x28f   : > { %v1085_v24 = vpop.f32.mrf.mxu0  ;;  %1101 = vmax.xlane.f32.xlu2 %v1100_v20  ;;  %1092 = vmax.xlane.f32.xlu1 %v1091_v22 }
 0x290   : > { %v1057_v18 = vpop.f32.mrf.mxu2 }
 0x291   : > { %v1103_v23 = vsel %vm1087_vm5, %v1057_v18, -inf }
 0x292   : > { %1104 = vmax.xlane.f32.xlu0 %v1103_v23 }
 0x295   : > { %v1007_v25 = vpop.f32.mrf.mxu3 }
 0x298   : > { %v1059_v26 = vpop.f32.mrf.mxu2 }
 0x29a   : > { %1110 = vmax.xlane.f32.xlu0 %v1109_v27 }
 0x29d   : > { %v1018_v28 = vpop.f32.mrf.mxu3 }
 0x29e   : > { %v1094_v29 = vsel %vm1087_vm5, %v1018_v28, -inf }
 0x29f   : > { %1095 = vmax.xlane.f32.xlu1 %v1094_v29 }
 0x2a5   : > { %v1020_v30 = vpop.f32.mrf.mxu3 }
 0x2ad   : > { %v1070_v31 = vpop.f32.mrf.mxu3 }
 0x2ae   : > { %v1106_v32 = vsel %vm1087_vm5, %v1070_v31, -inf }
 0x2af   : > { %1107 = vmax.xlane.f32.xlu1 %v1106_v32 }
 0x2b5   : > { %v1072_v33 = vpop.f32.mrf.mxu3 }
 0x2f2   : > { %v1090_v34 = vpop.xlane.xlu2 %1089 }
 0x2f3   : > { %v1112_v35 = vsub.f32 %v992_v8, %v1090_v34 }
 0x2f5   : > { %v1120_v37 = vmul.f32 1.442695, %v1112_v35 }
 0x2f7   : > { %10040 = vpow2.f32 %v1120_v37 }
 0x2fa   : > { %v1099_v19 = vpop.xlane.xlu2 %1098 }
 0x2fb   : > { %v1115_v43 = vsub.f32 %v1031_v7, %v1099_v19 }
 0x2fd   : > { %v10041_v38 = vpop.eup %10040  ;;  %v1126_v44 = vmul.f32 1.442695, %v1115_v43 }
 0x2fe   : > { %v1136_v39 = vsel %vm1087_vm5, %v10041_v38, 0.0 }
 0x2ff   : > { %1137 = vadd.xlane.f32.xlu0 %v1136_v39 }
 0x302   : > { %v1093_v40 = vpop.xlane.xlu1 %1092  ;;  %v1102_v45 = vpop.xlane.xlu2 %1101 }
 0x303   : > { %v1113_v41 = vsub.f32 %v1005_v17, %v1093_v40  ;;  %v1116_v46 = vsub.f32 %v1044_v9, %v1102_v45 }
 0x305   : > { %v1122_v42 = vmul.f32 1.442695, %v1113_v41  ;;  %v1105_v48 = vpop.xlane.xlu0 %1104  ;;  %v1128_v51 = vmul.f32 1.442695, %v1116_v46 }
 0x306   : > { %v1117_v55 = vsub.f32 %v1057_v18, %v1105_v48 }
 0x307   : > { %10042 = vpow2.f32 %v1122_v42 }
 0x308   : > { %10044 = vpow2.f32 %v1126_v44  ;;  %v1130_v58 = vmul.f32 1.442695, %v1117_v55  ;;  %v9351_v55 = vld [vmem:[#allocation10 + $0x30] sm:$0xff] }
 0x309   : > { %10046 = vpow2.f32 %v1128_v51 }
 0x30d   : > { %v10043_v47 = vpop.eup %10042  ;;  %v1111_v59 = vpop.xlane.xlu0 %1110 }
 0x30e   : > { %v1139_v49 = vsel %vm1087_vm5, %v10043_v47, 0.0  ;;  %v10045_v54 = vpop.eup %10044  ;;  %v1119_v63 = vsub.f32 %v10782_v15, %v1111_v59  ;;  %v9348_v59 = vld [vmem:[#allocation10 + $0x18] sm:$0xff] }
 0x30f   : > { %1140 = vadd.xlane.f32.xlu1 %v1139_v49  ;;  %v1145_v57 = vsel %vm1087_vm5, %v10045_v54, 0.0  ;;  %v10047_v60 = vpop.eup %10046 }
 0x310   : > { %v1148_v6 = vsel %vm1087_vm5, %v10047_v60, 0.0  ;;  %v1134_v7 = vmul.f32 1.442695, %v1119_v63  ;;  %v9346_v63 = vld [vmem:[#allocation10 + $0x8] sm:$0xff] }
 0x312   : > { %v1096_v52 = vpop.xlane.xlu1 %1095 }
 0x313   : > { %v1114_v53 = vsub.f32 %v1018_v28, %v1096_v52 }
 0x315   : > { %v1124_v56 = vmul.f32 1.442695, %v1114_v53 }
 0x317   : > { %10048 = vpow2.f32 %v1124_v56  ;;  %1146 = vadd.xlane.f32.xlu1 %v1145_v57  ;;  %v9350_v57 = vld [vmem:[#allocation10 + $0x28] sm:$0xff] }
 0x318   : > { %10050 = vpow2.f32 %v1130_v58  ;;  %v9349_v58 = vld [vmem:[#allocation10 + $0x20] sm:$0xff] }
 0x319   : > { %10052 = vpow2.f32 %v1134_v7 }
 0x31d   : > { %v10049_v61 = vpop.eup %10048 }
 0x31e   : > { %v1142_v3 = vsel %vm1087_vm5, %v10049_v61, 0.0  ;;  %v10051_v9 = vpop.eup %10050 }
 0x31f   : > { %1143 = vadd.xlane.f32.xlu2 %v1142_v3  ;;  %1149 = vadd.xlane.f32.xlu1 %v1148_v6  ;;  %v1151_v12 = vsel %vm1087_vm5, %v10051_v9, 0.0  ;;  %v10053_v13 = vpop.eup %10052  ;;  %v9345_v6 = vld [vmem:[#allocation10] sm:$0xff] }
 0x320   : > { %v1157_v15 = vsel %vm1087_vm5, %v10053_v13, 0.0 }
 0x322   : > { %v1108_v8 = vpop.xlane.xlu1 %1107 }
 0x323   : > { %v1118_v10 = vsub.f32 %v1070_v31, %v1108_v8 }
 0x325   : > { %v1132_v11 = vmul.f32 1.442695, %v1118_v10 }
 0x327   : > { %10054 = vpow2.f32 %v1132_v11  ;;  %1152 = vadd.xlane.f32.xlu2 %v1151_v12 }
 0x32d   : > { %v10055_v14 = vpop.eup %10054 }
 0x32e   : > { %v1154_v17 = vsel %vm1087_vm5, %v10055_v14, 0.0 }
 0x32f   : > { %1158 = vadd.xlane.f32.xlu2 %v1157_v15  ;;  %1155 = vadd.xlane.f32.xlu0 %v1154_v17 }
 0x372   : > { %v1138_v18 = vpop.xlane.xlu0 %1137 }
 0x373   : > { %10056 = vrcp.f32 %v1138_v18 }
 0x379   : > { %v10057_v20 = vpop.eup %10056 }
 0x37a   : > { %v1168_v22 = vmul.f32 %v10057_v20, %v10041_v38 }
 0x37c   : > { %v1176_v23 = vpack.c.bf16 %v1168_v22, %v1168_v22 }
 0x37e   : > { %7086 = vmatmul.msk.bf16.vlgmr.msrb.gmra.mxu1 %vm1087_vm5, %v1176_v23 }
 0x382   : > { %v1141_v24 = vpop.xlane.xlu1 %1140 }
 0x383   : > { %10058 = vrcp.f32 %v1141_v24 }
 0x389   : > { %v10059_v25 = vpop.eup %10058 }
 0x38a   : > { %v1169_v26 = vmul.f32 %v10059_v25, %v10043_v47  ;;  %v1147_v27 = vpop.xlane.xlu1 %1146 }
 0x38b   : > { %10060 = vrcp.f32 %v1147_v27 }
 0x38c   : > { %v1177_v28 = vpack.c.bf16 %v1169_v26, %v1169_v26 }
 0x38e   : > { %7087 = vmatmul.msk.bf16.vlgmr.msrb.gmra.mxu2 %vm1087_vm5, %v1177_v28 }
 0x391   : > { %v10061_v30 = vpop.eup %10060 }
 0x392   : > { %v1144_v29 = vpop.xlane.xlu2 %1143  ;;  %v1171_v31 = vmul.f32 %v10061_v30, %v10045_v54  ;;  %v1150_v32 = vpop.xlane.xlu1 %1149  ;;  %v9352_v54 = vld [vmem:[#allocation10 + $0x38] sm:$0xff]  ;;  %v10024_v30 = vld [vmem:[%s11076_s7] ss:$0 sm:$0xff] }
 0x393   : > { %10062 = vrcp.f32 %v1144_v29  ;;  %1413 = vmatpush.bf16.msrb.mxu1 %v9352_v54  ;;  %v9406_v54 = vld [vmem:[#allocation11 + $0x344] sm:$0xf0] }
 0x394   : > { %10064 = vrcp.f32 %v1150_v32  ;;  %v1179_v33 = vpack.c.bf16 %v1171_v31, %v1171_v31 }
 0x396   : > { %7089 = vmatmul.msk.bf16.vlgmr.msrb.gmra.mxu0 %vm1087_vm5, %v1179_v33 }
 0x397   : > { %1414 = vmatpush.bf16.msrb.mxu1 %v9351_v55  ;;  %v9402_v55 = vld [vmem:[#allocation11 + $0x30c] sm:$0xf] }
 0x399   : > { %v10063_v34 = vpop.eup %10062 }
 0x39a   : > { %v1170_v35 = vmul.f32 %v10063_v34, %v10049_v61  ;;  %v1153_v37 = vpop.xlane.xlu2 %1152  ;;  %v10065_v38 = vpop.eup %10064 }
 0x39b   : > { %10066 = vrcp.f32 %v1153_v37  ;;  %v1172_v19 = vmul.f32 %v10065_v38, %v10047_v60  ;;  %1415 = vmatpush.bf16.msrb.mxu1 %v9350_v57  ;;  %v9347_v60 = vld [vmem:[#allocation10 + $0x10] sm:$0xff]  ;;  %v9413_v37 = vld [vmem:[#allocation11 + $0x3bc] sm:$0xf0]  ;;  %v9409_v38 = vld [vmem:[#allocation11 + $0x384] sm:$0xf] }
 0x39c   : > { %v1178_v39 = vpack.c.bf16 %v1170_v35, %v1170_v35  ;;  %v7352_v35 = vld [vmem:[#allocation11 + $0x380] sm:$0xf]  ;;  %v7330_v57 = vld [vmem:[#allocation11 + $0x348] sm:$0xf0] }
 0x39d   : > { %v1180_v40 = vpack.c.bf16 %v1172_v19, %v1172_v19  ;;  %v7354_v19 = vld [vmem:[#allocation11 + $0x3c0] sm:$0xf0] }
 0x39e   : > { %7088 = vmatmul.msk.bf16.vlgmr.msra.gmra.mxu3 %vm1087_vm5, %v1178_v39  ;;  %v7353_v39 = vor.u32 %v9413_v37, %v7352_v35  ;;  %v9377_v35 = vld [vmem:[#allocation11 + $0x184] sm:$0xf] }
 0x39f   : > { %7090 = vmatmul.msk.bf16.vlgmr.msra.gmra.mxu1 %vm1087_vm5, %v1180_v40  ;;  %v7360_v40 = vld [vmem:[#allocation11 + $0x388] sm:$0xf] }
 0x3a0   : > { %1416 = vmatpush.bf16.msrb.mxu1 %v9349_v58  ;;  %1861 = vmatpush.bf16.msrb.mxu2 %v7353_v39  ;;  %v7288_v58 = vld [vmem:[#allocation11 + $0x280] sm:$0xf]  ;;  %v7232_v39 = vld [vmem:[#allocation11 + $0x188] sm:$0xf] }
 0x3a1   : > { %v10067_v41 = vpop.eup %10066 }
 0x3a2   : > { %v1173_v42 = vmul.f32 %v10067_v41, %v10051_v9  ;;  %v1159_v43 = vpop.xlane.xlu2 %1158  ;;  %v1156_v44 = vpop.xlane.xlu0 %1155  ;;  %v9414_v41 = vld [vmem:[#allocation11 + $0x3c4] sm:$0xf0] }
 0x3a3   : > { %10068 = vrcp.f32 %v1159_v43  ;;  %v7361_v43 = vor.u32 %v9414_v41, %v7360_v40 }
 0x3a4   : > { %v1181_v45 = vpack.c.bf16 %v1173_v42, %v1173_v42  ;;  %10070 = vrcp.f32 %v1156_v44  ;;  %1417 = vmatpush.bf16.msrb.mxu1 %v9348_v59  ;;  %v7357_v42 = vor.u32 %v9409_v38, %v7354_v19  ;;  %v9410_v44 = vld [vmem:[#allocation11 + $0x38c] sm:$0xf]  ;;  %v9397_v59 = vld [vmem:[#allocation11 + $0x2bc] sm:$0xf0]  ;;  %v7226_v38 = vld [vmem:[#allocation11 + $0x1c0] sm:$0xf0] }
 0x3a5   : > { %1887 = vmatpush.bf16.msrb.mxu0 %v7361_v43  ;;  %v9382_v19 = vld [vmem:[#allocation11 + $0x1c4] sm:$0xf0]  ;;  %v7229_v40 = vor.u32 %v9377_v35, %v7226_v38  ;;  %v7234_v43 = vld [vmem:[#allocation11 + $0x1c8] sm:$0xf0]  ;;  %v9412_v35 = vld [vmem:[#allocation11 + $0x39c] sm:$0xf] }
 0x3a6   : > { %7091 = vmatmul.msk.bf16.vlgmr.msra.gmra.mxu2 %vm1087_vm5, %v1181_v45  ;;  %v7362_v45 = vld [vmem:[#allocation11 + $0x3c8] sm:$0xf0]  ;;  %1874 = vmatpush.bf16.msra.mxu3 %v7357_v42  ;;  %v7233_v41 = vor.u32 %v9382_v19, %v7232_v39  ;;  %v7378_v38 = vld [vmem:[#allocation11 + $0x3d8] sm:$0xf0]  ;;  %v7336_v39 = vld [vmem:[#allocation11 + $0x310] sm:$0xf] }
 0x3a7   : > { %v9378_v42 = vld [vmem:[#allocation11 + $0x18c] sm:$0xf]  ;;  %v9407_v19 = vld [vmem:[#allocation11 + $0x34c] sm:$0xf0] }
 0x3a8   : > { %1418 = vmatpush.bf16.msrb.mxu1 %v9347_v60  ;;  %v7333_v60 = vor.u32 %v9402_v55, %v7330_v57  ;;  %v9365_v57 = vld [vmem:[#allocation11 + $0xbc] sm:$0xf0] }
 0x3a9   : > { %v10069_v46 = vpop.eup %10068 }
 0x3aa   : > { %v10071_v47 = vpop.eup %10070  ;;  %v1175_v48 = vmul.f32 %v10069_v46, %v10053_v13  ;;  %v7320_v46 = vld [vmem:[#allocation11 + $0x300] sm:$0xf] }
 0x3ab   : > { %v1174_v49 = vmul.f32 %v10071_v47, %v10055_v14  ;;  %v7365_v47 = vor.u32 %v9410_v44, %v7362_v45  ;;  %v7237_v44 = vor.u32 %v9378_v42, %v7234_v43  ;;  %v9373_v45 = vld [vmem:[#allocation11 + $0x13c] sm:$0xf0]  ;;  %v9403_v42 = vld [vmem:[#allocation11 + $0x314] sm:$0xf] }
 0x3ac   : > { %v1183_v51 = vpack.c.bf16 %v1175_v48, %v1175_v48  ;;  %1419 = vmatpush.bf16.msrb.mxu1 %v9346_v63  ;;  %v9405_v48 = vld [vmem:[#allocation11 + $0x33c] sm:$0xf0]  ;;  %v7290_v63 = vld [vmem:[#allocation11 + $0x2c0] sm:$0xf0]  ;;  %v7338_v43 = vld [vmem:[#allocation11 + $0x350] sm:$0xf0] }
 0x3ad   : > { %v1182_v52 = vpack.c.bf16 %v1174_v49, %v1174_v49  ;;  %v7322_v49 = vld [vmem:[#allocation11 + $0x340] sm:$0xf0] }
 0x3ae   : > { %7093 = vmatmul.msk.bf16.vlgmr.msra.gmra.mxu0 %vm1087_vm5, %v1183_v51  ;;  %v7321_v51 = vor.u32 %v9405_v48, %v7320_v46  ;;  %v9369_v46 = vld [vmem:[#allocation11 + $0x104] sm:$0xf] }
 0x3af   : > { %7092 = vmatmul.msk.bf16.vlgmr.msrb.gmra.mxu3 %vm1087_vm5, %v1182_v52  ;;  %v7194_v48 = vld [vmem:[#allocation11 + $0x140] sm:$0xf0] }
 0x3b0   : > { %1420 = vmatpush.bf16.msrb.mxu1 %v9345_v6  ;;  %1862 = vmatpush.bf16.msrb.mxu2 %v7321_v51  ;;  %v7289_v6 = vor.u32 %v9397_v59, %v7288_v58  ;;  %v7197_v51 = vor.u32 %v9369_v46, %v7194_v48  ;;  %v9361_v58 = vld [vmem:[#allocation11 + $0x84] sm:$0xf]  ;;  %v9404_v46 = vld [vmem:[#allocation11 + $0x31c] sm:$0xf] }
 0x3b4   : > { %1900 = vmatpush.bf16.msra.mxu1 %v7365_v47  ;;  %1863 = vmatpush.bf16.msrb.mxu2 %v7289_v6 }
 0x3b8   : > { %1901 = vmatpush.bf16.msra.mxu1 %v7333_v60  ;;  %v7162_v60 = vld [vmem:[#allocation11 + $0xc0] sm:$0xf0] }
 0x3fb   : > { %v1200_v53 = vpop.f32.mrf.mxu1 }
 0x403   : > { %v1202_v56 = vpop.f32.mrf.mxu1 }
 0x411   : > { %v1219_v61 = vpop.f32.mrf.mxu2 }
 0x412   : > { %v1337_v11 = vadd.f32 %v1219_v61, %v1200_v53  ;;  %v7328_v53 = vld [vmem:[#allocation11 + $0x308] sm:$0xf]  ;;  %v9393_v61 = vld [vmem:[#allocation11 + $0x284] sm:$0xf] }
 0x413   : > { %v1257_v3 = vpop.f32.mrf.mxu0  ;;  %v7329_v56 = vor.u32 %v9406_v54, %v7328_v53  ;;  %v9370_v53 = vld [vmem:[#allocation11 + $0x10c] sm:$0xf] }
 0x414   : > { %v7202_v54 = vld [vmem:[#allocation11 + $0x148] sm:$0xf0] }
 0x415   : > { %1888 = vmatpush.bf16.msrb.mxu0 %v7329_v56  ;;  %v7205_v55 = vor.u32 %v9370_v53, %v7202_v54  ;;  %v7160_v56 = vld [vmem:[#allocation11 + $0x80] sm:$0xf]  ;;  %v7306_v54 = vld [vmem:[#allocation11 + $0x2d0] sm:$0xf0] }
 0x416   : > { %v7161_v59 = vor.u32 %v9365_v57, %v7160_v56  ;;  %v9400_v56 = vld [vmem:[#allocation11 + $0x2d4] sm:$0xf0] }
 0x419   : > { %v1221_v7 = vpop.f32.mrf.mxu2 }
 0x41a   : > { %v9398_v7 = vld [vmem:[#allocation11 + $0x2c4] sm:$0xf0] }
 0x41b   : > { %v1259_v8 = vpop.f32.mrf.mxu0 }
 0x41c   : > { %v1276_v9 = vpop.f32.mrf.mxu1  ;;  %v9394_v8 = vld [vmem:[#allocation11 + $0x28c] sm:$0xf] }
 0x421   : > { %v1238_v10 = vpop.f32.mrf.mxu3 }
 0x422   : > { %v1338_v13 = vadd.f32 %v1337_v11, %v1238_v10  ;;  %v7293_v10 = vor.u32 %v9393_v61, %v7290_v63  ;;  %v7168_v61 = vld [vmem:[#allocation11 + $0x88] sm:$0xf] }
 0x423   : > { %v9366_v63 = vld [vmem:[#allocation11 + $0xc4] sm:$0xf0] }
 0x424   : > { %v1278_v12 = vpop.f32.mrf.mxu1  ;;  %v1339_v17 = vadd.f32 %v1338_v13, %v1257_v3  ;;  %v7296_v3 = vld [vmem:[#allocation11 + $0x288] sm:$0xf]  ;;  %v9389_v13 = vld [vmem:[#allocation11 + $0x23c] sm:$0xf0]  ;;  %v7169_v6 = vor.u32 %v9366_v63, %v7168_v61  ;;  %v7272_v63 = vld [vmem:[#allocation11 + $0x210] sm:$0xf] }
 0x425   : > { %v7297_v11 = vor.u32 %v9398_v7, %v7296_v3  ;;  %v7256_v12 = vld [vmem:[#allocation11 + $0x200] sm:$0xf]  ;;  %v7165_v3 = vor.u32 %v9361_v58, %v7162_v60  ;;  %v9362_v7 = vld [vmem:[#allocation11 + $0x8c] sm:$0xf]  ;;  %v7314_v60 = vld [vmem:[#allocation11 + $0x2d8] sm:$0xf0] }
 0x426   : > { %v1340_v20 = vadd.f32 %v1339_v17, %v1276_v9  ;;  %v7298_v9 = vld [vmem:[#allocation11 + $0x2c8] sm:$0xf0]  ;;  %v7258_v17 = vld [vmem:[#allocation11 + $0x240] sm:$0xf0] }
 0x427   : > { %1889 = vmatpush.bf16.msrb.mxu0 %v7297_v11  ;;  %v9357_v11 = vld [vmem:[#allocation11 + $0x3c] sm:$0xf0] }
 0x429   : > { %v1240_v14 = vpop.f32.mrf.mxu3  ;;  %v1295_v15 = vpop.f32.mrf.mxu2 }
 0x42a   : > { %v1341_v22 = vadd.f32 %v1340_v20, %v1295_v15  ;;  %v9385_v14 = vld [vmem:[#allocation11 + $0x204] sm:$0xf]  ;;  %v7301_v15 = vor.u32 %v9394_v8, %v7298_v9  ;;  %v9390_v20 = vld [vmem:[#allocation11 + $0x244] sm:$0xf0]  ;;  %v7170_v8 = vld [vmem:[#allocation11 + $0xc8] sm:$0xf0] }
 0x42b   : > { %v1333_v18 = vpop.f32.mrf.mxu0  ;;  %v7173_v9 = vor.u32 %v9362_v7, %v7170_v8  ;;  %v7274_v8 = vld [vmem:[#allocation11 + $0x250] sm:$0xf0] }
 0x42c   : > { %1902 = vmatpush.bf16.msra.mxu1 %v7301_v15  ;;  %v7136_v15 = vld [vmem:[#allocation11 + $0x8] sm:$0xf] }
 0x431   : > { %v1297_v23 = vpop.f32.mrf.mxu2 }
 0x432   : > { %v1314_v24 = vpop.f32.mrf.mxu3  ;;  %v7266_v23 = vld [vmem:[#allocation11 + $0x248] sm:$0xf0] }
 0x433   : > { %v1342_v25 = vadd.f32 %v1341_v22, %v1314_v24  ;;  %v1335_v26 = vpop.f32.mrf.mxu0  ;;  %v9386_v22 = vld [vmem:[#allocation11 + $0x20c] sm:$0xf]  ;;  %v7257_v24 = vor.u32 %v9389_v13, %v7256_v12  ;;  %v9353_v12 = vld [vmem:[#allocation11 + $0x4] sm:$0xf] }
 0x435   : > { %v1343_v27 = vadd.f32 %v1342_v25, %v1333_v18  ;;  %v7264_v18 = vld [vmem:[#allocation11 + $0x208] sm:$0xf]  ;;  %v7261_v25 = vor.u32 %v9385_v14, %v7258_v17  ;;  %1864 = vmatpush.bf16.msrb.mxu2 %v7257_v24  ;;  %v7130_v14 = vld [vmem:[#allocation11 + $0x40] sm:$0xf0]  ;;  %v7368_v24 = vld [vmem:[#allocation11 + $0x390] sm:$0xf] }
 0x436   : > { %v7265_v26 = vor.u32 %v9390_v20, %v7264_v18  ;;  %v9358_v17 = vld [vmem:[#allocation11 + $0x44] sm:$0xf0]  ;;  %v7133_v18 = vor.u32 %v9353_v12, %v7130_v14  ;;  %v7282_v14 = vld [vmem:[#allocation11 + $0x258] sm:$0xf0] }
 0x437   : > { %v1344_v28 = vpack.c.bf16 %v1343_v27, %v1343_v27  ;;  %v7269_v27 = vor.u32 %v9386_v22, %v7266_v23  ;;  %v7137_v20 = vor.u32 %v9358_v17, %v7136_v15  ;;  %v9354_v22 = vld [vmem:[#allocation11 + $0xc] sm:$0xf] }
 0x438   : > { %1890 = vmatpush.bf16.msrb.mxu0 %v7265_v26  ;;  %v7138_v23 = vld [vmem:[#allocation11 + $0x48] sm:$0xf0]  ;;  %v9415_v26 = vld [vmem:[#allocation11 + $0x3cc] sm:$0xf0] }
 0x439   : > { %1421 = vmatmul.bf16.vlgmr.msrb.gmra.mxu1 %v1344_v28 }
 0x43a   : > { %v1316_v29 = vpop.f32.mrf.mxu3  ;;  %1903 = vmatpush.bf16.msra.mxu1 %v7269_v27  ;;  %v9411_v27 = vld [vmem:[#allocation11 + $0x394] sm:$0xf] }
 0x43c   : > { %1891 = vmatpush.bf16.msrb.mxu0 %v7233_v41  ;;  %v7337_v41 = vor.u32 %v9407_v19, %v7336_v39  ;;  %v9371_v39 = vld [vmem:[#allocation11 + $0x114] sm:$0xf] }
 0x43d   : > { %v7210_v19 = vld [vmem:[#allocation11 + $0x150] sm:$0xf0] }
 0x43e   : > { %1904 = vmatpush.bf16.msra.mxu1 %v7237_v44  ;;  %v7344_v44 = vld [vmem:[#allocation11 + $0x318] sm:$0xf] }
 0x442   : > { %1905 = vmatpush.bf16.msra.mxu1 %v7205_v55  ;;  %v7312_v55 = vld [vmem:[#allocation11 + $0x298] sm:$0xf] }
 0x443   : > { %v7313_v58 = vor.u32 %v9400_v56, %v7312_v55 }
 0x446   : > { %1906 = vmatpush.bf16.msra.mxu1 %v7173_v9  ;;  %v7280_v9 = vld [vmem:[#allocation11 + $0x218] sm:$0xf] }
 0x4b6   : > { %v1422_v31 = vpop.f32.mrf.mxu1 }
 0x4b7   : > { %v1423_v32 = vadd.f32 %v10024_v30, %v1422_v31 }
 0x4b9   : > { %v10812_v33 = vadd.f32 %v1423_v32, %v10709_v36  ;;  %v9401_v36 = vld [vmem:[#allocation11 + $0x304] sm:$0xf]  ;;  %v7224_v32 = vld [vmem:[#allocation11 + $0x180] sm:$0xf] }
 0x4ba   : > { %v7325_v52 = vor.u32 %v9401_v36, %v7322_v49  ;;  %v7200_v36 = vld [vmem:[#allocation11 + $0x108] sm:$0xf] }
 0x4bb   : > { %1429 = vadd.xlane.f32.xlu0 %v10812_v33  ;;  %v9374_v49 = vld [vmem:[#allocation11 + $0x144] sm:$0xf0] }
 0x4bc   : > { %1875 = vmatpush.bf16.msra.mxu3 %v7325_v52  ;;  %v7201_v52 = vor.u32 %v9374_v49, %v7200_v36  ;;  %v7304_v49 = vld [vmem:[#allocation11 + $0x290] sm:$0xf] }
 0x4be   : > { %v1424_v34 = vpop.f32.mrf.mxu1  ;;  %1892 = vmatpush.bf16.msrb.mxu0 %v7201_v52  ;;  %v9395_v52 = vld [vmem:[#allocation11 + $0x294] sm:$0xf] }
 0x4bf   : > { %v9381_v34 = vld [vmem:[#allocation11 + $0x1bc] sm:$0xf0]  ;;  %v7309_v57 = vor.u32 %v9395_v52, %v7306_v54  ;;  %v9368_v52 = vld [vmem:[#allocation11 + $0xd4] sm:$0xf0]  ;;  %v7186_v54 = vld [vmem:[#allocation11 + $0xd8] sm:$0xf0] }
 0x4c0   : > { %1876 = vmatpush.bf16.msra.mxu3 %v7293_v10  ;;  %v7225_v37 = vor.u32 %v9381_v34, %v7224_v32  ;;  %v7128_v10 = vld [vmem:[#allocation11] sm:$0xf]  ;;  %v7376_v32 = vld [vmem:[#allocation11 + $0x398] sm:$0xf] }
 0x4c1   : > { %v7129_v13 = vor.u32 %v9357_v11, %v7128_v10  ;;  %v9416_v34 = vld [vmem:[#allocation11 + $0x3d4] sm:$0xf0] }
 0x4c2   : > { %1865 = vmatpush.bf16.msrb.mxu2 %v7225_v37  ;;  %1893 = vmatpush.bf16.msrb.mxu0 %v7169_v6  ;;  %v7377_v37 = vor.u32 %v9416_v34, %v7376_v32  ;;  %v9387_v6 = vld [vmem:[#allocation11 + $0x214] sm:$0xf]  ;;  %v9392_v10 = vld [vmem:[#allocation11 + $0x254] sm:$0xf0]  ;;  %v7250_v32 = vld [vmem:[#allocation11 + $0x1d8] sm:$0xf0] }
 0x4c3   : > { %v7277_v11 = vor.u32 %v9387_v6, %v7274_v8  ;;  %v7281_v12 = vor.u32 %v9392_v10, %v7280_v9  ;;  %v7208_v34 = vld [vmem:[#allocation11 + $0x110] sm:$0xf]  ;;  %v7152_v6 = vld [vmem:[#allocation11 + $0x18] sm:$0xf]  ;;  %v9356_v9 = vld [vmem:[#allocation11 + $0x1c] sm:$0xf] }
 0x4c4   : > { %1877 = vmatpush.bf16.msra.mxu3 %v7261_v25  ;;  %v7141_v25 = vor.u32 %v9354_v22, %v7138_v23  ;;  %v9379_v22 = vld [vmem:[#allocation11 + $0x194] sm:$0xf]  ;;  %v7154_v10 = vld [vmem:[#allocation11 + $0x58] sm:$0xf0] }
 0x4c6   : > { %1894 = vmatpush.bf16.msrb.mxu0 %v7137_v20  ;;  %1907 = vmatpush.bf16.msra.mxu1 %v7141_v25  ;;  %v9383_v20 = vld [vmem:[#allocation11 + $0x1cc] sm:$0xf0]  ;;  %v7242_v25 = vld [vmem:[#allocation11 + $0x1d0] sm:$0xf0] }
 0x4c8   : > { %1878 = vmatpush.bf16.msra.mxu3 %v7229_v40  ;;  %v7381_v40 = vor.u32 %v9412_v35, %v7378_v38  ;;  %v9375_v38 = vld [vmem:[#allocation11 + $0x14c] sm:$0xf0] }
 0x4ca   : > { %1939 = vmatpush.bf16.msra.mxu0 %v7377_v37  ;;  %1952 = vmatpush.bf16.msrb.mxu1 %v7381_v40  ;;  %v7216_v40 = vld [vmem:[#allocation11 + $0x118] sm:$0xf] }
 0x4cc   : > { %1879 = vmatpush.bf16.msra.mxu3 %v7197_v51  ;;  %v9399_v51 = vld [vmem:[#allocation11 + $0x2cc] sm:$0xf0] }
 0x4cd   : > { %v7305_v53 = vor.u32 %v9399_v51, %v7304_v49  ;;  %v7184_v51 = vld [vmem:[#allocation11 + $0x98] sm:$0xf] }
 0x4d0   : > { %1880 = vmatpush.bf16.msra.mxu3 %v7165_v3  ;;  %v9391_v3 = vld [vmem:[#allocation11 + $0x24c] sm:$0xf0] }
 0x4d1   : > { %v7273_v7 = vor.u32 %v9391_v3, %v7272_v63 }
 0x4d4   : > { %1881 = vmatpush.bf16.msra.mxu3 %v7133_v18  ;;  %v7240_v18 = vld [vmem:[#allocation11 + $0x190] sm:$0xf] }
 0x52e   : > { %v1430_v28 = vpop.xlane.xlu0 %1429 }
 0x52f   : > { %v1431_v29 = vmul.f32 %v1430_v28, %v10700_v16  ;;  %v7370_v28 = vld [vmem:[#allocation11 + $0x3d0] sm:$0xf0] }
 0x531   : > { %v10817_v30 = vsub.f32 %v10812_v33, %v1431_v29  ;;  %v7192_v33 = vld [vmem:[#allocation11 + $0x100] sm:$0xf]  ;;  %v7369_v29 = vor.u32 %v9415_v26, %v7368_v24  ;;  %v7241_v24 = vor.u32 %v9383_v20, %v7240_v18  ;;  %v7248_v26 = vld [vmem:[#allocation11 + $0x198] sm:$0xf] }
 0x532   : > { %v7193_v47 = vor.u32 %v9373_v45, %v7192_v33  ;;  %v7341_v33 = vor.u32 %v9403_v42, %v7338_v43  ;;  %v9408_v45 = vld [vmem:[#allocation11 + $0x354] sm:$0xf0]  ;;  %v7209_v42 = vor.u32 %v9375_v38, %v7208_v34  ;;  %v7213_v43 = vor.u32 %v9371_v39, %v7210_v19  ;;  %v9431_v38 = vld [vmem:[#allocation14 + $0x70] sm:$0xff]  ;;  %v9438_v39 = vld [vmem:[#allocation14 + $0xa8] sm:$0xff] }
 0x533   : > { %v1433_v31 = vmul.f32 %v10817_v30, %v10817_v30  ;;  %v7345_v48 = vor.u32 %v9408_v45, %v7344_v44  ;;  %v9372_v44 = vld [vmem:[#allocation11 + $0x11c] sm:$0xf]  ;;  %v7176_v45 = vld [vmem:[#allocation11 + $0x90] sm:$0xf]  ;;  %v9446_v19 = vld [vmem:[#allocation14 + $0xe8] sm:$0xff] }
 0x534   : > { %1866 = vmatpush.bf16.msrb.mxu2 %v7193_v47  ;;  %v7346_v47 = vld [vmem:[#allocation11 + $0x358] sm:$0xf0] }
 0x535   : > { %1434 = vadd.xlane.f32.xlu1 %v1433_v31  ;;  %v7373_v31 = vor.u32 %v9411_v27, %v7370_v28  ;;  %v7349_v36 = vor.u32 %v9404_v46, %v7346_v47  ;;  %1940 = vmatpush.bf16.msra.mxu0 %v7345_v48  ;;  %v9384_v27 = vld [vmem:[#allocation11 + $0x1d4] sm:$0xf0]  ;;  %v7245_v28 = vor.u32 %v9379_v22, %v7242_v25  ;;  %v9367_v47 = vld [vmem:[#allocation11 + $0xcc] sm:$0xf0]  ;;  %v9363_v48 = vld [vmem:[#allocation11 + $0x94] sm:$0xf] }
 0x536   : > { %v7177_v55 = vor.u32 %v9367_v47, %v7176_v45  ;;  %v10025_v22 = vld [vmem:[%s11081_s12] ss:$0 sm:$0xff]  ;;  %v9432_v34 = vld [vmem:[#allocation14 + $0x78] sm:$0xff] }
 0x537   : > { %1926 = vmatpush.bf16.msrb.mxu3 %v7373_v31  ;;  %1953 = vmatpush.bf16.msrb.mxu1 %v7349_v36  ;;  %v9380_v31 = vld [vmem:[#allocation11 + $0x19c] sm:$0xf]  ;;  %v7178_v36 = vld [vmem:[#allocation11 + $0xd0] sm:$0xf0] }
 0x538   : > { %1867 = vmatpush.bf16.msrb.mxu2 %v7161_v59  ;;  %v9396_v59 = vld [vmem:[#allocation11 + $0x29c] sm:$0xf]  ;;  %v7253_v37 = vor.u32 %v9380_v31, %v7250_v32  ;;  %v7181_v56 = vor.u32 %v9363_v48, %v7178_v36  ;;  %v9435_v36 = vld [vmem:[#allocation14 + $0x90] sm:$0xff] }
 0x539   : > { %v7317_v61 = vor.u32 %v9396_v59, %v7314_v60  ;;  %1941 = vmatpush.bf16.msra.mxu0 %v7313_v58  ;;  %v7185_v58 = vor.u32 %v9368_v52, %v7184_v51  ;;  %v9359_v59 = vld [vmem:[#allocation11 + $0x4c] sm:$0xf0]  ;;  %v9355_v60 = vld [vmem:[#allocation11 + $0x14] sm:$0xf]  ;;  %v9448_v31 = vld [vmem:[#allocation14 + $0xf8] sm:$0xff] }
 0x53a   : > { %v9424_v32 = vld [vmem:[#allocation14 + $0x38] sm:$0xff]  ;;  %v9419_v51 = vld [vmem:[#allocation14 + $0x10] sm:$0xff] }
 0x53b   : > { %1927 = vmatpush.bf16.msrb.mxu3 %v7341_v33  ;;  %1954 = vmatpush.bf16.msrb.mxu1 %v7317_v61  ;;  %v7218_v33 = vld [vmem:[#allocation11 + $0x158] sm:$0xf0]  ;;  %v7146_v61 = vld [vmem:[#allocation11 + $0x50] sm:$0xf0] }
 0x53c   : > { %1868 = vmatpush.bf16.msrb.mxu2 %v7129_v13  ;;  %v9388_v13 = vld [vmem:[#allocation11 + $0x21c] sm:$0xf]  ;;  %v7221_v49 = vor.u32 %v9372_v44, %v7218_v33  ;;  %v9421_v44 = vld [vmem:[#allocation14 + $0x20] sm:$0xff]  ;;  %v9427_v52 = vld [vmem:[#allocation14 + $0x50] sm:$0xff] }
 0x53d   : > { %v7285_v15 = vor.u32 %v9388_v13, %v7282_v14  ;;  %1942 = vmatpush.bf16.msra.mxu0 %v7281_v12  ;;  %v7149_v12 = vor.u32 %v9355_v60, %v7146_v61  ;;  %v9429_v33 = vld [vmem:[#allocation14 + $0x60] sm:$0xff]  ;;  %v9436_v45 = vld [vmem:[#allocation14 + $0x98] sm:$0xff] }
 0x53e   : > { %v9420_v47 = vld [vmem:[#allocation14 + $0x18] sm:$0xff]  ;;  %v9417_v61 = vld [vmem:[#allocation14] sm:$0xff] }
 0x53f   : > { %1928 = vmatpush.bf16.msrb.mxu3 %v7309_v57  ;;  %1955 = vmatpush.bf16.msrb.mxu1 %v7285_v15  ;;  %v7144_v57 = vld [vmem:[#allocation11 + $0x10] sm:$0xf]  ;;  %v7157_v15 = vor.u32 %v9356_v9, %v7154_v10  ;;  %v9428_v48 = vld [vmem:[#allocation14 + $0x58] sm:$0xff] }
 0x540   : > { %1913 = vmatpush.bf16.msra.mxu2 %v7369_v29  ;;  %v7249_v29 = vor.u32 %v9384_v27, %v7248_v26  ;;  %v9480_v60 = vld [vmem:[#allocation14 + $0x1f8] sm:$0xff]  ;;  %v9455_v9 = vld [vmem:[#allocation14 + $0x130] sm:$0xff] }
 0x541   : > { %v9463_v10 = vld [vmem:[#allocation14 + $0x170] sm:$0xff] }
 0x542   : > { %1943 = vmatpush.bf16.msra.mxu0 %v7249_v29  ;;  %v9440_v29 = vld [vmem:[#allocation14 + $0xb8] sm:$0xff] }
 0x543   : > { %1929 = vmatpush.bf16.msrb.mxu3 %v7277_v11  ;;  %1956 = vmatpush.bf16.msrb.mxu1 %v7253_v37  ;;  %v7145_v11 = vor.u32 %v9359_v59, %v7144_v57  ;;  %v9423_v37 = vld [vmem:[#allocation14 + $0x30] sm:$0xff]  ;;  %v9433_v57 = vld [vmem:[#allocation14 + $0x80] sm:$0xff]  ;;  %v9472_v59 = vld [vmem:[#allocation14 + $0x1b8] sm:$0xff] }
 0x544   : > { %1914 = vmatpush.bf16.msra.mxu2 %v7337_v41  ;;  %v9376_v41 = vld [vmem:[#allocation11 + $0x154] sm:$0xf0] }
 0x545   : > { %v7217_v46 = vor.u32 %v9376_v41, %v7216_v40  ;;  %v9422_v40 = vld [vmem:[#allocation14 + $0x28] sm:$0xff] }
 0x546   : > { %v9430_v41 = vld [vmem:[#allocation14 + $0x68] sm:$0xff] }
 0x547   : > { %1930 = vmatpush.bf16.msrb.mxu3 %v7245_v28  ;;  %1944 = vmatpush.bf16.msra.mxu0 %v7217_v46  ;;  %v9444_v46 = vld [vmem:[#allocation14 + $0xd8] sm:$0xff] }
 0x548   : > { %1915 = vmatpush.bf16.msra.mxu2 %v7305_v53  ;;  %v9364_v53 = vld [vmem:[#allocation11 + $0x9c] sm:$0xf]  ;;  %1957 = vmatpush.bf16.msrb.mxu1 %v7221_v49  ;;  %v9443_v49 = vld [vmem:[#allocation14 + $0xd0] sm:$0xff] }
 0x549   : > { %v7189_v3 = vor.u32 %v9364_v53, %v7186_v54  ;;  %v9434_v53 = vld [vmem:[#allocation14 + $0x88] sm:$0xff] }
 0x54a   : > { %v9442_v54 = vld [vmem:[#allocation14 + $0xc8] sm:$0xff] }
 0x54b   : > { %1931 = vmatpush.bf16.msrb.mxu3 %v7213_v43  ;;  %1945 = vmatpush.bf16.msra.mxu0 %v7185_v58  ;;  %v9445_v43 = vld [vmem:[#allocation14 + $0xe0] sm:$0xff] }
 0x54c   : > { %1916 = vmatpush.bf16.msra.mxu2 %v7273_v7  ;;  %v9360_v7 = vld [vmem:[#allocation11 + $0x54] sm:$0xf0]  ;;  %1958 = vmatpush.bf16.msrb.mxu1 %v7189_v3  ;;  %v9441_v58 = vld [vmem:[#allocation14 + $0xc0] sm:$0xff] }
 0x54d   : > { %v7153_v14 = vor.u32 %v9360_v7, %v7152_v6  ;;  %v9456_v3 = vld [vmem:[#allocation14 + $0x138] sm:$0xff]  ;;  %v9471_v7 = vld [vmem:[#allocation14 + $0x1b0] sm:$0xff] }
 0x54e   : > { %v9464_v6 = vld [vmem:[#allocation14 + $0x178] sm:$0xff] }
 0x54f   : > { %1932 = vmatpush.bf16.msrb.mxu3 %v7181_v56  ;;  %1946 = vmatpush.bf16.msra.mxu0 %v7153_v14  ;;  %v9426_v56 = vld [vmem:[#allocation14 + $0x48] sm:$0xff] }
 0x550   : > { %1917 = vmatpush.bf16.msra.mxu2 %v7241_v24  ;;  %1959 = vmatpush.bf16.msrb.mxu1 %v7157_v15  ;;  %v10026_v24 = vld [vmem:[%s11120_s26] ss:$0 sm:$0xff]  ;;  %v9469_v15 = vld [vmem:[#allocation14 + $0x1a0] sm:$0xff] }
 0x551   : > { %v9462_v14 = vld [vmem:[#allocation14 + $0x168] sm:$0xff] }
 0x553   : > { %1933 = vmatpush.bf16.msrb.mxu3 %v7149_v12  ;;  %v9478_v12 = vld [vmem:[#allocation14 + $0x1e8] sm:$0xff] }
 0x554   : > { %1918 = vmatpush.bf16.msra.mxu2 %v7209_v42  ;;  %v9437_v42 = vld [vmem:[#allocation14 + $0xa0] sm:$0xff] }
 0x558   : > { %1919 = vmatpush.bf16.msra.mxu2 %v7177_v55  ;;  %v9418_v55 = vld [vmem:[#allocation14 + $0x8] sm:$0xff] }
 0x55c   : > { %1920 = vmatpush.bf16.msra.mxu2 %v7145_v11  ;;  %v9470_v11 = vld [vmem:[#allocation14 + $0x1a8] sm:$0xff] }
 0x5a8   : > { %v1435_v17 = vpop.xlane.xlu1 %1434 }
 0x5a9   : > { %v1436_v23 = vmul.f32 %v1435_v17, %v10700_v16 }
 0x5ab   : > { %v10822_v35 = vadd.f32 1e-05, %v1436_v23 }
 0x5ad   : > { %10072 = vrsqrt.f32 %v10822_v35  ;;  %vm1444_vm7 = vweird.f32 %v10822_v35 }
 0x5b3   : > { %v10073_v63 = vpop.eup %10072 }
 0x5b4   : > { %v1439_v8 = vmul.f32 %v10073_v63, %v10822_v35  ;;  %vm1445_vm6 = vweird.f32 %v10073_v63  ;;  %v9447_v35 = vld [vmem:[#allocation14 + $0xf0] sm:$0xff] }
 0x5b5   : > { %vm1446_vm8 = vmor %vm1444_vm7, %vm1445_vm6 }
 0x5b6   : > { %v1440_v13 = vmul.f32 %v10073_v63, %v1439_v8  ;;  %v9479_v8 = vld [vmem:[#allocation14 + $0x1f0] sm:$0xff] }
 0x5b8   : > { %v1441_v17 = vmul.f32 0.5, %v1440_v13  ;;  %v9454_v13 = vld [vmem:[#allocation14 + $0x128] sm:$0xff] }
 0x5ba   : > { %v1442_v18 = vsub.f32 1.5, %v1441_v17  ;;  %v9477_v17 = vld [vmem:[#allocation14 + $0x1e0] sm:$0xff] }
 0x5bc   : > { %v1443_v20 = vmul.f32 %v10073_v63, %v1442_v18  ;;  %v9453_v18 = vld [vmem:[#allocation14 + $0x120] sm:$0xff] }
 0x5be   : > { %v1447_v23 = vsel %vm1446_vm8, %v10073_v63, %v1443_v20  ;;  %v9425_v63 = vld [vmem:[#allocation14 + $0x40] sm:$0xff] }
 0x5bf   : > { %v1448_v25 = vmul.f32 %v1447_v23, %v10817_v30  ;;  %v9439_v30 = vld [vmem:[#allocation14 + $0xb0] sm:$0xff]  ;;  %v9461_v20 = vld [vmem:[#allocation14 + $0x160] sm:$0xff]  ;;  %v9476_v23 = vld [vmem:[#allocation14 + $0x1d8] sm:$0xff] }
 0x5c1   : > { %v1452_v26 = vmul.f32 %v10025_v22, %v1448_v25  ;;  %v9468_v22 = vld [vmem:[#allocation14 + $0x198] sm:$0xff]  ;;  %v9475_v25 = vld [vmem:[#allocation14 + $0x1d0] sm:$0xff] }
 0x5c3   : > { %v10834_v27 = vadd.f32 %v10026_v24, %v1452_v26  ;;  %v9467_v24 = vld [vmem:[#allocation14 + $0x190] sm:$0xff]  ;;  %v9452_v26 = vld [vmem:[#allocation14 + $0x118] sm:$0xff] }
 0x5c5   : > { %v10838_v28 = vpack.c.bf16 %v10834_v27, %v10834_v27 }
 0x5c7   : > { %1869 = vmatmul.bf16.vlgmr.msrb.gmra.mxu2 %v10838_v28  ;;  %1882 = vmatmul.bf16.vlgmr.msra.gmra.mxu3 %v10838_v28 }
 0x5c8   : > { %1895 = vmatmul.bf16.vlgmr.msrb.gmra.mxu0 %v10838_v28  ;;  %1908 = vmatmul.bf16.vlgmr.msra.gmra.mxu1 %v10838_v28 }
 0x5c9   : > { %2519 = vmatpush.bf16.msrb.mxu0 %v9440_v29  ;;  %2532 = vmatpush.bf16.msra.mxu1 %v9448_v31  ;;  %v9460_v29 = vld [vmem:[#allocation14 + $0x158] sm:$0xff]  ;;  %v9466_v31 = vld [vmem:[#allocation14 + $0x188] sm:$0xff] }
 0x5ca   : > { %2493 = vmatpush.bf16.msrb.mxu2 %v9424_v32  ;;  %2506 = vmatpush.bf16.msra.mxu3 %v9432_v34  ;;  %v9474_v32 = vld [vmem:[#allocation14 + $0x1c8] sm:$0xff]  ;;  %v9451_v34 = vld [vmem:[#allocation14 + $0x110] sm:$0xff] }
 0x5cd   : > { %2520 = vmatpush.bf16.msrb.mxu0 %v9439_v30  ;;  %2533 = vmatpush.bf16.msra.mxu1 %v9447_v35  ;;  %v9459_v30 = vld [vmem:[#allocation14 + $0x150] sm:$0xff]  ;;  %v9465_v35 = vld [vmem:[#allocation14 + $0x180] sm:$0xff] }
 0x5ce   : > { %2494 = vmatpush.bf16.msrb.mxu2 %v9423_v37  ;;  %2507 = vmatpush.bf16.msra.mxu3 %v9431_v38  ;;  %v9473_v37 = vld [vmem:[#allocation14 + $0x1c0] sm:$0xff]  ;;  %v9450_v38 = vld [vmem:[#allocation14 + $0x108] sm:$0xff] }
 0x5d1   : > { %2521 = vmatpush.bf16.msrb.mxu0 %v9438_v39  ;;  %2534 = vmatpush.bf16.msra.mxu1 %v9446_v19  ;;  %v9458_v39 = vld [vmem:[#allocation14 + $0x148] sm:$0xff]  ;;  %v9449_v19 = vld [vmem:[#allocation14 + $0x100] sm:$0xff] }
 0x5d2   : > { %2495 = vmatpush.bf16.msrb.mxu2 %v9422_v40  ;;  %2508 = vmatpush.bf16.msra.mxu3 %v9430_v41  ;;  %v9457_v40 = vld [vmem:[#allocation14 + $0x140] sm:$0xff] }
 0x5d3   : > { %v10848_v41 = vld [vmem:[#allocation13] sm:$0xff] }
 0x5d5   : > { %2522 = vmatpush.bf16.msrb.mxu0 %v9437_v42  ;;  %2535 = vmatpush.bf16.msra.mxu1 %v9445_v43  ;;  %v1527_v42 = vperm.slane %v10848_v41, 2  ;;  %v1528_v43 = vperm.slane %v10848_v41, 3 }
 0x5d6   : > { %2496 = vmatpush.bf16.msrb.mxu2 %v9421_v44  ;;  %2509 = vmatpush.bf16.msra.mxu3 %v9429_v33 }
 0x5d7   : > { %1921 = vmatmul.bf16.vlgmr.msra.gmra.mxu2 %v10838_v28  ;;  %1934 = vmatmul.bf16.vlgmr.msrb.gmra.mxu3 %v10838_v28 }
 0x5d8   : > { %1947 = vmatmul.bf16.vlgmr.msra.gmra.mxu0 %v10838_v28  ;;  %1960 = vmatmul.bf16.vlgmr.msrb.gmra.mxu1 %v10838_v28 }
 0x5d9   : > { %2523 = vmatpush.bf16.msrb.mxu0 %v9436_v45  ;;  %2536 = vmatpush.bf16.msra.mxu1 %v9444_v46  ;;  %v7872_v45 = vld [vmem:[#allocation11 + $0x3a8] sm:$0xf] }
 0x5da   : > { %2497 = vmatpush.bf16.msrb.mxu2 %v9420_v47  ;;  %2510 = vmatpush.bf16.msra.mxu3 %v9428_v48  ;;  %v9542_v48 = vld [vmem:[#allocation11 + $0x3e4] sm:$0xf0] }
 0x5dd   : > { %2524 = vmatpush.bf16.msrb.mxu0 %v9435_v36  ;;  %2537 = vmatpush.bf16.msra.mxu1 %v9443_v49  ;;  %v9538_v36 = vld [vmem:[#allocation11 + $0x3ac] sm:$0xf] }
 0x5de   : > { %2498 = vmatpush.bf16.msrb.mxu2 %v9419_v51  ;;  %2511 = vmatpush.bf16.msra.mxu3 %v9427_v52  ;;  %v7874_v49 = vld [vmem:[#allocation11 + $0x3e8] sm:$0xf0]  ;;  %v1525_v51 = vperm.slane %v10848_v41, 0  ;;  %v1526_v52 = vperm.slane %v10848_v41, 1 }
 0x5e1   : > { %2525 = vmatpush.bf16.msrb.mxu0 %v9434_v53  ;;  %2538 = vmatpush.bf16.msra.mxu1 %v9442_v54 }
 0x5e2   : > { %2499 = vmatpush.bf16.msrb.mxu2 %v9418_v55  ;;  %2512 = vmatpush.bf16.msra.mxu3 %v9426_v56  ;;  %v7873_v55 = vor.u32 %v9542_v48, %v7872_v45  ;;  %v7877_v56 = vor.u32 %v9538_v36, %v7874_v49  ;;  %v9514_v45 = vld [vmem:[#allocation11 + $0x22c] sm:$0xf]  ;;  %v7800_v36 = vld [vmem:[#allocation11 + $0x2a0] sm:$0xf] }
 0x5e3   : > { %v9525_v49 = vld [vmem:[#allocation11 + $0x2dc] sm:$0xf0] }
 0x5e5   : > { %2526 = vmatpush.bf16.msrb.mxu0 %v9433_v57  ;;  %2539 = vmatpush.bf16.msra.mxu1 %v9441_v58  ;;  %v7840_v57 = vld [vmem:[#allocation11 + $0x328] sm:$0xf] }
 0x5e6   : > { %2500 = vmatpush.bf16.msrb.mxu2 %v9417_v61  ;;  %2513 = vmatpush.bf16.msra.mxu3 %v9425_v63  ;;  %v9534_v63 = vld [vmem:[#allocation11 + $0x364] sm:$0xf0] }
 0x5e9   : > { %2571 = vmatpush.bf16.msra.mxu0 %v9472_v59  ;;  %2584 = vmatpush.bf16.msrb.mxu1 %v9480_v60 }
 0x5ea   : > { %2545 = vmatpush.bf16.msra.mxu2 %v9456_v3  ;;  %2558 = vmatpush.bf16.msrb.mxu3 %v9464_v6  ;;  %v9530_v3 = vld [vmem:[#allocation11 + $0x32c] sm:$0xf] }
 0x5eb   : > { %v7842_v6 = vld [vmem:[#allocation11 + $0x368] sm:$0xf0] }
 0x5ed   : > { %2572 = vmatpush.bf16.msra.mxu0 %v9471_v7  ;;  %2585 = vmatpush.bf16.msrb.mxu1 %v9479_v8 }
 0x5ee   : > { %2546 = vmatpush.bf16.msra.mxu2 %v9455_v9  ;;  %2559 = vmatpush.bf16.msrb.mxu3 %v9463_v10  ;;  %v7864_v9 = vld [vmem:[#allocation11 + $0x3a0] sm:$0xf] }
 0x5ef   : > { %v9541_v10 = vld [vmem:[#allocation11 + $0x3dc] sm:$0xf0] }
 0x5f1   : > { %2573 = vmatpush.bf16.msra.mxu0 %v9470_v11  ;;  %2586 = vmatpush.bf16.msrb.mxu1 %v9478_v12  ;;  %v9537_v11 = vld [vmem:[#allocation11 + $0x3a4] sm:$0xf] }
 0x5f2   : > { %2547 = vmatpush.bf16.msra.mxu2 %v9454_v13  ;;  %2560 = vmatpush.bf16.msrb.mxu3 %v9462_v14  ;;  %v7866_v12 = vld [vmem:[#allocation11 + $0x3e0] sm:$0xf0] }
 0x5f5   : > { %2574 = vmatpush.bf16.msra.mxu0 %v9469_v15  ;;  %2587 = vmatpush.bf16.msrb.mxu1 %v9477_v17 }
 0x5f6   : > { %2548 = vmatpush.bf16.msra.mxu2 %v9453_v18  ;;  %2561 = vmatpush.bf16.msrb.mxu3 %v9461_v20  ;;  %v7841_v18 = vor.u32 %v9534_v63, %v7840_v57  ;;  %v7845_v20 = vor.u32 %v9530_v3, %v7842_v6  ;;  %v7744_v57 = vld [vmem:[#allocation11 + $0x1a8] sm:$0xf]  ;;  %v7746_v63 = vld [vmem:[#allocation11 + $0x1e8] sm:$0xf0]  ;;  %v7801_v3 = vor.u32 %v9525_v49, %v7800_v36 }
 0x5f9   : > { %2575 = vmatpush.bf16.msra.mxu0 %v9468_v22  ;;  %2588 = vmatpush.bf16.msrb.mxu1 %v9476_v23  ;;  %v7808_v22 = vld [vmem:[#allocation11 + $0x2a8] sm:$0xf] }
 0x5fa   : > { %2549 = vmatpush.bf16.msra.mxu2 %v9452_v26  ;;  %2562 = vmatpush.bf16.msrb.mxu3 %v9460_v29  ;;  %v9526_v23 = vld [vmem:[#allocation11 + $0x2e4] sm:$0xf0] }
 0x5fd   : > { %2576 = vmatpush.bf16.msra.mxu0 %v9467_v24  ;;  %2589 = vmatpush.bf16.msrb.mxu1 %v9475_v25  ;;  %v9522_v24 = vld [vmem:[#allocation11 + $0x2ac] sm:$0xf] }
 0x5fe   : > { %2550 = vmatpush.bf16.msra.mxu2 %v9451_v34  ;;  %2563 = vmatpush.bf16.msrb.mxu3 %v9459_v30  ;;  %v7810_v25 = vld [vmem:[#allocation11 + $0x2e8] sm:$0xf0]  ;;  %v7832_v34 = vld [vmem:[#allocation11 + $0x320] sm:$0xf] }
 0x5ff   : > { %v9533_v30 = vld [vmem:[#allocation11 + $0x35c] sm:$0xf0] }
 0x601   : > { %2577 = vmatpush.bf16.msra.mxu0 %v9466_v31  ;;  %2590 = vmatpush.bf16.msrb.mxu1 %v9474_v32  ;;  %v7865_v31 = vor.u32 %v9541_v10, %v7864_v9  ;;  %v7869_v32 = vor.u32 %v9537_v11, %v7866_v12  ;;  %v7768_v9 = vld [vmem:[#allocation11 + $0x220] sm:$0xf] }
 0x602   : > { %2551 = vmatpush.bf16.msra.mxu2 %v9450_v38  ;;  %2564 = vmatpush.bf16.msrb.mxu3 %v9458_v39  ;;  %v7809_v38 = vor.u32 %v9526_v23, %v7808_v22  ;;  %v7813_v39 = vor.u32 %v9522_v24, %v7810_v25  ;;  %v9517_v10 = vld [vmem:[#allocation11 + $0x25c] sm:$0xf0] }
 0x603   : > { %v7769_v25 = vor.u32 %v9517_v10, %v7768_v9  ;;  %v9540_v10 = vld [vmem:[#allocation11 + $0x3bc] sm:$0xf] }
 0x605   : > { %2578 = vmatpush.bf16.msra.mxu0 %v9465_v35  ;;  %2591 = vmatpush.bf16.msrb.mxu1 %v9473_v37  ;;  %v9529_v35 = vld [vmem:[#allocation11 + $0x324] sm:$0xf] }
 0x606   : > { %2552 = vmatpush.bf16.msra.mxu2 %v9449_v19  ;;  %2565 = vmatpush.bf16.msrb.mxu3 %v9457_v40  ;;  %v7834_v37 = vld [vmem:[#allocation11 + $0x360] sm:$0xf0]  ;;  %v1531_v19 = vperm.slane %v10848_v41, 6  ;;  %v1532_v40 = vperm.slane %v10848_v41, 7 }
 0x607   : > { %v7837_v48 = vor.u32 %v9529_v35, %v7834_v37  ;;  %v9509_v35 = vld [vmem:[#allocation11 + $0x1dc] sm:$0xf0]  ;;  %v9505_v37 = vld [vmem:[#allocation11 + $0x1a4] sm:$0xf] }
 0x645   : > { %v1896_v44 = vpop.f32.mrf.mxu0  ;;  %v1909_v33 = vpop.f32.mrf.mxu1 }
 0x646   : > { %v1897_v46 = vadd.f32 %v1896_v44, %v1527_v42  ;;  %v1910_v47 = vadd.f32 %v1909_v33, %v1528_v43  ;;  %v7776_v42 = vld [vmem:[#allocation11 + $0x228] sm:$0xf] }
 0x647   : > { %v9518_v33 = vld [vmem:[#allocation11 + $0x264] sm:$0xf0] }
 0x648   : > { %v1967_v53 = vmax.f32 %v1897_v46, 0.0  ;;  %v1968_v54 = vmax.f32 %v1910_v47, 0.0  ;;  %v7778_v46 = vld [vmem:[#allocation11 + $0x268] sm:$0xf0]  ;;  %v7833_v47 = vor.u32 %v9533_v30, %v7832_v34  ;;  %v7736_v30 = vld [vmem:[#allocation11 + $0x1a0] sm:$0xf] }
 0x64a   : > { %v1975_v58 = vpack.c.bf16 %v1967_v53, %v1967_v53  ;;  %v1976_v59 = vpack.c.bf16 %v1968_v54, %v1968_v54  ;;  %v1870_v60 = vpop.f32.mrf.mxu2  ;;  %v1883_v61 = vpop.f32.mrf.mxu3 }
 0x64b   : > { %v1871_v7 = vadd.f32 %v1870_v60, %v1525_v51  ;;  %v1884_v8 = vadd.f32 %v1883_v61, %v1526_v52  ;;  %v9521_v51 = vld [vmem:[#allocation11 + $0x2a4] sm:$0xf]  ;;  %v9510_v60 = vld [vmem:[#allocation11 + $0x1e4] sm:$0xf0]  ;;  %v9506_v61 = vld [vmem:[#allocation11 + $0x1ac] sm:$0xf] }
 0x64c   : > { %2527 = vmatmul.bf16.vlgmr.msrb.gmra.mxu0 %v1975_v58  ;;  %2540 = vmatmul.bf16.vlgmr.msra.gmra.mxu1 %v1976_v59  ;;  %v7802_v52 = vld [vmem:[#allocation11 + $0x2e0] sm:$0xf0] }
 0x64d   : > { %v1965_v13 = vmax.f32 %v1871_v7, 0.0  ;;  %v1966_v14 = vmax.f32 %v1884_v8, 0.0  ;;  %3029 = vmatpush.bf16.msrb.mxu0 %v7873_v55  ;;  %3042 = vmatpush.bf16.msra.mxu1 %v7877_v56  ;;  %v1898_v15 = vpop.f32.mrf.mxu0  ;;  %v1911_v17 = vpop.f32.mrf.mxu1  ;;  %v7777_v55 = vor.u32 %v9518_v33, %v7776_v42  ;;  %v7781_v56 = vor.u32 %v9514_v45, %v7778_v46  ;;  %v7680_v33 = vld [vmem:[#allocation11 + $0xa8] sm:$0xf] }
 0x64e   : > { %v7805_v6 = vor.u32 %v9521_v51, %v7802_v52  ;;  %v1529_v7 = vperm.slane %v10848_v41, 4  ;;  %v1530_v8 = vperm.slane %v10848_v41, 5  ;;  %v7745_v15 = vor.u32 %v9510_v60, %v7744_v57  ;;  %v9494_v46 = vld [vmem:[#allocation11 + $0xe4] sm:$0xf0]  ;;  %v7704_v52 = vld [vmem:[#allocation11 + $0x120] sm:$0xf] }
 0x64f   : > { %v1973_v26 = vpack.c.bf16 %v1965_v13, %v1965_v13  ;;  %v1974_v29 = vpack.c.bf16 %v1966_v14, %v1966_v14  ;;  %v9513_v13 = vld [vmem:[#allocation11 + $0x224] sm:$0xf]  ;;  %v7749_v17 = vor.u32 %v9506_v61, %v7746_v63  ;;  %v7737_v45 = vor.u32 %v9509_v35, %v7736_v30  ;;  %v9482_v60 = vld [vmem:[#allocation11 + $0x2c] sm:$0xf]  ;;  %v7880_v35 = vld [vmem:[#allocation11 + $0x3b0] sm:$0xf] }
 0x650   : > { %v7770_v14 = vld [vmem:[#allocation11 + $0x260] sm:$0xf0] }
 0x651   : > { %3030 = vmatpush.bf16.msrb.mxu0 %v7841_v18  ;;  %3043 = vmatpush.bf16.msra.mxu1 %v7845_v20  ;;  %v7712_v18 = vld [vmem:[#allocation11 + $0x128] sm:$0xf]  ;;  %v7773_v34 = vor.u32 %v9513_v13, %v7770_v14  ;;  %v9493_v13 = vld [vmem:[#allocation11 + $0xdc] sm:$0xf0]  ;;  %v9489_v14 = vld [vmem:[#allocation11 + $0xa4] sm:$0xf] }
 0x652   : > { %2501 = vmatmul.bf16.vlgmr.msrb.gmra.mxu2 %v1973_v26  ;;  %2514 = vmatmul.bf16.vlgmr.msra.gmra.mxu3 %v1974_v29  ;;  %v1872_v43 = vpop.f32.mrf.mxu2  ;;  %v1885_v44 = vpop.f32.mrf.mxu3  ;;  %v9502_v26 = vld [vmem:[#allocation11 + $0x164] sm:$0xf0]  ;;  %v9498_v29 = vld [vmem:[#allocation11 + $0x12c] sm:$0xf]  ;;  %v7642_v30 = vld [vmem:[#allocation11 + $0x60] sm:$0xf0] }
 0x653   : > { %3003 = vmatpush.bf16.msrb.mxu2 %v7865_v31  ;;  %3016 = vmatpush.bf16.msra.mxu3 %v7869_v32  ;;  %v7714_v31 = vld [vmem:[#allocation11 + $0x168] sm:$0xf0]  ;;  %v7713_v43 = vor.u32 %v9502_v26, %v7712_v18 }
 0x654   : > { %v7717_v44 = vor.u32 %v9498_v29, %v7714_v31  ;;  %v7858_v31 = vld [vmem:[#allocation11 + $0x378] sm:$0xf0] }
 0x655   : > { %3031 = vmatpush.bf16.msrb.mxu0 %v7809_v38  ;;  %3044 = vmatpush.bf16.msra.mxu1 %v7813_v39  ;;  %v1948_v53 = vpop.f32.mrf.mxu0  ;;  %v1961_v54 = vpop.f32.mrf.mxu1  ;;  %v7738_v38 = vld [vmem:[#allocation11 + $0x1e0] sm:$0xf0] }
 0x656   : > { %v1949_v58 = vadd.f32 %v1948_v53, %v1531_v19  ;;  %v1962_v59 = vadd.f32 %v1961_v54, %v1532_v40  ;;  %v7741_v51 = vor.u32 %v9505_v37, %v7738_v38  ;;  %v9501_v53 = vld [vmem:[#allocation11 + $0x15c] sm:$0xf0]  ;;  %v9497_v54 = vld [vmem:[#allocation11 + $0x124] sm:$0xf]  ;;  %v9543_v37 = vld [vmem:[#allocation11 + $0x3ec] sm:$0xf0] }
 0x657   : > { %3004 = vmatpush.bf16.msrb.mxu2 %v7833_v47  ;;  %3017 = vmatpush.bf16.msra.mxu3 %v7837_v48  ;;  %v9490_v47 = vld [vmem:[#allocation11 + $0xac] sm:$0xf]  ;;  %v9539_v38 = vld [vmem:[#allocation11 + $0x3b4] sm:$0xf] }
 0x658   : > { %v1971_v11 = vmax.f32 %v1949_v58, 0.0  ;;  %v1972_v12 = vmax.f32 %v1962_v59, 0.0  ;;  %v7682_v48 = vld [vmem:[#allocation11 + $0xe8] sm:$0xf0]  ;;  %v7648_v58 = vld [vmem:[#allocation11 + $0x28] sm:$0xf] }
 0x659   : > { %3032 = vmatpush.bf16.msrb.mxu0 %v7777_v55  ;;  %3045 = vmatpush.bf16.msra.mxu1 %v7781_v56  ;;  %v7706_v55 = vld [vmem:[#allocation11 + $0x160] sm:$0xf0]  ;;  %v7681_v56 = vor.u32 %v9494_v46, %v7680_v33  ;;  %v7685_v57 = vor.u32 %v9490_v47, %v7682_v48  ;;  %v9486_v59 = vld [vmem:[#allocation11 + $0x64] sm:$0xf0]  ;;  %v9528_v33 = vld [vmem:[#allocation11 + $0x2f4] sm:$0xf0]  ;;  %v7881_v47 = vor.u32 %v9543_v37, %v7880_v35 }
 0x65a   : > { %v1979_v20 = vpack.c.bf16 %v1971_v11, %v1971_v11  ;;  %v1980_v22 = vpack.c.bf16 %v1972_v12, %v1972_v12  ;;  %v1922_v23 = vpop.f32.mrf.mxu2  ;;  %v1935_v24 = vpop.f32.mrf.mxu3  ;;  %v7709_v9 = vor.u32 %v9497_v54, %v7706_v55  ;;  %v7890_v11 = vld [vmem:[#allocation11 + $0x3f8] sm:$0xf0]  ;;  %v7672_v12 = vld [vmem:[#allocation11 + $0xa0] sm:$0xf]  ;;  %v7792_v55 = vld [vmem:[#allocation11 + $0x238] sm:$0xf] }
 0x65b   : > { %3005 = vmatpush.bf16.msrb.mxu2 %v7801_v3  ;;  %3018 = vmatpush.bf16.msra.mxu3 %v7805_v6  ;;  %v1923_v41 = vadd.f32 %v1922_v23, %v1529_v7  ;;  %v1936_v32 = vadd.f32 %v1935_v24, %v1530_v8  ;;  %v7650_v3 = vld [vmem:[#allocation11 + $0x68] sm:$0xf0]  ;;  %v7888_v6 = vld [vmem:[#allocation11 + $0x3b8] sm:$0xf]  ;;  %v7705_v8 = vor.u32 %v9501_v53, %v7704_v52  ;;  %v7826_v46 = vld [vmem:[#allocation11 + $0x2f8] sm:$0xf0] }
 0x65c   : > { %2579 = vmatmul.bf16.vlgmr.msra.gmra.mxu0 %v1979_v20  ;;  %2592 = vmatmul.bf16.vlgmr.msrb.gmra.mxu1 %v1980_v22  ;;  %v9544_v7 = vld [vmem:[#allocation11 + $0x3f4] sm:$0xf0]  ;;  %v7653_v18 = vor.u32 %v9482_v60, %v7650_v3  ;;  %v7893_v22 = vor.u32 %v9540_v10, %v7890_v11  ;;  %v7673_v26 = vor.u32 %v9493_v13, %v7672_v12  ;;  %v7850_v52 = vld [vmem:[#allocation11 + $0x370] sm:$0xf0]  ;;  %v9508_v11 = vld [vmem:[#allocation11 + $0x1bc] sm:$0xf] }
 0x65d   : > { %v1969_v39 = vmax.f32 %v1923_v41, 0.0  ;;  %v1970_v19 = vmax.f32 %v1936_v32, 0.0  ;;  %3033 = vmatpush.bf16.msrb.mxu0 %v7745_v15  ;;  %3046 = vmatpush.bf16.msra.mxu1 %v7749_v17  ;;  %v1950_v40 = vpop.f32.mrf.mxu0  ;;  %v1963_v42 = vpop.f32.mrf.mxu1  ;;  %v7674_v15 = vld [vmem:[#allocation11 + $0xe0] sm:$0xf0]  ;;  %v7649_v17 = vor.u32 %v9486_v59, %v7648_v58  ;;  %v7889_v20 = vor.u32 %v9544_v7, %v7888_v6  ;;  %v7856_v23 = vld [vmem:[#allocation11 + $0x338] sm:$0xf] }
 0x65e   : > { %v9536_v24 = vld [vmem:[#allocation11 + $0x374] sm:$0xf0]  ;;  %v7677_v29 = vor.u32 %v9489_v14, %v7674_v15  ;;  %v7640_v41 = vld [vmem:[#allocation11 + $0x20] sm:$0xf]  ;;  %v7794_v58 = vld [vmem:[#allocation11 + $0x278] sm:$0xf0] }
 0x65f   : > { %v1977_v36 = vpack.c.bf16 %v1969_v39, %v1969_v39  ;;  %v1978_v49 = vpack.c.bf16 %v1970_v19, %v1970_v19  ;;  %3006 = vmatpush.bf16.msrb.mxu2 %v7769_v25  ;;  %3019 = vmatpush.bf16.msra.mxu3 %v7773_v34  ;;  %v9532_v25 = vld [vmem:[#allocation11 + $0x33c] sm:$0xf]  ;;  %v9485_v32 = vld [vmem:[#allocation11 + $0x5c] sm:$0xf0]  ;;  %v9481_v34 = vld [vmem:[#allocation11 + $0x24] sm:$0xf]  ;;  %v7857_v19 = vor.u32 %v9536_v24, %v7856_v23 }
 0x660   : > { %v7882_v39 = vld [vmem:[#allocation11 + $0x3f0] sm:$0xf0]  ;;  %v7861_v40 = vor.u32 %v9532_v25, %v7858_v31  ;;  %v7824_v42 = vld [vmem:[#allocation11 + $0x2b8] sm:$0xf]  ;;  %v7762_v12 = vld [vmem:[#allocation11 + $0x1f8] sm:$0xf0] }
 0x661   : > { %3034 = vmatpush.bf16.msrb.mxu0 %v7713_v43  ;;  %3047 = vmatpush.bf16.msra.mxu1 %v7717_v44  ;;  %v7641_v43 = vor.u32 %v9485_v32, %v7640_v41  ;;  %v7645_v44 = vor.u32 %v9481_v34, %v7642_v30  ;;  %v7885_v48 = vor.u32 %v9539_v38, %v7882_v39  ;;  %v9523_v3 = vld [vmem:[#allocation11 + $0x2b4] sm:$0xf]  ;;  %v9512_v10 = vld [vmem:[#allocation11 + $0x1f4] sm:$0xf0]  ;;  %v7784_v15 = vld [vmem:[#allocation11 + $0x230] sm:$0xf] }
 0x662   : > { %2553 = vmatmul.bf16.vlgmr.msra.gmra.mxu2 %v1977_v36  ;;  %2566 = vmatmul.bf16.vlgmr.msrb.gmra.mxu3 %v1978_v49  ;;  %v1924_v61 = vpop.f32.mrf.mxu2  ;;  %v1937_v63 = vpop.f32.mrf.mxu3  ;;  %v7848_v36 = vld [vmem:[#allocation11 + $0x330] sm:$0xf]  ;;  %v7825_v53 = vor.u32 %v9528_v33, %v7824_v42  ;;  %v7818_v6 = vld [vmem:[#allocation11 + $0x2f0] sm:$0xf0]  ;;  %v7765_v23 = vor.u32 %v9508_v11, %v7762_v12  ;;  %v7728_v24 = vld [vmem:[#allocation11 + $0x138] sm:$0xf] }
 0x663   : > { %3007 = vmatpush.bf16.msrb.mxu2 %v7737_v45  ;;  %3020 = vmatpush.bf16.msra.mxu3 %v7741_v51  ;;  %v9524_v45 = vld [vmem:[#allocation11 + $0x2bc] sm:$0xf]  ;;  %v9535_v49 = vld [vmem:[#allocation11 + $0x36c] sm:$0xf0]  ;;  %v9531_v51 = vld [vmem:[#allocation11 + $0x334] sm:$0xf]  ;;  %v7821_v14 = vor.u32 %v9523_v3, %v7818_v6 }
 0x664   : > { %v7829_v54 = vor.u32 %v9524_v45, %v7826_v46  ;;  %v7849_v59 = vor.u32 %v9535_v49, %v7848_v36  ;;  %v7853_v60 = vor.u32 %v9531_v51, %v7850_v52  ;;  %v7816_v61 = vld [vmem:[#allocation11 + $0x2b0] sm:$0xf]  ;;  %v9504_v25 = vld [vmem:[#allocation11 + $0x174] sm:$0xf0]  ;;  %v9507_v30 = vld [vmem:[#allocation11 + $0x1b4] sm:$0xf] }
 0x665   : > { %3035 = vmatpush.bf16.msrb.mxu0 %v7681_v56  ;;  %3048 = vmatpush.bf16.msra.mxu1 %v7685_v57  ;;  %v9520_v56 = vld [vmem:[#allocation11 + $0x274] sm:$0xf0]  ;;  %v9516_v57 = vld [vmem:[#allocation11 + $0x23c] sm:$0xf]  ;;  %v9527_v63 = vld [vmem:[#allocation11 + $0x2ec] sm:$0xf0]  ;;  %v7729_v37 = vor.u32 %v9504_v25, %v7728_v24 }
 0x666   : > { %v7793_v7 = vor.u32 %v9520_v56, %v7792_v55  ;;  %v7817_v13 = vor.u32 %v9527_v63, %v7816_v61  ;;  %v7752_v32 = vld [vmem:[#allocation11 + $0x1b0] sm:$0xf]  ;;  %v7754_v35 = vld [vmem:[#allocation11 + $0x1f0] sm:$0xf0]  ;;  %v7696_v39 = vld [vmem:[#allocation11 + $0xb8] sm:$0xf] }
 0x667   : > { %3008 = vmatpush.bf16.msrb.mxu2 %v7705_v8  ;;  %3021 = vmatpush.bf16.msra.mxu3 %v7709_v9  ;;  %v7797_v8 = vor.u32 %v9516_v57, %v7794_v58  ;;  %v7760_v9 = vld [vmem:[#allocation11 + $0x1b8] sm:$0xf]  ;;  %v9511_v34 = vld [vmem:[#allocation11 + $0x1ec] sm:$0xf0]  ;;  %v7698_v42 = vld [vmem:[#allocation11 + $0xf8] sm:$0xf0] }
 0x668   : > { %v7720_v33 = vld [vmem:[#allocation11 + $0x130] sm:$0xf]  ;;  %v9499_v46 = vld [vmem:[#allocation11 + $0x134] sm:$0xf]  ;;  %v7664_v49 = vld [vmem:[#allocation11 + $0x38] sm:$0xf] }
 0x669   : > { %3036 = vmatpush.bf16.msrb.mxu0 %v7649_v17  ;;  %3049 = vmatpush.bf16.msra.mxu1 %v7653_v18  ;;  %v9519_v17 = vld [vmem:[#allocation11 + $0x26c] sm:$0xf0]  ;;  %v9515_v18 = vld [vmem:[#allocation11 + $0x234] sm:$0xf]  ;;  %v9488_v51 = vld [vmem:[#allocation11 + $0x74] sm:$0xf0] }
 0x66a   : > { %v7785_v31 = vor.u32 %v9519_v17, %v7784_v15  ;;  %v9503_v45 = vld [vmem:[#allocation11 + $0x16c] sm:$0xf0]  ;;  %v9484_v52 = vld [vmem:[#allocation11 + $0x3c] sm:$0xf]  ;;  %v9491_v58 = vld [vmem:[#allocation11 + $0xb4] sm:$0xf] }
 0x66b   : > { %3009 = vmatpush.bf16.msrb.mxu2 %v7673_v26  ;;  %3022 = vmatpush.bf16.msra.mxu3 %v7677_v29  ;;  %v9500_v26 = vld [vmem:[#allocation11 + $0x13c] sm:$0xf]  ;;  %v7688_v56 = vld [vmem:[#allocation11 + $0xb0] sm:$0xf]  ;;  %v9566_v17 = vld [vmem:[#allocation14 + $0x2a8] sm:$0xff] }
 0x66c   : > { %3037 = vmatmul.bf16.vlgmr.msrb.gmra.mxu0 %v10838_v28  ;;  %3050 = vmatmul.bf16.vlgmr.msra.gmra.mxu1 %v10838_v28  ;;  %v7730_v29 = vld [vmem:[#allocation11 + $0x178] sm:$0xf0]  ;;  %v9495_v57 = vld [vmem:[#allocation11 + $0xec] sm:$0xf0]  ;;  %v9573_v24 = vld [vmem:[#allocation14 + $0x2e0] sm:$0xff] }
 0x66d   : > { %3081 = vmatpush.bf16.msra.mxu0 %v7889_v20  ;;  %3094 = vmatpush.bf16.msrb.mxu1 %v7893_v22  ;;  %v7786_v20 = vld [vmem:[#allocation11 + $0x270] sm:$0xf0]  ;;  %v7761_v22 = vor.u32 %v9512_v10, %v7760_v9  ;;  %v7733_v38 = vor.u32 %v9500_v26, %v7730_v29  ;;  %v7689_v63 = vor.u32 %v9495_v57, %v7688_v56  ;;  %v7656_v6 = vld [vmem:[#allocation11 + $0x30] sm:$0xf]  ;;  %v9568_v12 = vld [vmem:[#allocation14 + $0x2b8] sm:$0xff] }
 0x66e   : > { %v7789_v41 = vor.u32 %v9515_v18, %v7786_v20  ;;  %v7658_v9 = vld [vmem:[#allocation11 + $0x70] sm:$0xf0]  ;;  %v9574_v18 = vld [vmem:[#allocation14 + $0x2e8] sm:$0xff]  ;;  %v9552_v20 = vld [vmem:[#allocation14 + $0x238] sm:$0xff] }
 0x66f   : > { %3010 = vmatpush.bf16.msrb.mxu2 %v7641_v43  ;;  %3023 = vmatpush.bf16.msra.mxu3 %v7645_v44  ;;  %v7753_v43 = vor.u32 %v9511_v34, %v7752_v32  ;;  %v7757_v44 = vor.u32 %v9507_v30, %v7754_v35  ;;  %v9575_v15 = vld [vmem:[#allocation14 + $0x2f0] sm:$0xff]  ;;  %v9564_v26 = vld [vmem:[#allocation14 + $0x298] sm:$0xff]  ;;  %v9549_v30 = vld [vmem:[#allocation14 + $0x220] sm:$0xff] }
 0x670   : > { %v9551_v25 = vld [vmem:[#allocation14 + $0x230] sm:$0xff]  ;;  %v9572_v29 = vld [vmem:[#allocation14 + $0x2d8] sm:$0xff]  ;;  %v9557_v35 = vld [vmem:[#allocation14 + $0x260] sm:$0xff] }
 0x671   : > { %3082 = vmatpush.bf16.msra.mxu0 %v7857_v19  ;;  %3095 = vmatpush.bf16.msrb.mxu1 %v7861_v40  ;;  %v9496_v19 = vld [vmem:[#allocation11 + $0xf4] sm:$0xf0]  ;;  %v9492_v40 = vld [vmem:[#allocation11 + $0xbc] sm:$0xf]  ;;  %v9563_v32 = vld [vmem:[#allocation14 + $0x290] sm:$0xff] }
 0x672   : > { %3011 = vmatmul.bf16.vlgmr.msrb.gmra.mxu2 %v10838_v28  ;;  %3024 = vmatmul.bf16.vlgmr.msra.gmra.mxu3 %v10838_v28  ;;  %v7701_v36 = vor.u32 %v9492_v40, %v7698_v42  ;;  %v9571_v34 = vld [vmem:[#allocation14 + $0x2d0] sm:$0xff]  ;;  %v9548_v40 = vld [vmem:[#allocation14 + $0x218] sm:$0xff]  ;;  %v9598_v56 = vld [vmem:[#allocation14 + $0x3a8] sm:$0xff] }
 0x673   : > { %3055 = vmatpush.bf16.msra.mxu2 %v7881_v47  ;;  %3068 = vmatpush.bf16.msrb.mxu3 %v7885_v48  ;;  %v7722_v47 = vld [vmem:[#allocation11 + $0x170] sm:$0xf0]  ;;  %v7697_v48 = vor.u32 %v9496_v19, %v7696_v39  ;;  %v9570_v19 = vld [vmem:[#allocation14 + $0x2c8] sm:$0xff]  ;;  %v9556_v42 = vld [vmem:[#allocation14 + $0x258] sm:$0xff] }
 0x674   : > { %v7725_v55 = vor.u32 %v9499_v46, %v7722_v47  ;;  %v9547_v46 = vld [vmem:[#allocation14 + $0x210] sm:$0xff]  ;;  %v9606_v57 = vld [vmem:[#allocation14 + $0x3e8] sm:$0xff] }
 0x675   : > { %3083 = vmatpush.bf16.msra.mxu0 %v7825_v53  ;;  %3096 = vmatpush.bf16.msrb.mxu1 %v7829_v54  ;;  %v7666_v53 = vld [vmem:[#allocation11 + $0x78] sm:$0xf0]  ;;  %v7721_v54 = vor.u32 %v9503_v45, %v7720_v33  ;;  %v9555_v47 = vld [vmem:[#allocation14 + $0x250] sm:$0xff] }
 0x676   : > { %v7669_v61 = vor.u32 %v9484_v52, %v7666_v53  ;;  %v9600_v33 = vld [vmem:[#allocation14 + $0x3b8] sm:$0xff]  ;;  %v9546_v52 = vld [vmem:[#allocation14 + $0x208] sm:$0xff] }
 0x677   : > { %3056 = vmatpush.bf16.msra.mxu2 %v7849_v59  ;;  %3069 = vmatpush.bf16.msrb.mxu3 %v7853_v60  ;;  %v7690_v59 = vld [vmem:[#allocation11 + $0xf0] sm:$0xf0]  ;;  %v7665_v60 = vor.u32 %v9488_v51, %v7664_v49  ;;  %v9608_v45 = vld [vmem:[#allocation14 + $0x3f8] sm:$0xff]  ;;  %v9554_v53 = vld [vmem:[#allocation14 + $0x248] sm:$0xff] }
 0x678   : > { %v7693_v3 = vor.u32 %v9491_v58, %v7690_v59  ;;  %v9599_v49 = vld [vmem:[#allocation14 + $0x3b0] sm:$0xff] }
 0x679   : > { %3084 = vmatpush.bf16.msra.mxu0 %v7793_v7  ;;  %3097 = vmatpush.bf16.msrb.mxu1 %v7797_v8  ;;  %v9487_v7 = vld [vmem:[#allocation11 + $0x6c] sm:$0xf0]  ;;  %v9483_v8 = vld [vmem:[#allocation11 + $0x34] sm:$0xf] }
 0x67a   : > { %v7657_v10 = vor.u32 %v9487_v7, %v7656_v6  ;;  %v7661_v11 = vor.u32 %v9483_v8, %v7658_v9  ;;  %v9607_v51 = vld [vmem:[#allocation14 + $0x3f0] sm:$0xff]  ;;  %v9584_v6 = vld [vmem:[#allocation14 + $0x338] sm:$0xff]  ;;  %v9597_v8 = vld [vmem:[#allocation14 + $0x3a0] sm:$0xff] }
 0x67b   : > { %3057 = vmatpush.bf16.msra.mxu2 %v7817_v13  ;;  %3070 = vmatpush.bf16.msrb.mxu3 %v7821_v14  ;;  %v9576_v13 = vld [vmem:[#allocation14 + $0x2f8] sm:$0xff]  ;;  %v9567_v14 = vld [vmem:[#allocation14 + $0x2b0] sm:$0xff] }
 0x67c   : > { %v9592_v7 = vld [vmem:[#allocation14 + $0x378] sm:$0xff] }
 0x67d   : > { %3085 = vmatpush.bf16.msra.mxu0 %v7761_v22  ;;  %3098 = vmatpush.bf16.msrb.mxu1 %v7765_v23  ;;  %v9560_v22 = vld [vmem:[#allocation14 + $0x278] sm:$0xff]  ;;  %v9565_v23 = vld [vmem:[#allocation14 + $0x2a0] sm:$0xff] }
 0x67f   : > { %3058 = vmatpush.bf16.msra.mxu2 %v7785_v31  ;;  %3071 = vmatpush.bf16.msrb.mxu3 %v7789_v41  ;;  %v9550_v31 = vld [vmem:[#allocation14 + $0x228] sm:$0xff] }
 0x680   : > { %v9558_v41 = vld [vmem:[#allocation14 + $0x268] sm:$0xff] }
 0x681   : > { %3086 = vmatpush.bf16.msra.mxu0 %v7729_v37  ;;  %3099 = vmatpush.bf16.msrb.mxu1 %v7733_v38  ;;  %v9562_v37 = vld [vmem:[#allocation14 + $0x288] sm:$0xff] }
 0x683   : > { %3059 = vmatpush.bf16.msra.mxu2 %v7753_v43  ;;  %3072 = vmatpush.bf16.msrb.mxu3 %v7757_v44  ;;  %v9561_v43 = vld [vmem:[#allocation14 + $0x280] sm:$0xff] }
 0x684   : > { %v9569_v44 = vld [vmem:[#allocation14 + $0x2c0] sm:$0xff] }
 0x685   : > { %3087 = vmatpush.bf16.msra.mxu0 %v7697_v48  ;;  %3100 = vmatpush.bf16.msrb.mxu1 %v7701_v36 }
 0x687   : > { %3060 = vmatpush.bf16.msra.mxu2 %v7721_v54  ;;  %3073 = vmatpush.bf16.msrb.mxu3 %v7725_v55 }
 0x689   : > { %3088 = vmatpush.bf16.msra.mxu0 %v7665_v60  ;;  %3101 = vmatpush.bf16.msrb.mxu1 %v7669_v61  ;;  %v9545_v60 = vld [vmem:[#allocation14 + $0x200] sm:$0xff] }
 0x68a   : > { %v9553_v61 = vld [vmem:[#allocation14 + $0x240] sm:$0xff] }
 0x68b   : > { %3061 = vmatpush.bf16.msra.mxu2 %v7689_v63  ;;  %3074 = vmatpush.bf16.msrb.mxu3 %v7693_v3 }
 0x68c   : > { %3089 = vmatmul.bf16.vlgmr.msra.gmra.mxu0 %v10838_v28  ;;  %3102 = vmatmul.bf16.vlgmr.msrb.gmra.mxu1 %v10838_v28 }
 0x68d   : > { %3661 = vmatpush.bf16.msrb.mxu0 %v9568_v12  ;;  %3674 = vmatpush.bf16.msra.mxu1 %v9576_v13  ;;  %v9583_v13 = vld [vmem:[#allocation14 + $0x330] sm:$0xff] }
 0x68f   : > { %3062 = vmatpush.bf16.msra.mxu2 %v7657_v10  ;;  %3075 = vmatpush.bf16.msrb.mxu3 %v7661_v11  ;;  %v9605_v10 = vld [vmem:[#allocation14 + $0x3e0] sm:$0xff] }
 0x691   : > { %3662 = vmatpush.bf16.msrb.mxu0 %v9567_v14  ;;  %3675 = vmatpush.bf16.msra.mxu1 %v9575_v15  ;;  %v9591_v14 = vld [vmem:[#allocation14 + $0x370] sm:$0xff]  ;;  %v9596_v15 = vld [vmem:[#allocation14 + $0x398] sm:$0xff] }
 0x692   : > { %3063 = vmatmul.bf16.vlgmr.msra.gmra.mxu2 %v10838_v28  ;;  %3076 = vmatmul.bf16.vlgmr.msrb.gmra.mxu3 %v10838_v28  ;;  %v9559_v28 = vld [vmem:[#allocation14 + $0x270] sm:$0xff] }
 0x693   : > { %3635 = vmatpush.bf16.msrb.mxu2 %v9552_v20  ;;  %3648 = vmatpush.bf16.msra.mxu3 %v9560_v22  ;;  %v9590_v20 = vld [vmem:[#allocation14 + $0x368] sm:$0xff]  ;;  %v9595_v22 = vld [vmem:[#allocation14 + $0x390] sm:$0xff] }
 0x695   : > { %3663 = vmatpush.bf16.msrb.mxu0 %v9566_v17  ;;  %3676 = vmatpush.bf16.msra.mxu1 %v9574_v18  ;;  %v9604_v17 = vld [vmem:[#allocation14 + $0x3d8] sm:$0xff]  ;;  %v9582_v18 = vld [vmem:[#allocation14 + $0x328] sm:$0xff] }
 0x697   : > { %3636 = vmatpush.bf16.msrb.mxu2 %v9551_v25  ;;  %3649 = vmatpush.bf16.msra.mxu3 %v9559_v28  ;;  %v10866_v28 = vld [vmem:[#allocation13 + $0x8] sm:$0xff] }
 0x699   : > { %3664 = vmatpush.bf16.msrb.mxu0 %v9565_v23  ;;  %3677 = vmatpush.bf16.msra.mxu1 %v9573_v24  ;;  %v9603_v23 = vld [vmem:[#allocation14 + $0x3d0] sm:$0xff] }
 0x69b   : > { %3637 = vmatpush.bf16.msrb.mxu2 %v9550_v31  ;;  %3650 = vmatpush.bf16.msra.mxu3 %v9558_v41  ;;  %v9581_v31 = vld [vmem:[#allocation14 + $0x320] sm:$0xff] }
 0x69c   : > { %v9589_v41 = vld [vmem:[#allocation14 + $0x360] sm:$0xff] }
 0x69d   : > { %3665 = vmatpush.bf16.msrb.mxu0 %v9564_v26  ;;  %3678 = vmatpush.bf16.msra.mxu1 %v9572_v29 }
 0x69f   : > { %3638 = vmatpush.bf16.msrb.mxu2 %v9549_v30  ;;  %3651 = vmatpush.bf16.msra.mxu3 %v9557_v35  ;;  %v2669_v30 = vperm.slane %v10866_v28, 2  ;;  %v2670_v35 = vperm.slane %v10866_v28, 3 }
 0x6a1   : > { %3666 = vmatpush.bf16.msrb.mxu0 %v9563_v32  ;;  %3679 = vmatpush.bf16.msra.mxu1 %v9571_v34  ;;  %v9594_v32 = vld [vmem:[#allocation14 + $0x388] sm:$0xff] }
 0x6a3   : > { %3639 = vmatpush.bf16.msrb.mxu2 %v9548_v40  ;;  %3652 = vmatpush.bf16.msra.mxu3 %v9556_v42  ;;  %v9580_v40 = vld [vmem:[#allocation14 + $0x318] sm:$0xff] }
 0x6a4   : > { %v9588_v42 = vld [vmem:[#allocation14 + $0x358] sm:$0xff] }
 0x6a5   : > { %3667 = vmatpush.bf16.msrb.mxu0 %v9562_v37  ;;  %3680 = vmatpush.bf16.msra.mxu1 %v9570_v19  ;;  %v9602_v37 = vld [vmem:[#allocation14 + $0x3c8] sm:$0xff] }
 0x6a7   : > { %3640 = vmatpush.bf16.msrb.mxu2 %v9547_v46  ;;  %3653 = vmatpush.bf16.msra.mxu3 %v9555_v47  ;;  %v9601_v46 = vld [vmem:[#allocation14 + $0x3c0] sm:$0xff] }
 0x6a9   : > { %3668 = vmatpush.bf16.msrb.mxu0 %v9561_v43  ;;  %3681 = vmatpush.bf16.msra.mxu1 %v9569_v44  ;;  %v9593_v43 = vld [vmem:[#allocation14 + $0x380] sm:$0xff] }
 0x6ab   : > { %3641 = vmatpush.bf16.msrb.mxu2 %v9546_v52  ;;  %3654 = vmatpush.bf16.msra.mxu3 %v9554_v53  ;;  %v9579_v52 = vld [vmem:[#allocation14 + $0x310] sm:$0xff] }
 0x6ac   : > { %v9587_v53 = vld [vmem:[#allocation14 + $0x350] sm:$0xff] }
 0x6ad   : > { %3713 = vmatpush.bf16.msra.mxu0 %v9600_v33  ;;  %3726 = vmatpush.bf16.msrb.mxu1 %v9608_v45 }
 0x6af   : > { %3642 = vmatpush.bf16.msrb.mxu2 %v9545_v60  ;;  %3655 = vmatpush.bf16.msra.mxu3 %v9553_v61  ;;  %v2667_v60 = vperm.slane %v10866_v28, 0  ;;  %v2668_v61 = vperm.slane %v10866_v28, 1 }
 0x6b1   : > { %3714 = vmatpush.bf16.msra.mxu0 %v9599_v49  ;;  %3727 = vmatpush.bf16.msrb.mxu1 %v9607_v51 }
 0x6b3   : > { %3687 = vmatpush.bf16.msra.mxu2 %v9584_v6  ;;  %3700 = vmatpush.bf16.msrb.mxu3 %v9592_v7 }
 0x6b5   : > { %3715 = vmatpush.bf16.msra.mxu0 %v9598_v56  ;;  %3728 = vmatpush.bf16.msrb.mxu1 %v9606_v57 }
 0x6b7   : > { %3688 = vmatpush.bf16.msra.mxu2 %v9583_v13  ;;  %3701 = vmatpush.bf16.msrb.mxu3 %v9591_v14 }
 0x6b9   : > { %3716 = vmatpush.bf16.msra.mxu0 %v9597_v8  ;;  %3729 = vmatpush.bf16.msrb.mxu1 %v9605_v10 }
 0x6bb   : > { %3689 = vmatpush.bf16.msra.mxu2 %v9582_v18  ;;  %3702 = vmatpush.bf16.msrb.mxu3 %v9590_v20  ;;  %v2674_v18 = vperm.slane %v10866_v28, 7 }
 0x6bd   : > { %3717 = vmatpush.bf16.msra.mxu0 %v9596_v15  ;;  %3730 = vmatpush.bf16.msrb.mxu1 %v9604_v17  ;;  %v2673_v17 = vperm.slane %v10866_v28, 6 }
 0x6bf   : > { %3690 = vmatpush.bf16.msra.mxu2 %v9581_v31  ;;  %3703 = vmatpush.bf16.msrb.mxu3 %v9589_v41 }
 0x6c1   : > { %3718 = vmatpush.bf16.msra.mxu0 %v9595_v22  ;;  %3731 = vmatpush.bf16.msrb.mxu1 %v9603_v23 }
 0x6c3   : > { %3691 = vmatpush.bf16.msra.mxu2 %v9580_v40  ;;  %3704 = vmatpush.bf16.msrb.mxu3 %v9588_v42 }
 0x6c5   : > { %3719 = vmatpush.bf16.msra.mxu0 %v9594_v32  ;;  %3732 = vmatpush.bf16.msrb.mxu1 %v9602_v37 }
 0x6c7   : > { %3692 = vmatpush.bf16.msra.mxu2 %v9579_v52  ;;  %3705 = vmatpush.bf16.msrb.mxu3 %v9587_v53 }
 0x6c9   : > { %v2528_v38 = vpop.f32.mrf.mxu0  ;;  %v2541_v39 = vpop.f32.mrf.mxu1  ;;  %3720 = vmatpush.bf16.msra.mxu0 %v9593_v43  ;;  %3733 = vmatpush.bf16.msrb.mxu1 %v9601_v46 }
 0x6d1   : > { %v2530_v48 = vpop.f32.mrf.mxu0  ;;  %v2543_v36 = vpop.f32.mrf.mxu1 }
 0x6d5   : > { %v2502_v54 = vpop.f32.mrf.mxu2  ;;  %v2515_v55 = vpop.f32.mrf.mxu3 }
 0x6d6   : > { %v2516_v58 = vadd.f32 %v2515_v55, %v2502_v54 }
 0x6d8   : > { %v2529_v59 = vadd.f32 %v2528_v38, %v2516_v58  ;;  %v9578_v58 = vld [vmem:[#allocation14 + $0x308] sm:$0xff] }
 0x6d9   : > { %v2580_v63 = vpop.f32.mrf.mxu0  ;;  %v2593_v3 = vpop.f32.mrf.mxu1  ;;  %3693 = vmatpush.bf16.msra.mxu2 %v9578_v58 }
 0x6da   : > { %v2542_v9 = vadd.f32 %v2541_v39, %v2529_v59  ;;  %v9586_v59 = vld [vmem:[#allocation14 + $0x348] sm:$0xff] }
 0x6db   : > { %3706 = vmatpush.bf16.msrb.mxu3 %v9586_v59 }
 0x6dd   : > { %v2504_v11 = vpop.f32.mrf.mxu2  ;;  %v2517_v12 = vpop.f32.mrf.mxu3 }
 0x6e1   : > { %v2582_v24 = vpop.f32.mrf.mxu0  ;;  %v2595_v25 = vpop.f32.mrf.mxu1 }
 0x6e5   : > { %v2554_v26 = vpop.f32.mrf.mxu2  ;;  %v2567_v29 = vpop.f32.mrf.mxu3 }
 0x6e6   : > { %v2555_v34 = vadd.f32 %v2554_v26, %v2542_v9 }
 0x6e8   : > { %v2568_v38 = vadd.f32 %v2567_v29, %v2555_v34  ;;  %v2671_v34 = vperm.slane %v10866_v28, 4 }
 0x6e9   : > { %v3038_v39 = vpop.f32.mrf.mxu0  ;;  %v3051_v19 = vpop.f32.mrf.mxu1 }
 0x6ea   : > { %v2581_v44 = vadd.f32 %v2580_v63, %v2568_v38  ;;  %v3039_v33 = vadd.f32 %v3038_v39, %v2669_v30  ;;  %v3052_v45 = vadd.f32 %v3051_v19, %v2670_v35  ;;  %v9577_v63 = vld [vmem:[#allocation14 + $0x300] sm:$0xff]  ;;  %v2672_v30 = vperm.slane %v10866_v28, 5 }
 0x6eb   : > { %3694 = vmatpush.bf16.msra.mxu2 %v9577_v63 }
 0x6ec   : > { %v10870_v47 = vadd.f32 %v2593_v3, %v2581_v44  ;;  %v3109_v48 = vmax.f32 %v3039_v33, 0.0  ;;  %v3110_v36 = vmax.f32 %v3052_v45, 0.0  ;;  %v9585_v3 = vld [vmem:[#allocation14 + $0x340] sm:$0xff] }
 0x6ed   : > { %v2556_v49 = vpop.f32.mrf.mxu2  ;;  %v2569_v51 = vpop.f32.mrf.mxu3  ;;  %3707 = vmatpush.bf16.msrb.mxu3 %v9585_v3 }
 0x6ee   : > { %v3117_v54 = vpack.c.bf16 %v3109_v48, %v3109_v48  ;;  %v3118_v55 = vpack.c.bf16 %v3110_v36, %v3110_v36 }
 0x6f0   : > { %3669 = vmatmul.bf16.vlgmr.msrb.gmra.mxu0 %v3117_v54  ;;  %3682 = vmatmul.bf16.vlgmr.msra.gmra.mxu1 %v3118_v55 }
 0x6f1   : > { %v3040_v56 = vpop.f32.mrf.mxu0  ;;  %v3053_v57 = vpop.f32.mrf.mxu1 }
 0x6f5   : > { %v3012_v6 = vpop.f32.mrf.mxu2  ;;  %v3025_v7 = vpop.f32.mrf.mxu3 }
 0x6f6   : > { %v3013_v8 = vadd.f32 %v3012_v6, %v2667_v60  ;;  %v3026_v9 = vadd.f32 %v3025_v7, %v2668_v61  ;;  %v10027_v6 = vld [vmem:[%s11121_s8] ss:$0 sm:$0xff] }
 0x6f8   : > { %v3107_v10 = vmax.f32 %v3013_v8, 0.0  ;;  %v3108_v11 = vmax.f32 %v3026_v9, 0.0  ;;  %v2600_v9 = vadd.f32 %v10027_v6, %v10870_v47 }
 0x6fa   : > { %v3115_v12 = vpack.c.bf16 %v3107_v10, %v3107_v10  ;;  %v3116_v13 = vpack.c.bf16 %v3108_v11, %v3108_v11 }
 0x6fc   : > { %3643 = vmatmul.bf16.vlgmr.msrb.gmra.mxu2 %v3115_v12  ;;  %3656 = vmatmul.bf16.vlgmr.msra.gmra.mxu3 %v3116_v13 }
 0x6fd   : > { %v3014_v14 = vpop.f32.mrf.mxu2  ;;  %v3027_v15 = vpop.f32.mrf.mxu3 }
 0x6fe   : > { %v8237_v14 = vld [vmem:[#allocation8 + $0x168] sm:$0xf]  ;;  %v9631_v15 = vld [vmem:[#allocation8 + $0x170] sm:$0xf0] }
 0x709   : > { %v3090_v20 = vpop.f32.mrf.mxu0  ;;  %v3103_v22 = vpop.f32.mrf.mxu1 }
 0x70a   : > { %v3091_v23 = vadd.f32 %v3090_v20, %v2673_v17  ;;  %v3104_v24 = vadd.f32 %v3103_v22, %v2674_v18  ;;  %v9630_v17 = vld [vmem:[#allocation8 + $0x16c] sm:$0xf]  ;;  %v8238_v18 = vor.u32 %v9631_v15, %v8237_v14  ;;  %v8239_v20 = vld [vmem:[#allocation8 + $0x174] sm:$0xf0]  ;;  %v8245_v22 = vld [vmem:[#allocation8 + $0x170] sm:$0xf] }
 0x70b   : > { %v9617_v14 = vld [vmem:[#allocation8 + $0x100] sm:$0xf0] }
 0x70c   : > { %v3113_v25 = vmax.f32 %v3091_v23, 0.0  ;;  %v3114_v26 = vmax.f32 %v3104_v24, 0.0  ;;  %v9632_v23 = vld [vmem:[#allocation8 + $0x178] sm:$0xf0]  ;;  %v8242_v24 = vor.u32 %v9630_v17, %v8239_v20  ;;  %3942 = vmatpush.bf16.msrb.mxu2 %v8238_v18  ;;  %v8165_v18 = vld [vmem:[#allocation8 + $0xd8] sm:$0xf] }
 0x70d   : > { %v9613_v20 = vld [vmem:[#allocation8 + $0xe0] sm:$0xf0] }
 0x70e   : > { %v3121_v29 = vpack.c.bf16 %v3113_v25, %v3113_v25  ;;  %v3122_v31 = vpack.c.bf16 %v3114_v26, %v3114_v26  ;;  %v8246_v25 = vor.u32 %v9632_v23, %v8245_v22  ;;  %3955 = vmatpush.bf16.msra.mxu3 %v8242_v24  ;;  %v9612_v22 = vld [vmem:[#allocation8 + $0xdc] sm:$0xf]  ;;  %v8166_v23 = vor.u32 %v9613_v20, %v8165_v18  ;;  %v8167_v24 = vld [vmem:[#allocation8 + $0xe4] sm:$0xf0] }
 0x710   : > { %3721 = vmatmul.bf16.vlgmr.msra.gmra.mxu0 %v3121_v29  ;;  %3734 = vmatmul.bf16.vlgmr.msrb.gmra.mxu1 %v3122_v31  ;;  %v8225_v31 = vld [vmem:[#allocation8 + $0x150] sm:$0xf] }
 0x711   : > { %v3092_v41 = vpop.f32.mrf.mxu0  ;;  %v3105_v32 = vpop.f32.mrf.mxu1  ;;  %3968 = vmatpush.bf16.msrb.mxu0 %v8246_v25  ;;  %v8173_v25 = vld [vmem:[#allocation8 + $0xe0] sm:$0xf] }
 0x712   : > { %v9628_v41 = vld [vmem:[#allocation8 + $0x158] sm:$0xf0]  ;;  %v9627_v32 = vld [vmem:[#allocation8 + $0x154] sm:$0xf] }
 0x715   : > { %v3064_v35 = vpop.f32.mrf.mxu2  ;;  %v3077_v37 = vpop.f32.mrf.mxu3 }
 0x716   : > { %v3065_v38 = vadd.f32 %v3064_v35, %v2671_v34  ;;  %v3078_v39 = vadd.f32 %v3077_v37, %v2672_v30  ;;  %v8226_v34 = vor.u32 %v9628_v41, %v8225_v31  ;;  %v8227_v30 = vld [vmem:[#allocation8 + $0x15c] sm:$0xf0]  ;;  %v8233_v35 = vld [vmem:[#allocation8 + $0x158] sm:$0xf]  ;;  %v9629_v37 = vld [vmem:[#allocation8 + $0x160] sm:$0xf0] }
 0x717   : > { %v8153_v31 = vld [vmem:[#allocation8 + $0xc0] sm:$0xf]  ;;  %v9610_v41 = vld [vmem:[#allocation8 + $0xc8] sm:$0xf0] }
 0x718   : > { %v3111_v19 = vmax.f32 %v3065_v38, 0.0  ;;  %v3112_v40 = vmax.f32 %v3078_v39, 0.0  ;;  %v8230_v38 = vor.u32 %v9627_v32, %v8227_v30  ;;  %v8234_v39 = vor.u32 %v9629_v37, %v8233_v35  ;;  %3943 = vmatpush.bf16.msrb.mxu2 %v8226_v34  ;;  %v9609_v32 = vld [vmem:[#allocation8 + $0xc4] sm:$0xf]  ;;  %v8155_v30 = vld [vmem:[#allocation8 + $0xcc] sm:$0xf0] }
 0x719   : > { %v8154_v34 = vor.u32 %v9610_v41, %v8153_v31  ;;  %v8161_v35 = vld [vmem:[#allocation8 + $0xc8] sm:$0xf]  ;;  %v9611_v37 = vld [vmem:[#allocation8 + $0xd0] sm:$0xf0] }
 0x71a   : > { %v3119_v42 = vpack.c.bf16 %v3111_v19, %v3111_v19  ;;  %v3120_v43 = vpack.c.bf16 %v3112_v40, %v3112_v40  ;;  %3956 = vmatpush.bf16.msra.mxu3 %v8230_v38  ;;  %3969 = vmatpush.bf16.msrb.mxu0 %v8234_v39  ;;  %v8213_v19 = vld [vmem:[#allocation8 + $0x138] sm:$0xf]  ;;  %v9625_v40 = vld [vmem:[#allocation8 + $0x140] sm:$0xf0]  ;;  %v8158_v38 = vor.u32 %v9609_v32, %v8155_v30 }
 0x71b   : > { %v8162_v39 = vor.u32 %v9611_v37, %v8161_v35 }
 0x71c   : > { %3695 = vmatmul.bf16.vlgmr.msra.gmra.mxu2 %v3119_v42  ;;  %3708 = vmatmul.bf16.vlgmr.msrb.gmra.mxu3 %v3120_v43  ;;  %v9624_v42 = vld [vmem:[#allocation8 + $0x13c] sm:$0xf]  ;;  %v8214_v43 = vor.u32 %v9625_v40, %v8213_v19 }
 0x71d   : > { %v3066_v44 = vpop.f32.mrf.mxu2  ;;  %v3079_v33 = vpop.f32.mrf.mxu3 }
 0x71e   : > { %v8215_v44 = vld [vmem:[#allocation8 + $0x144] sm:$0xf0]  ;;  %v8221_v33 = vld [vmem:[#allocation8 + $0x140] sm:$0xf]  ;;  %3944 = vmatpush.bf16.msrb.mxu2 %v8214_v43 }
 0x76d   : > { %v3670_v45 = vpop.f32.mrf.mxu0  ;;  %v3683_v46 = vpop.f32.mrf.mxu1 }
 0x775   : > { %v3672_v48 = vpop.f32.mrf.mxu0  ;;  %v3685_v36 = vpop.f32.mrf.mxu1 }
 0x776   : > { %v8201_v36 = vld [vmem:[#allocation8 + $0x120] sm:$0xf] }
 0x77f   : > { %v3644_v49 = vpop.f32.mrf.mxu2  ;;  %v3657_v51 = vpop.f32.mrf.mxu3 }
 0x780   : > { %v3658_v57 = vadd.f32 %v3657_v51, %v3644_v49  ;;  %v9622_v49 = vld [vmem:[#allocation8 + $0x128] sm:$0xf0]  ;;  %v9621_v51 = vld [vmem:[#allocation8 + $0x124] sm:$0xf] }
 0x782   : > { %v3671_v58 = vadd.f32 %v3670_v45, %v3658_v57  ;;  %v9626_v45 = vld [vmem:[#allocation8 + $0x148] sm:$0xf0]  ;;  %v8189_v57 = vld [vmem:[#allocation8 + $0x108] sm:$0xf] }
 0x783   : > { %v8222_v48 = vor.u32 %v9626_v45, %v8221_v33 }
 0x784   : > { %v3684_v59 = vadd.f32 %v3683_v46, %v3671_v58  ;;  %v8218_v46 = vor.u32 %v9624_v42, %v8215_v44  ;;  %v9619_v58 = vld [vmem:[#allocation8 + $0x110] sm:$0xf0] }
 0x785   : > { %3970 = vmatpush.bf16.msrb.mxu0 %v8222_v48 }
 0x786   : > { %3957 = vmatpush.bf16.msra.mxu3 %v8218_v46 }
 0x787   : > { %v3646_v52 = vpop.f32.mrf.mxu2  ;;  %v3659_v28 = vpop.f32.mrf.mxu3 }
 0x788   : > { %v8202_v52 = vor.u32 %v9622_v49, %v8201_v36  ;;  %v8203_v28 = vld [vmem:[#allocation8 + $0x12c] sm:$0xf0]  ;;  %v10028_v36 = vld [vmem:[%s11122_s9] ss:$0 sm:$0xff] }
 0x78a   : > { %3945 = vmatpush.bf16.msrb.mxu2 %v8202_v52 }
 0x78d   : > { %v3722_v53 = vpop.f32.mrf.mxu0  ;;  %v3735_v54 = vpop.f32.mrf.mxu1 }
 0x795   : > { %v3724_v55 = vpop.f32.mrf.mxu0  ;;  %v3737_v56 = vpop.f32.mrf.mxu1 }
 0x796   : > { %v8206_v55 = vor.u32 %v9621_v51, %v8203_v28  ;;  %v10029_v51 = vld [vmem:[%s11123_s13] ss:$0 sm:$0xff] }
 0x798   : > { %3958 = vmatpush.bf16.msra.mxu3 %v8206_v55  ;;  %v8150_v55 = vld [vmem:[%s11074_s5 + $0x3] sm:$0x7] }
 0x79f   : > { %v3696_v60 = vpop.f32.mrf.mxu2  ;;  %v3709_v61 = vpop.f32.mrf.mxu3 }
 0x7a0   : > { %v3697_v63 = vadd.f32 %v3696_v60, %v3684_v59  ;;  %v9618_v59 = vld [vmem:[#allocation8 + $0x10c] sm:$0xf]  ;;  %v8190_v60 = vor.u32 %v9619_v58, %v8189_v57  ;;  %v3809_v58 = vperm.slane %v8150_v55, 1 }
 0x7a2   : > { %v3710_v3 = vadd.f32 %v3709_v61, %v3697_v63  ;;  %v8191_v61 = vld [vmem:[#allocation8 + $0x114] sm:$0xf0]  ;;  %v8197_v63 = vld [vmem:[#allocation8 + $0x110] sm:$0xf]  ;;  %3946 = vmatpush.bf16.msrb.mxu2 %v8190_v60 }
 0x7a3   : > { %v8194_v6 = vor.u32 %v9618_v59, %v8191_v61 }
 0x7a4   : > { %v3723_v7 = vadd.f32 %v3722_v53, %v3710_v3  ;;  %v8209_v53 = vld [vmem:[#allocation8 + $0x128] sm:$0xf]  ;;  %v9620_v3 = vld [vmem:[#allocation8 + $0x118] sm:$0xf0] }
 0x7a5   : > { %3959 = vmatpush.bf16.msra.mxu3 %v8194_v6 }
 0x7a6   : > { %v3736_v8 = vadd.f32 %v3735_v54, %v3723_v7  ;;  %v9623_v54 = vld [vmem:[#allocation8 + $0x130] sm:$0xf0]  ;;  %v8198_v7 = vor.u32 %v9620_v3, %v8197_v63 }
 0x7a7   : > { %v3698_v10 = vpop.f32.mrf.mxu2  ;;  %v3711_v11 = vpop.f32.mrf.mxu3  ;;  %v8210_v56 = vor.u32 %v9623_v54, %v8209_v53 }
 0x7a8   : > { %v3739_v12 = vadd.f32 %v3736_v8, %v2600_v9  ;;  %v8177_v8 = vld [vmem:[#allocation8 + $0xf0] sm:$0xf]  ;;  %v9616_v9 = vld [vmem:[#allocation8 + $0xf8] sm:$0xf0]  ;;  %v9615_v10 = vld [vmem:[#allocation8 + $0xf4] sm:$0xf] }
 0x7a9   : > { %3971 = vmatpush.bf16.msrb.mxu0 %v8210_v56  ;;  %v8178_v11 = vor.u32 %v9616_v9, %v8177_v8  ;;  %v3810_v56 = vperm.slane %v8150_v55, 2  ;;  %v3808_v9 = vperm.slane %v8150_v55, 0 }
 0x7aa   : > { %v3740_v13 = vadd.f32 %v3739_v12, %v10834_v27  ;;  %v8179_v12 = vld [vmem:[#allocation8 + $0xfc] sm:$0xf0] }
 0x7ab   : > { %v8182_v15 = vor.u32 %v9615_v10, %v8179_v12  ;;  %3947 = vmatpush.bf16.msrb.mxu2 %v8178_v11 }
 0x7ac   : > { %3743 = vadd.xlane.f32.xlu2 %v3740_v13 }
 0x7ad   : > { %3972 = vmatpush.bf16.msrb.mxu0 %v8198_v7  ;;  %3960 = vmatpush.bf16.msra.mxu3 %v8182_v15 }
 0x7af   : > { %3948 = vmatpush.bf16.msrb.mxu2 %v8166_v23 }
 0x7b3   : > { %3949 = vmatpush.bf16.msrb.mxu2 %v8154_v34 }
 0x81f   : > { %v3744_v26 = vpop.xlane.xlu2 %3743 }
 0x820   : > { %v3745_v47 = vmul.f32 %v3744_v26, %v10700_v16  ;;  %v9614_v26 = vld [vmem:[#allocation8 + $0xe8] sm:$0xf0] }
 0x822   : > { %v10884_v29 = vsub.f32 %v3740_v13, %v3745_v47  ;;  %v8185_v13 = vld [vmem:[#allocation8 + $0xf8] sm:$0xf]  ;;  %v8170_v47 = vor.u32 %v9612_v22, %v8167_v24 }
 0x823   : > { %v8186_v17 = vor.u32 %v9617_v14, %v8185_v13 }
 0x824   : > { %v3747_v27 = vmul.f32 %v10884_v29, %v10884_v29  ;;  %3961 = vmatpush.bf16.msra.mxu3 %v8170_v47 }
 0x825   : > { %3973 = vmatpush.bf16.msrb.mxu0 %v8186_v17 }
 0x826   : > { %3748 = vadd.xlane.f32.xlu0 %v3747_v27  ;;  %v8174_v27 = vor.u32 %v9614_v26, %v8173_v25 }
 0x828   : > { %3962 = vmatpush.bf16.msra.mxu3 %v8158_v38 }
 0x829   : > { %3974 = vmatpush.bf16.msrb.mxu0 %v8174_v27 }
 0x82d   : > { %3975 = vmatpush.bf16.msrb.mxu0 %v8162_v39 }
 0x899   : > { %v3749_v19 = vpop.xlane.xlu0 %3748 }
 0x89a   : > { %v3750_v40 = vmul.f32 %v3749_v19, %v10700_v16 }
 0x89c   : > { %v3751_v42 = vadd.f32 1e-05, %v3750_v40 }
 0x89e   : > { %10074 = vrsqrt.f32 %v3751_v42  ;;  %vm3758_vm10 = vweird.f32 %v3751_v42 }
 0x8a4   : > { %v10075_v43 = vpop.eup %10074 }
 0x8a5   : > { %v3753_v44 = vmul.f32 %v10075_v43, %v3751_v42  ;;  %vm3759_vm9 = vweird.f32 %v10075_v43 }
 0x8a6   : > { %vm3760_vm11 = vmor %vm3758_vm10, %vm3759_vm9 }
 0x8a7   : > { %v3754_v33 = vmul.f32 %v10075_v43, %v3753_v44 }
 0x8a9   : > { %v3755_v45 = vmul.f32 0.5, %v3754_v33 }
 0x8ab   : > { %v3756_v46 = vsub.f32 1.5, %v3755_v45 }
 0x8ad   : > { %v3757_v48 = vmul.f32 %v10075_v43, %v3756_v46 }
 0x8af   : > { %v3761_v49 = vsel %vm3760_vm11, %v10075_v43, %v3757_v48 }
 0x8b0   : > { %v3762_v52 = vmul.f32 %v3761_v49, %v10884_v29 }
 0x8b2   : > { %v3766_v28 = vmul.f32 %v10028_v36, %v3762_v52 }
 0x8b4   : > { %v10896_v53 = vadd.f32 %v10029_v51, %v3766_v28 }
 0x8b6   : > { %v3771_v54 = vpack.c.bf16 %v10896_v53, %v10896_v53 }
 0x8b8   : > { %3950 = vmatmul.bf16.vlgmr.msrb.gmra.mxu2 %v3771_v54  ;;  %3963 = vmatmul.bf16.vlgmr.msra.gmra.mxu3 %v3771_v54 }
 0x8b9   : > { %3976 = vmatmul.bf16.vlgmr.msrb.gmra.mxu0 %v3771_v54 }
 0x936   : > { %v3977_v57 = vpop.f32.mrf.mxu0 }
 0x937   : > { %v3978_v59 = vadd.f32 %v3977_v57, %v3810_v56 }
 0x939   : > { %v4000_v63 = vpack.c.bf16 %v3978_v59, %v3978_v59 }
 0x93b   : > { %v3951_v60 = vpop.f32.mrf.mxu2  ;;  %v3964_v61 = vpop.f32.mrf.mxu3  ;;  %v4001_v8 = vunpack.c.l.bf16 %v4000_v63 }
 0x93c   : > { %v3965_v29 = vadd.f32 %v3964_v61, %v3809_v58  ;;  %v3952_v30 = vadd.f32 %v3951_v60, %v3808_v9 }
 0x93d   : > { %v4002_v32 = vmul.f32 %v4001_v8, %v10737_v62  ;;  %v4003_v34 = vmul.f32 %v4001_v8, %v10743_v2  ;;  %v4004_v35 = vmul.f32 %v4001_v8, %v10755_v21  ;;  %v4005_v37 = vmul.f32 %v4001_v8, %v10739_v0 }
 0x93e   : > { %v3982_v3 = vpack.c.bf16 %v3965_v29, %v3965_v29  ;;  %v3979_v6 = vpop.f32.mrf.mxu0  ;;  %v3981_v19 = vpack.c.bf16 %v3952_v30, %v3952_v30  ;;  %v4006_v43 = vmul.f32 %v4001_v8, %v10741_v1  ;;  %v4007_v44 = vmul.f32 %v4001_v8, %v10745_v4 }
 0x93f   : > { %v4010_v38 = vpack.c.bf16 %v4002_v32, %v4002_v32  ;;  %v4011_v39 = vpack.c.bf16 %v4003_v34, %v4003_v34  ;;  %v4012_v40 = vpack.c.bf16 %v4004_v35, %v4004_v35  ;;  %v4013_v42 = vpack.c.bf16 %v4005_v37, %v4005_v37 }
 0x940   : > { %v3983_v7 = vunpack.c.l.bf16 %v3982_v3  ;;  %v4008_v33 = vmul.f32 %v4001_v8, %v10769_v50  ;;  %v4009_v45 = vmul.f32 %v4001_v8, %v10747_v5  ;;  %v4014_v46 = vpack.c.bf16 %v4006_v43, %v4006_v43 }
 0x941   : > { %v4015_v48 = vpack.c.bf16 %v4007_v44, %v4007_v44 }
 0x942   : > { %v3984_v10 = vmul.f32 %v3983_v7, %v10737_v62  ;;  %v3985_v11 = vmul.f32 %v3983_v7, %v10743_v2  ;;  %v3986_v12 = vmul.f32 %v3983_v7, %v10755_v21  ;;  %v3987_v13 = vmul.f32 %v3983_v7, %v10739_v0 }
 0x943   : > { %v3953_v14 = vpop.f32.mrf.mxu2  ;;  %v3966_v15 = vpop.f32.mrf.mxu3  ;;  %v3988_v17 = vmul.f32 %v3983_v7, %v10741_v1  ;;  %v3989_v18 = vmul.f32 %v3983_v7, %v10745_v4  ;;  %v3990_v20 = vmul.f32 %v3983_v7, %v10769_v50  ;;  %v3991_v22 = vmul.f32 %v3983_v7, %v10747_v5 }
 0x944   : > { %v3992_v23 = vpack.c.bf16 %v3984_v10, %v3984_v10  ;;  %v3993_v24 = vpack.c.bf16 %v3985_v11, %v3985_v11  ;;  %v3994_v25 = vpack.c.bf16 %v3986_v12, %v3986_v12  ;;  %v3995_v26 = vpack.c.bf16 %v3987_v13, %v3987_v13 }
 0x945   : > { %v3996_v47 = vpack.c.bf16 %v3988_v17, %v3988_v17  ;;  %v3997_v27 = vpack.c.bf16 %v3989_v18, %v3989_v18  ;;  %v3998_v31 = vpack.c.bf16 %v3990_v20, %v3990_v20  ;;  %v3999_v41 = vpack.c.bf16 %v3991_v22, %v3991_v22 }
 0x946   : > { %4025 = vmatpush.bf16.xpose.msra.mxu1 %v3992_v23  ;;  %4038 = vmatpush.bf16.xpose.msra.mxu2 %v3993_v24  ;;  %v4222_v62 = vsel %vm1187_vm4, %v4010_v38, 0  ;;  %v4241_v2 = vsel %vm1187_vm4, %v4011_v39, 0  ;;  %v4260_v0 = vsel %vm1187_vm4, %v4012_v40, 0  ;;  %v4279_v21 = vsel %vm1187_vm4, %v4013_v42, 0 }
 0x947   : > { %4051 = vmatpush.bf16.xpose.msrb.mxu3 %v3994_v25  ;;  %4064 = vmatpush.bf16.xpose.msra.mxu0 %v3995_v26  ;;  %v4016_v36 = vpack.c.bf16 %v4008_v33, %v4008_v33  ;;  %v4017_v49 = vpack.c.bf16 %v4009_v45, %v4009_v45  ;;  %v4298_v51 = vsel %vm1187_vm4, %v4014_v46, 0  ;;  %v4317_v52 = vsel %vm1187_vm4, %v4015_v48, 0 }
 0x949   : > { %v4336_v1 = vsel %vm1187_vm4, %v4016_v36, 0  ;;  %v4355_v4 = vsel %vm1187_vm4, %v4017_v49, 0 }
 0x94d   : > { %4026 = vmatmul.bf16.vlgmr.msra.gmra.mxu1 %v3981_v19  ;;  %4039 = vmatmul.bf16.vlgmr.msra.gmra.mxu2 %v3981_v19 }
 0x94e   : > { %4077 = vmatpush.bf16.xpose.msrb.mxu1 %v3996_v47  ;;  %4090 = vmatpush.bf16.xpose.msrb.mxu2 %v3997_v27 }
 0x94f   : > { %4103 = vmatpush.bf16.xpose.msra.mxu3 %v3998_v31  ;;  %4116 = vmatpush.bf16.xpose.msrb.mxu0 %v3999_v41 }
 0x950   : > { %4052 = vmatmul.bf16.vlgmr.msrb.gmra.mxu3 %v3981_v19  ;;  %4065 = vmatmul.bf16.vlgmr.msra.gmra.mxu0 %v3981_v19 }
 0x956   : > { %4231 = vmatpush.bf16.msra.mxu1 %v4222_v62  ;;  %4250 = vmatpush.bf16.msra.mxu2 %v4241_v2 }
 0x957   : > { %4269 = vmatpush.bf16.msrb.mxu3 %v4260_v0  ;;  %4288 = vmatpush.bf16.msra.mxu0 %v4279_v21 }
 0x95d   : > { %4078 = vmatmul.bf16.vlgmr.msrb.gmra.mxu1 %v3981_v19  ;;  %4091 = vmatmul.bf16.vlgmr.msrb.gmra.mxu2 %v3981_v19 }
 0x95e   : > { %4307 = vmatpush.bf16.msrb.mxu1 %v4298_v51  ;;  %4326 = vmatpush.bf16.msrb.mxu2 %v4317_v52 }
 0x960   : > { %4104 = vmatmul.bf16.vlgmr.msra.gmra.mxu3 %v3981_v19  ;;  %4117 = vmatmul.bf16.vlgmr.msrb.gmra.mxu0 %v3981_v19 }
 0x961   : > { %4345 = vmatpush.bf16.msra.mxu3 %v4336_v1  ;;  %4364 = vmatpush.bf16.msrb.mxu0 %v4355_v4 }
 0x9ca   : > { %v4027_v5 = vpop.f32.mrf.mxu1 }
 0x9cb   : > { %v4122_v28 = vsel %vm1087_vm5, %v4027_v5, -inf }
 0x9cc   : > { %4123 = vmax.xlane.f32.xlu0 %v4122_v28 }
 0x9cd   : > { %v4066_v50 = vpop.f32.mrf.mxu0 }
 0x9ce   : > { %v4131_v29 = vsel %vm1087_vm5, %v4066_v50, -inf }
 0x9d0   : > { %v4040_v54 = vpop.f32.mrf.mxu2 }
 0x9d1   : > { %v4125_v56 = vsel %vm1087_vm5, %v4040_v54, -inf }
 0x9d2   : > { %4126 = vmax.xlane.f32.xlu1 %v4125_v56  ;;  %v4029_v58 = vpop.f32.mrf.mxu1 }
 0x9d3   : > { %v4053_v55 = vpop.f32.mrf.mxu3 }
 0x9d4   : > { %v4128_v57 = vsel %vm1087_vm5, %v4053_v55, -inf }
 0x9d5   : > { %v4068_v59 = vpop.f32.mrf.mxu0  ;;  %4129 = vmax.xlane.f32.xlu2 %v4128_v57 }
 0x9d8   : > { %v4042_v60 = vpop.f32.mrf.mxu2 }
 0x9da   : > { %4132 = vmax.xlane.f32.xlu1 %v4131_v29  ;;  %v4079_v63 = vpop.f32.mrf.mxu1 }
 0x9db   : > { %v4055_v61 = vpop.f32.mrf.mxu3  ;;  %v4134_v9 = vsel %vm1087_vm5, %v4079_v63, -inf }
 0x9dd   : > { %v4118_v3 = vpop.f32.mrf.mxu0 }
 0x9de   : > { %v4143_v15 = vsel %vm1087_vm5, %v4118_v3, -inf }
 0x9e0   : > { %v4092_v6 = vpop.f32.mrf.mxu2 }
 0x9e1   : > { %v4137_v8 = vsel %vm1087_vm5, %v4092_v6, -inf }
 0x9e2   : > { %4138 = vmax.xlane.f32.xlu2 %v4137_v8  ;;  %4135 = vmax.xlane.f32.xlu1 %v4134_v9  ;;  %v4081_v11 = vpop.f32.mrf.mxu1 }
 0x9e3   : > { %v4105_v7 = vpop.f32.mrf.mxu3 }
 0x9e4   : > { %v4140_v10 = vsel %vm1087_vm5, %v4105_v7, -inf }
 0x9e5   : > { %v4120_v12 = vpop.f32.mrf.mxu0  ;;  %4141 = vmax.xlane.f32.xlu0 %v4140_v10 }
 0x9e8   : > { %v4094_v13 = vpop.f32.mrf.mxu2 }
 0x9ea   : > { %4144 = vmax.xlane.f32.xlu2 %v4143_v15 }
 0x9eb   : > { %v4107_v14 = vpop.f32.mrf.mxu3 }
 0xa3f   : > { %v4124_v17 = vpop.xlane.xlu0 %4123 }
 0xa40   : > { %v4146_v18 = vsub.f32 %v4027_v5, %v4124_v17 }
 0xa42   : > { %v4154_v20 = vmul.f32 1.442695, %v4146_v18 }
 0xa44   : > { %10076 = vpow2.f32 %v4154_v20 }
 0xa45   : > { %v4127_v22 = vpop.xlane.xlu1 %4126 }
 0xa46   : > { %v4147_v24 = vsub.f32 %v4040_v54, %v4127_v22 }
 0xa48   : > { %v4130_v23 = vpop.xlane.xlu2 %4129  ;;  %v4156_v26 = vmul.f32 1.442695, %v4147_v24 }
 0xa49   : > { %v4148_v25 = vsub.f32 %v4053_v55, %v4130_v23 }
 0xa4a   : > { %v10077_v27 = vpop.eup %10076  ;;  %10078 = vpow2.f32 %v4156_v26 }
 0xa4b   : > { %v4158_v47 = vmul.f32 1.442695, %v4148_v25  ;;  %v4170_v31 = vsel %vm1087_vm5, %v10077_v27, 0.0 }
 0xa4c   : > { %4171 = vadd.xlane.f32.xlu2 %v4170_v31  ;;  %v9640_v31 = vld [vmem:[#allocation10 + $0x78] sm:$0xff] }
 0xa4d   : > { %10080 = vpow2.f32 %v4158_v47  ;;  %v4133_v41 = vpop.xlane.xlu1 %4132 }
 0xa4e   : > { %v4149_v32 = vsub.f32 %v4066_v50, %v4133_v41  ;;  %v9639_v41 = vld [vmem:[#allocation10 + $0x70] sm:$0xff] }
 0xa50   : > { %v10079_v34 = vpop.eup %10078  ;;  %v4160_v30 = vmul.f32 1.442695, %v4149_v32  ;;  %v9638_v32 = vld [vmem:[#allocation10 + $0x68] sm:$0xff] }
 0xa51   : > { %v4173_v37 = vsel %vm1087_vm5, %v10079_v34, 0.0 }
 0xa52   : > { %10082 = vpow2.f32 %v4160_v30  ;;  %4174 = vadd.xlane.f32.xlu0 %v4173_v37  ;;  %v9636_v30 = vld [vmem:[#allocation10 + $0x58] sm:$0xff] }
 0xa53   : > { %v10081_v35 = vpop.eup %10080 }
 0xa54   : > { %v4176_v38 = vsel %vm1087_vm5, %v10081_v35, 0.0 }
 0xa55   : > { %4177 = vadd.xlane.f32.xlu1 %v4176_v38  ;;  %v4139_v39 = vpop.xlane.xlu2 %4138  ;;  %v4136_v19 = vpop.xlane.xlu1 %4135  ;;  %v9634_v38 = vld [vmem:[#allocation10 + $0x48] sm:$0xff] }
 0xa56   : > { %v4151_v40 = vsub.f32 %v4092_v6, %v4139_v39  ;;  %v4150_v62 = vsub.f32 %v4079_v63, %v4136_v19  ;;  %v9633_v39 = vld [vmem:[#allocation10 + $0x40] sm:$0xff] }
 0xa58   : > { %v4142_v42 = vpop.xlane.xlu0 %4141  ;;  %v10083_v0 = vpop.eup %10082  ;;  %v4164_v21 = vmul.f32 1.442695, %v4151_v40  ;;  %v4162_v43 = vmul.f32 1.442695, %v4150_v62 }
 0xa59   : > { %v4152_v2 = vsub.f32 %v4105_v7, %v4142_v42  ;;  %v4179_v33 = vsel %vm1087_vm5, %v10083_v0, 0.0 }
 0xa5a   : > { %10084 = vpow2.f32 %v4164_v21  ;;  %4180 = vadd.xlane.f32.xlu0 %v4179_v33 }
 0xa5b   : > { %v4166_v44 = vmul.f32 1.442695, %v4152_v2 }
 0xa5d   : > { %10086 = vpow2.f32 %v4166_v44  ;;  %v4145_v45 = vpop.xlane.xlu2 %4144 }
 0xa5e   : > { %10088 = vpow2.f32 %v4162_v43  ;;  %v4153_v46 = vsub.f32 %v4118_v3, %v4145_v45 }
 0xa60   : > { %v10085_v48 = vpop.eup %10084  ;;  %v4168_v36 = vmul.f32 1.442695, %v4153_v46 }
 0xa61   : > { %v4185_v51 = vsel %vm1087_vm5, %v10085_v48, 0.0 }
 0xa62   : > { %10090 = vpow2.f32 %v4168_v36  ;;  %4186 = vadd.xlane.f32.xlu1 %v4185_v51 }
 0xa63   : > { %v10087_v49 = vpop.eup %10086 }
 0xa64   : > { %v10089_v52 = vpop.eup %10088  ;;  %v4188_v1 = vsel %vm1087_vm5, %v10087_v49, 0.0 }
 0xa65   : > { %4189 = vadd.xlane.f32.xlu2 %v4188_v1  ;;  %v4182_v4 = vsel %vm1087_vm5, %v10089_v52, 0.0 }
 0xa66   : > { %4183 = vadd.xlane.f32.xlu0 %v4182_v4 }
 0xa68   : > { %v10091_v5 = vpop.eup %10090 }
 0xa69   : > { %v4191_v50 = vsel %vm1087_vm5, %v10091_v5, 0.0 }
 0xa6a   : > { %4192 = vadd.xlane.f32.xlu1 %v4191_v50 }
 0xabf   : > { %v4172_v28 = vpop.xlane.xlu2 %4171 }
 0xac0   : > { %10092 = vrcp.f32 %v4172_v28 }
 0xac5   : > { %v4175_v54 = vpop.xlane.xlu0 %4174 }
 0xac6   : > { %v10093_v55 = vpop.eup %10092  ;;  %10094 = vrcp.f32 %v4175_v54 }
 0xac7   : > { %v4202_v57 = vmul.f32 %v10093_v55, %v10077_v27  ;;  %v10030_v55 = vld [vmem:[%s11076_s7 + $0x1] ss:$0 sm:$0xff] }
 0xac8   : > { %v4178_v56 = vpop.xlane.xlu1 %4177 }
 0xac9   : > { %10096 = vrcp.f32 %v4178_v56  ;;  %v4210_v58 = vpack.c.bf16 %v4202_v57, %v4202_v57 }
 0xacb   : > { %8247 = vmatmul.msk.bf16.vlgmr.msra.gmra.mxu1 %vm1087_vm5, %v4210_v58 }
 0xacc   : > { %v10095_v59 = vpop.eup %10094  ;;  %4448 = vmatpush.bf16.msra.mxu1 %v9640_v31  ;;  %v9681_v31 = vld [vmem:[#allocation11 + $0x684] sm:$0xf] }
 0xacd   : > { %v4203_v61 = vmul.f32 %v10095_v59, %v10079_v34  ;;  %v4181_v29 = vpop.xlane.xlu0 %4180  ;;  %v9637_v34 = vld [vmem:[#allocation10 + $0x60] sm:$0xff] }
 0xace   : > { %10098 = vrcp.f32 %v4181_v29  ;;  %v9697_v29 = vld [vmem:[#allocation11 + $0x784] sm:$0xf] }
 0xacf   : > { %v10097_v60 = vpop.eup %10096  ;;  %v4211_v3 = vpack.c.bf16 %v4203_v61, %v4203_v61  ;;  %v9701_v61 = vld [vmem:[#allocation11 + $0x7bc] sm:$0xf0] }
 0xad0   : > { %v4204_v63 = vmul.f32 %v10097_v60, %v10081_v35  ;;  %4449 = vmatpush.bf16.msra.mxu1 %v9639_v41  ;;  %v9635_v35 = vld [vmem:[#allocation10 + $0x50] sm:$0xff]  ;;  %v8517_v60 = vld [vmem:[#allocation11 + $0x780] sm:$0xf]  ;;  %v8455_v41 = vld [vmem:[#allocation11 + $0x6c0] sm:$0xf0] }
 0xad1   : > { %8248 = vmatmul.msk.bf16.vlgmr.msra.gmra.mxu2 %vm1087_vm5, %v4211_v3  ;;  %v8519_v3 = vld [vmem:[#allocation11 + $0x7c0] sm:$0xf0] }
 0xad2   : > { %v4212_v6 = vpack.c.bf16 %v4204_v63, %v4204_v63  ;;  %v8518_v63 = vor.u32 %v9701_v61, %v8517_v60  ;;  %v8399_v60 = vld [vmem:[#allocation11 + $0x5c8] sm:$0xf0] }
 0xad4   : > { %8249 = vmatmul.msk.bf16.vlgmr.msrb.gmra.mxu3 %vm1087_vm5, %v4212_v6  ;;  %v10099_v7 = vpop.eup %10098  ;;  %4450 = vmatpush.bf16.msra.mxu1 %v9638_v32  ;;  %v8525_v6 = vld [vmem:[#allocation11 + $0x788] sm:$0xf] }
 0xad5   : > { %v4205_v8 = vmul.f32 %v10099_v7, %v10083_v0  ;;  %v4187_v9 = vpop.xlane.xlu1 %4186  ;;  %v9702_v7 = vld [vmem:[#allocation11 + $0x7c4] sm:$0xf0]  ;;  %4901 = vmatpush.bf16.msra.mxu2 %v8518_v63  ;;  %v9657_v63 = vld [vmem:[#allocation11 + $0x504] sm:$0xf] }
 0xad6   : > { %10100 = vrcp.f32 %v4187_v9  ;;  %v8526_v9 = vor.u32 %v9702_v7, %v8525_v6  ;;  %v8461_v32 = vld [vmem:[#allocation11 + $0x688] sm:$0xf]  ;;  %v8359_v6 = vld [vmem:[#allocation11 + $0x540] sm:$0xf0] }
 0xad7   : > { %v4213_v11 = vpack.c.bf16 %v4205_v8, %v4205_v8  ;;  %v8522_v8 = vor.u32 %v9697_v29, %v8519_v3  ;;  %v9661_v29 = vld [vmem:[#allocation11 + $0x53c] sm:$0xf0]  ;;  %v8365_v7 = vld [vmem:[#allocation11 + $0x508] sm:$0xf] }
 0xad8   : > { %v4190_v10 = vpop.xlane.xlu2 %4189  ;;  %4451 = vmatpush.bf16.msra.mxu1 %v9637_v34 }
 0xad9   : > { %10102 = vrcp.f32 %v4190_v10  ;;  %v4184_v12 = vpop.xlane.xlu0 %4183  ;;  %8250 = vmatmul.msk.bf16.vlgmr.msra.gmra.mxu0 %vm1087_vm5, %v4213_v11  ;;  %v9698_v10 = vld [vmem:[#allocation11 + $0x78c] sm:$0xf]  ;;  %4914 = vmatpush.bf16.msrb.mxu3 %v8522_v8  ;;  %v9662_v8 = vld [vmem:[#allocation11 + $0x544] sm:$0xf0] }
 0xada   : > { %10104 = vrcp.f32 %v4184_v12  ;;  %v8527_v11 = vld [vmem:[#allocation11 + $0x7c8] sm:$0xf0]  ;;  %v8485_v12 = vld [vmem:[#allocation11 + $0x700] sm:$0xf]  ;;  %4927 = vmatpush.bf16.msra.mxu0 %v8526_v9  ;;  %v8362_v9 = vor.u32 %v9657_v63, %v8359_v6  ;;  %v8477_v63 = vld [vmem:[#allocation11 + $0x698] sm:$0xf] }
 0xadc   : > { %v10101_v13 = vpop.eup %10100  ;;  %4452 = vmatpush.bf16.msra.mxu1 %v9636_v30  ;;  %v9686_v30 = vld [vmem:[#allocation11 + $0x6c4] sm:$0xf0] }
 0xadd   : > { %v4207_v15 = vmul.f32 %v10101_v13, %v10085_v48  ;;  %v4193_v17 = vpop.xlane.xlu1 %4192  ;;  %v8530_v13 = vor.u32 %v9698_v10, %v8527_v11  ;;  %v8366_v10 = vor.u32 %v9662_v8, %v8365_v7  ;;  %v9658_v11 = vld [vmem:[#allocation11 + $0x50c] sm:$0xf] }
 0xade   : > { %10106 = vrcp.f32 %v4193_v17 }
 0xadf   : > { %v10103_v14 = vpop.eup %10102  ;;  %v4215_v23 = vpack.c.bf16 %v4207_v15, %v4207_v15  ;;  %v8487_v15 = vld [vmem:[#allocation11 + $0x740] sm:$0xf0] }
 0xae0   : > { %v10105_v18 = vpop.eup %10104  ;;  %v4208_v20 = vmul.f32 %v10103_v14, %v10087_v49  ;;  %4453 = vmatpush.bf16.msra.mxu1 %v9635_v35  ;;  %v9693_v14 = vld [vmem:[#allocation11 + $0x73c] sm:$0xf0]  ;;  %v9682_v35 = vld [vmem:[#allocation11 + $0x68c] sm:$0xf] }
 0xae1   : > { %v4206_v22 = vmul.f32 %v10105_v18, %v10089_v52  ;;  %8252 = vmatmul.msk.bf16.vlgmr.msrb.gmra.mxu2 %vm1087_vm5, %v4215_v23  ;;  %v8486_v17 = vor.u32 %v9693_v14, %v8485_v12  ;;  %v9690_v23 = vld [vmem:[#allocation11 + $0x70c] sm:$0xf]  ;;  %v8325_v14 = vld [vmem:[#allocation11 + $0x480] sm:$0xf] }
 0xae2   : > { %v4216_v24 = vpack.c.bf16 %v4208_v20, %v4208_v20  ;;  %v8493_v20 = vld [vmem:[#allocation11 + $0x708] sm:$0xf]  ;;  %v8367_v12 = vld [vmem:[#allocation11 + $0x548] sm:$0xf0] }
 0xae3   : > { %v4214_v25 = vpack.c.bf16 %v4206_v22, %v4206_v22  ;;  %v9694_v22 = vld [vmem:[#allocation11 + $0x744] sm:$0xf0]  ;;  %4902 = vmatpush.bf16.msra.mxu2 %v8486_v17 }
 0xae4   : > { %8253 = vmatmul.msk.bf16.vlgmr.msra.gmra.mxu3 %vm1087_vm5, %v4216_v24  ;;  %v10107_v26 = vpop.eup %10106  ;;  %4454 = vmatpush.bf16.msra.mxu1 %v9634_v38  ;;  %v8494_v24 = vor.u32 %v9694_v22, %v8493_v20  ;;  %v8458_v38 = vor.u32 %v9681_v31, %v8455_v41  ;;  %v8333_v20 = vld [vmem:[#allocation11 + $0x488] sm:$0xf]  ;;  %v9645_v31 = vld [vmem:[#allocation11 + $0x43c] sm:$0xf0]  ;;  %v9641_v41 = vld [vmem:[#allocation11 + $0x404] sm:$0xf] }
 0xae5   : > { %8251 = vmatmul.msk.bf16.vlgmr.msrb.gmra.mxu1 %vm1087_vm5, %v4214_v25  ;;  %v4209_v47 = vmul.f32 %v10107_v26, %v10091_v5  ;;  %v8495_v25 = vld [vmem:[#allocation11 + $0x748] sm:$0xf0]  ;;  %v8453_v26 = vld [vmem:[#allocation11 + $0x680] sm:$0xf]  ;;  %v9654_v22 = vld [vmem:[#allocation11 + $0x4c4] sm:$0xf0] }
 0xae6   : > { %4928 = vmatpush.bf16.msra.mxu0 %v8494_v24  ;;  %v8334_v24 = vor.u32 %v9654_v22, %v8333_v20  ;;  %v9680_v20 = vld [vmem:[#allocation11 + $0x654] sm:$0xf0] }
 0xae7   : > { %v4217_v27 = vpack.c.bf16 %v4209_v47, %v4209_v47  ;;  %v9685_v47 = vld [vmem:[#allocation11 + $0x6bc] sm:$0xf0] }
 0xae8   : > { %4455 = vmatpush.bf16.msra.mxu1 %v9633_v39  ;;  %v8454_v34 = vor.u32 %v9685_v47, %v8453_v26  ;;  %v8462_v39 = vor.u32 %v9686_v30, %v8461_v32  ;;  %v8335_v26 = vld [vmem:[#allocation11 + $0x4c8] sm:$0xf0]  ;;  %v8301_v30 = vld [vmem:[#allocation11 + $0x408] sm:$0xf] }
 0xae9   : > { %8254 = vmatmul.msk.bf16.vlgmr.msrb.gmra.mxu0 %vm1087_vm5, %v4217_v27  ;;  %v8498_v27 = vor.u32 %v9690_v23, %v8495_v25  ;;  %v9650_v25 = vld [vmem:[#allocation11 + $0x48c] sm:$0xf] }
 0xaea   : > { %4903 = vmatpush.bf16.msra.mxu2 %v8454_v34  ;;  %4929 = vmatpush.bf16.msra.mxu0 %v8462_v39  ;;  %v8338_v47 = vor.u32 %v9650_v25, %v8335_v26  ;;  %v8295_v34 = vld [vmem:[#allocation11 + $0x440] sm:$0xf0]  ;;  %v9642_v39 = vld [vmem:[#allocation11 + $0x40c] sm:$0xf] }
 0xaec   : > { %4940 = vmatpush.bf16.msrb.mxu1 %v8530_v13  ;;  %v8370_v13 = vor.u32 %v9658_v11, %v8367_v12  ;;  %v8437_v11 = vld [vmem:[#allocation11 + $0x610] sm:$0xf] }
 0xaf0   : > { %4941 = vmatpush.bf16.msrb.mxu1 %v8498_v27  ;;  %v8293_v27 = vld [vmem:[#allocation11 + $0x400] sm:$0xf] }
 0xaf1   : > { %v8294_v32 = vor.u32 %v9645_v31, %v8293_v27  ;;  %v9671_v31 = vld [vmem:[#allocation11 + $0x5cc] sm:$0xf0] }
 0xb48   : > { %v4233_v37 = vpop.f32.mrf.mxu1 }
 0xb50   : > { %v4235_v19 = vpop.f32.mrf.mxu1 }
 0xb51   : > { %v8421_v19 = vld [vmem:[#allocation11 + $0x600] sm:$0xf] }
 0xb54   : > { %v4252_v40 = vpop.f32.mrf.mxu2 }
 0xb55   : > { %v4370_v2 = vadd.f32 %v4252_v40, %v4233_v37  ;;  %v8463_v37 = vld [vmem:[#allocation11 + $0x6c8] sm:$0xf0]  ;;  %v9677_v40 = vld [vmem:[#allocation11 + $0x63c] sm:$0xf0] }
 0xb56   : > { %v4290_v62 = vpop.f32.mrf.mxu0 }
 0xb57   : > { %v4271_v42 = vpop.f32.mrf.mxu3 }
 0xb58   : > { %v4371_v21 = vadd.f32 %v4370_v2, %v4271_v42  ;;  %v9673_v42 = vld [vmem:[#allocation11 + $0x604] sm:$0xf] }
 0xb59   : > { %v8423_v2 = vld [vmem:[#allocation11 + $0x640] sm:$0xf0] }
 0xb5a   : > { %v4372_v45 = vadd.f32 %v4371_v21, %v4290_v62  ;;  %v8466_v62 = vor.u32 %v9682_v35, %v8463_v37  ;;  %v9678_v21 = vld [vmem:[#allocation11 + $0x644] sm:$0xf0]  ;;  %v8298_v37 = vor.u32 %v9641_v41, %v8295_v34  ;;  %v9667_v41 = vld [vmem:[#allocation11 + $0x594] sm:$0xf] }
 0xb5b   : > { %v9646_v35 = vld [vmem:[#allocation11 + $0x444] sm:$0xf0] }
 0xb5c   : > { %v4254_v0 = vpop.f32.mrf.mxu2  ;;  %4942 = vmatpush.bf16.msrb.mxu1 %v8466_v62  ;;  %v9703_v62 = vld [vmem:[#allocation11 + $0x7cc] sm:$0xf0] }
 0xb5d   : > { %v8429_v0 = vld [vmem:[#allocation11 + $0x608] sm:$0xf] }
 0xb5e   : > { %v4292_v44 = vpop.f32.mrf.mxu0 }
 0xb5f   : > { %v4273_v43 = vpop.f32.mrf.mxu3  ;;  %v8431_v44 = vld [vmem:[#allocation11 + $0x648] sm:$0xf0] }
 0xb60   : > { %v9674_v43 = vld [vmem:[#allocation11 + $0x60c] sm:$0xf] }
 0xb62   : > { %v4309_v33 = vpop.f32.mrf.mxu1 }
 0xb63   : > { %v4373_v46 = vadd.f32 %v4372_v45, %v4309_v33  ;;  %v8422_v33 = vor.u32 %v9677_v40, %v8421_v19  ;;  %v8426_v45 = vor.u32 %v9673_v42, %v8423_v2  ;;  %v8303_v19 = vld [vmem:[#allocation11 + $0x448] sm:$0xf0]  ;;  %v8533_v40 = vld [vmem:[#allocation11 + $0x790] sm:$0xf]  ;;  %v9699_v2 = vld [vmem:[#allocation11 + $0x794] sm:$0xf] }
 0xb64   : > { %v4328_v48 = vpop.f32.mrf.mxu2  ;;  %v8306_v42 = vor.u32 %v9642_v39, %v8303_v19 }
 0xb65   : > { %v4374_v36 = vadd.f32 %v4373_v46, %v4328_v48  ;;  %v8430_v46 = vor.u32 %v9678_v21, %v8429_v0  ;;  %v8434_v48 = vor.u32 %v9674_v43, %v8431_v44  ;;  %4904 = vmatpush.bf16.msra.mxu2 %v8422_v33  ;;  %v8535_v0 = vld [vmem:[#allocation11 + $0x7d0] sm:$0xf0]  ;;  %v8534_v21 = vor.u32 %v9703_v62, %v8533_v40  ;;  %v8541_v44 = vld [vmem:[#allocation11 + $0x798] sm:$0xf]  ;;  %v8373_v40 = vld [vmem:[#allocation11 + $0x510] sm:$0xf] }
 0xb66   : > { %v4366_v51 = vpop.f32.mrf.mxu0  ;;  %v8538_v43 = vor.u32 %v9699_v2, %v8535_v0  ;;  %v9704_v33 = vld [vmem:[#allocation11 + $0x7d4] sm:$0xf0]  ;;  %v9663_v62 = vld [vmem:[#allocation11 + $0x54c] sm:$0xf0]  ;;  %v9659_v2 = vld [vmem:[#allocation11 + $0x514] sm:$0xf] }
 0xb67   : > { %v4347_v49 = vpop.f32.mrf.mxu3  ;;  %4930 = vmatpush.bf16.msra.mxu0 %v8430_v46  ;;  %4943 = vmatpush.bf16.msrb.mxu1 %v8434_v48  ;;  %v8542_v46 = vor.u32 %v9704_v33, %v8541_v44  ;;  %v8543_v48 = vld [vmem:[#allocation11 + $0x7d8] sm:$0xf0]  ;;  %v8375_v0 = vld [vmem:[#allocation11 + $0x550] sm:$0xf0]  ;;  %v9664_v44 = vld [vmem:[#allocation11 + $0x554] sm:$0xf0] }
 0xb68   : > { %v4375_v52 = vadd.f32 %v4374_v36, %v4347_v49 }
 0xb6a   : > { %v4311_v1 = vpop.f32.mrf.mxu1  ;;  %v4376_v4 = vadd.f32 %v4375_v52, %v4366_v51 }
 0xb6b   : > { %v8389_v1 = vld [vmem:[#allocation11 + $0x580] sm:$0xf] }
 0xb6c   : > { %v4377_v5 = vpack.c.bf16 %v4376_v4, %v4376_v4  ;;  %v4330_v50 = vpop.f32.mrf.mxu2  ;;  %v9669_v4 = vld [vmem:[#allocation11 + $0x5bc] sm:$0xf0] }
 0xb6d   : > { %v8390_v50 = vor.u32 %v9669_v4, %v8389_v1  ;;  %v9691_v4 = vld [vmem:[#allocation11 + $0x714] sm:$0xf] }
 0xb6e   : > { %4456 = vmatmul.bf16.vlgmr.msra.gmra.mxu1 %v4377_v5  ;;  %v4368_v54 = vpop.f32.mrf.mxu0  ;;  %v9665_v5 = vld [vmem:[#allocation11 + $0x584] sm:$0xf] }
 0xb6f   : > { %v4349_v28 = vpop.f32.mrf.mxu3  ;;  %v8397_v54 = vld [vmem:[#allocation11 + $0x588] sm:$0xf]  ;;  %4905 = vmatpush.bf16.msra.mxu2 %v8390_v50  ;;  %v8509_v50 = vld [vmem:[#allocation11 + $0x718] sm:$0xf] }
 0xb70   : > { %v8391_v28 = vld [vmem:[#allocation11 + $0x5c0] sm:$0xf0] }
 0xbeb   : > { %v4457_v56 = vpop.f32.mrf.mxu1 }
 0xbec   : > { %v4458_v57 = vadd.f32 %v10030_v55, %v4457_v56  ;;  %v9670_v55 = vld [vmem:[#allocation11 + $0x5c4] sm:$0xf0]  ;;  %v8394_v56 = vor.u32 %v9665_v5, %v8391_v28  ;;  %v8503_v5 = vld [vmem:[#allocation11 + $0x750] sm:$0xf0] }
 0xbed   : > { %v8506_v28 = vor.u32 %v9691_v4, %v8503_v5  ;;  %v9655_v4 = vld [vmem:[#allocation11 + $0x4cc] sm:$0xf0]  ;;  %v9651_v5 = vld [vmem:[#allocation11 + $0x494] sm:$0xf] }
 0xbee   : > { %v10955_v58 = vadd.f32 %v4458_v57, %v10896_v53  ;;  %v9689_v53 = vld [vmem:[#allocation11 + $0x704] sm:$0xf]  ;;  %v8398_v57 = vor.u32 %v9670_v55, %v8397_v54  ;;  %v9696_v54 = vld [vmem:[#allocation11 + $0x754] sm:$0xf0]  ;;  %v9692_v55 = vld [vmem:[#allocation11 + $0x71c] sm:$0xf] }
 0xbef   : > { %v8490_v18 = vor.u32 %v9689_v53, %v8487_v15  ;;  %v9653_v53 = vld [vmem:[#allocation11 + $0x4bc] sm:$0xf0]  ;;  %v9649_v15 = vld [vmem:[#allocation11 + $0x484] sm:$0xf] }
 0xbf0   : > { %4466 = vadd.xlane.f32.xlu2 %v10955_v58  ;;  %4931 = vmatpush.bf16.msra.mxu0 %v8398_v57  ;;  %v8326_v17 = vor.u32 %v9653_v53, %v8325_v14  ;;  %v8510_v57 = vor.u32 %v9696_v54, %v8509_v50  ;;  %v9679_v14 = vld [vmem:[#allocation11 + $0x64c] sm:$0xf0]  ;;  %v9675_v53 = vld [vmem:[#allocation11 + $0x614] sm:$0xf] }
 0xbf1   : > { %4915 = vmatpush.bf16.msrb.mxu3 %v8490_v18  ;;  %v8327_v18 = vld [vmem:[#allocation11 + $0x4c0] sm:$0xf0]  ;;  %v8438_v25 = vor.u32 %v9679_v14, %v8437_v11  ;;  %v8343_v50 = vld [vmem:[#allocation11 + $0x4d0] sm:$0xf0]  ;;  %v9648_v11 = vld [vmem:[#allocation11 + $0x454] sm:$0xf0] }
 0xbf2   : > { %v8330_v23 = vor.u32 %v9649_v15, %v8327_v18  ;;  %v8439_v15 = vld [vmem:[#allocation11 + $0x650] sm:$0xf0]  ;;  %v8445_v18 = vld [vmem:[#allocation11 + $0x618] sm:$0xf] }
 0xbf3   : > { %v4459_v59 = vpop.f32.mrf.mxu1  ;;  %v8442_v26 = vor.u32 %v9675_v53, %v8439_v15  ;;  %v8446_v27 = vor.u32 %v9680_v20, %v8445_v18 }
 0xbf4   : > { %v9666_v59 = vld [vmem:[#allocation11 + $0x58c] sm:$0xf]  ;;  %4932 = vmatpush.bf16.msra.mxu0 %v8366_v10  ;;  %v8479_v10 = vld [vmem:[#allocation11 + $0x6d8] sm:$0xf0] }
 0xbf5   : > { %4916 = vmatpush.bf16.msrb.mxu3 %v8458_v38  ;;  %v8402_v61 = vor.u32 %v9666_v59, %v8399_v60  ;;  %v8302_v38 = vor.u32 %v9646_v35, %v8301_v30  ;;  %v8469_v60 = vld [vmem:[#allocation11 + $0x690] sm:$0xf]  ;;  %v8413_v30 = vld [vmem:[#allocation11 + $0x598] sm:$0xf] }
 0xbf6   : > { %v9672_v35 = vld [vmem:[#allocation11 + $0x5d4] sm:$0xf0] }
 0xbf7   : > { %4944 = vmatpush.bf16.msrb.mxu1 %v8402_v61  ;;  %v9687_v61 = vld [vmem:[#allocation11 + $0x6cc] sm:$0xf0] }
 0xbf8   : > { %4933 = vmatpush.bf16.msra.mxu0 %v8334_v24  ;;  %v8470_v7 = vor.u32 %v9687_v61, %v8469_v60  ;;  %v8447_v24 = vld [vmem:[#allocation11 + $0x658] sm:$0xf0] }
 0xbf9   : > { %4917 = vmatpush.bf16.msrb.mxu3 %v8426_v45  ;;  %v9700_v45 = vld [vmem:[#allocation11 + $0x79c] sm:$0xf] }
 0xbfb   : > { %4945 = vmatpush.bf16.msrb.mxu1 %v8370_v13 }
 0xbfc   : > { %4934 = vmatpush.bf16.msra.mxu0 %v8302_v38  ;;  %v8415_v38 = vld [vmem:[#allocation11 + $0x5d8] sm:$0xf0] }
 0xbfd   : > { %4918 = vmatpush.bf16.msrb.mxu3 %v8394_v56  ;;  %v8511_v56 = vld [vmem:[#allocation11 + $0x758] sm:$0xf0] }
 0xbfe   : > { %v8514_v59 = vor.u32 %v9692_v55, %v8511_v56  ;;  %v8349_v55 = vld [vmem:[#allocation11 + $0x498] sm:$0xf] }
 0xbff   : > { %4946 = vmatpush.bf16.msrb.mxu1 %v8338_v47  ;;  %v8405_v47 = vld [vmem:[#allocation11 + $0x590] sm:$0xf]  ;;  %v9656_v56 = vld [vmem:[#allocation11 + $0x4d4] sm:$0xf0] }
 0xc00   : > { %4979 = vmatpush.bf16.msrb.mxu0 %v8542_v46  ;;  %v8406_v39 = vor.u32 %v9671_v31, %v8405_v47  ;;  %v8383_v46 = vld [vmem:[#allocation11 + $0x558] sm:$0xf0] }
 0xc01   : > { %4919 = vmatpush.bf16.msrb.mxu3 %v8362_v9  ;;  %v9684_v9 = vld [vmem:[#allocation11 + $0x69c] sm:$0xf] }
 0xc02   : > { %v9736_v31 = vld [vmem:[#allocation14 + $0x4f8] sm:$0xff] }
 0xc03   : > { %4947 = vmatpush.bf16.msrb.mxu1 %v8306_v42  ;;  %v8414_v42 = vor.u32 %v9672_v35, %v8413_v30  ;;  %v9711_v30 = vld [vmem:[#allocation14 + $0x430] sm:$0xff] }
 0xc04   : > { %4980 = vmatpush.bf16.msrb.mxu0 %v8510_v57  ;;  %v9652_v57 = vld [vmem:[#allocation11 + $0x49c] sm:$0xf]  ;;  %v9719_v35 = vld [vmem:[#allocation14 + $0x470] sm:$0xff] }
 0xc05   : > { %4920 = vmatpush.bf16.msrb.mxu3 %v8330_v23  ;;  %v9676_v23 = vld [vmem:[#allocation11 + $0x61c] sm:$0xf] }
 0xc06   : > { %v8450_v34 = vor.u32 %v9676_v23, %v8447_v24  ;;  %v10032_v24 = vld [vmem:[%s11120_s26 + $0x1] ss:$0 sm:$0xff] }
 0xc09   : > { %4921 = vmatpush.bf16.msrb.mxu3 %v8298_v37  ;;  %v9668_v37 = vld [vmem:[#allocation11 + $0x59c] sm:$0xf] }
 0xc0d   : > { %4966 = vmatpush.bf16.msra.mxu3 %v8538_v43  ;;  %v8381_v43 = vld [vmem:[#allocation11 + $0x518] sm:$0xf] }
 0xc11   : > { %4967 = vmatpush.bf16.msra.mxu3 %v8506_v28 }
 0xc63   : > { %v4467_v36 = vpop.xlane.xlu2 %4466 }
 0xc64   : > { %v4468_v49 = vmul.f32 %v4467_v36, %v10700_v16  ;;  %v8501_v36 = vld [vmem:[#allocation11 + $0x710] sm:$0xf] }
 0xc66   : > { %v10960_v51 = vsub.f32 %v10955_v58, %v4468_v49  ;;  %v8357_v58 = vld [vmem:[#allocation11 + $0x500] sm:$0xf]  ;;  %v9695_v49 = vld [vmem:[#allocation11 + $0x74c] sm:$0xf0] }
 0xc67   : > { %v8358_v3 = vor.u32 %v9661_v29, %v8357_v58  ;;  %v8502_v1 = vor.u32 %v9695_v49, %v8501_v36  ;;  %v9683_v58 = vld [vmem:[#allocation11 + $0x694] sm:$0xf]  ;;  %v8374_v36 = vor.u32 %v9663_v62, %v8373_v40  ;;  %v8378_v49 = vor.u32 %v9659_v2, %v8375_v0  ;;  %v9725_v40 = vld [vmem:[#allocation14 + $0x4a0] sm:$0xff]  ;;  %v9724_v0 = vld [vmem:[#allocation14 + $0x498] sm:$0xff] }
 0xc68   : > { %v4470_v52 = vmul.f32 %v10960_v51, %v10960_v51  ;;  %v8471_v29 = vld [vmem:[#allocation11 + $0x6d0] sm:$0xf0]  ;;  %v9709_v62 = vld [vmem:[#allocation14 + $0x420] sm:$0xff] }
 0xc69   : > { %4906 = vmatpush.bf16.msra.mxu2 %v8358_v3  ;;  %v9688_v3 = vld [vmem:[#allocation11 + $0x6d4] sm:$0xf0]  ;;  %v8474_v8 = vor.u32 %v9683_v58, %v8471_v29  ;;  %v8346_v58 = vor.u32 %v9651_v5, %v8343_v50  ;;  %v8309_v29 = vld [vmem:[#allocation11 + $0x410] sm:$0xf]  ;;  %v9717_v2 = vld [vmem:[#allocation14 + $0x460] sm:$0xff] }
 0xc6a   : > { %4471 = vadd.xlane.f32.xlu0 %v4470_v52  ;;  %v8546_v52 = vor.u32 %v9700_v45, %v8543_v48  ;;  %v8478_v13 = vor.u32 %v9688_v3, %v8477_v63  ;;  %v9660_v45 = vld [vmem:[#allocation11 + $0x51c] sm:$0xf]  ;;  %v8350_v63 = vor.u32 %v9656_v56, %v8349_v55  ;;  %v9647_v3 = vld [vmem:[#allocation11 + $0x44c] sm:$0xf0]  ;;  %v9729_v5 = vld [vmem:[#allocation14 + $0x4c0] sm:$0xff] }
 0xc6b   : > { %4968 = vmatpush.bf16.msra.mxu3 %v8474_v8  ;;  %v8386_v54 = vor.u32 %v9660_v45, %v8383_v46  ;;  %v8310_v53 = vor.u32 %v9647_v3, %v8309_v29  ;;  %v9731_v45 = vld [vmem:[#allocation14 + $0x4d0] sm:$0xff]  ;;  %v9760_v50 = vld [vmem:[#allocation14 + $0x5b8] sm:$0xff]  ;;  %v9713_v55 = vld [vmem:[#allocation14 + $0x440] sm:$0xff] }
 0xc6c   : > { %4992 = vmatpush.bf16.msra.mxu1 %v8546_v52  ;;  %4981 = vmatpush.bf16.msrb.mxu0 %v8478_v13  ;;  %v8341_v52 = vld [vmem:[#allocation11 + $0x490] sm:$0xf]  ;;  %v8319_v13 = vld [vmem:[#allocation11 + $0x458] sm:$0xf0]  ;;  %v9758_v29 = vld [vmem:[#allocation14 + $0x5a8] sm:$0xff] }
 0xc6d   : > { %4907 = vmatpush.bf16.msra.mxu2 %v8326_v17  ;;  %v8482_v17 = vor.u32 %v9684_v9, %v8479_v10  ;;  %v8342_v61 = vor.u32 %v9655_v4, %v8341_v52  ;;  %v8317_v10 = vld [vmem:[#allocation11 + $0x418] sm:$0xf]  ;;  %v9707_v46 = vld [vmem:[#allocation14 + $0x410] sm:$0xff]  ;;  %v9706_v52 = vld [vmem:[#allocation14 + $0x408] sm:$0xff] }
 0xc6e   : > { %v8318_v18 = vor.u32 %v9648_v11, %v8317_v10  ;;  %v9721_v4 = vld [vmem:[#allocation14 + $0x480] sm:$0xff]  ;;  %v9744_v56 = vld [vmem:[#allocation14 + $0x538] sm:$0xff]  ;;  %v9742_v3 = vld [vmem:[#allocation14 + $0x528] sm:$0xff] }
 0xc6f   : > { %4969 = vmatpush.bf16.msra.mxu3 %v8442_v26  ;;  %v9749_v10 = vld [vmem:[#allocation14 + $0x560] sm:$0xff]  ;;  %v9756_v11 = vld [vmem:[#allocation14 + $0x598] sm:$0xff] }
 0xc70   : > { %4993 = vmatpush.bf16.msra.mxu1 %v8514_v59  ;;  %4982 = vmatpush.bf16.msrb.mxu0 %v8446_v27  ;;  %v8351_v59 = vld [vmem:[#allocation11 + $0x4d8] sm:$0xf0] }
 0xc71   : > { %4908 = vmatpush.bf16.msra.mxu2 %v8294_v32  ;;  %v8407_v32 = vld [vmem:[#allocation11 + $0x5d0] sm:$0xf0]  ;;  %v8354_v9 = vor.u32 %v9652_v57, %v8351_v59  ;;  %v9728_v27 = vld [vmem:[#allocation14 + $0x4b8] sm:$0xff] }
 0xc72   : > { %v8410_v19 = vor.u32 %v9667_v41, %v8407_v32  ;;  %v9712_v41 = vld [vmem:[#allocation14 + $0x438] sm:$0xff]  ;;  %v9759_v59 = vld [vmem:[#allocation14 + $0x5b0] sm:$0xff] }
 0xc73   : > { %v9720_v32 = vld [vmem:[#allocation14 + $0x478] sm:$0xff] }
 0xc74   : > { %4994 = vmatpush.bf16.msra.mxu1 %v8482_v17  ;;  %4970 = vmatpush.bf16.msra.mxu3 %v8410_v19  ;;  %v10031_v17 = vld [vmem:[%s11081_s12 + $0x1] ss:$0 sm:$0xff]  ;;  %v9752_v57 = vld [vmem:[#allocation14 + $0x578] sm:$0xff] }
 0xc75   : > { %4953 = vmatpush.bf16.msrb.mxu2 %v8534_v21  ;;  %v8418_v21 = vor.u32 %v9668_v37, %v8415_v38  ;;  %4983 = vmatpush.bf16.msrb.mxu0 %v8414_v42  ;;  %v9726_v37 = vld [vmem:[#allocation14 + $0x4a8] sm:$0xff]  ;;  %v9733_v42 = vld [vmem:[#allocation14 + $0x4e0] sm:$0xff] }
 0xc76   : > { %v9734_v38 = vld [vmem:[#allocation14 + $0x4e8] sm:$0xff] }
 0xc77   : > { %v9718_v19 = vld [vmem:[#allocation14 + $0x468] sm:$0xff] }
 0xc78   : > { %4995 = vmatpush.bf16.msra.mxu1 %v8450_v34  ;;  %4971 = vmatpush.bf16.msra.mxu3 %v8378_v49  ;;  %v9735_v34 = vld [vmem:[#allocation14 + $0x4f0] sm:$0xff]  ;;  %v9730_v49 = vld [vmem:[#allocation14 + $0x4c8] sm:$0xff] }
 0xc79   : > { %4954 = vmatpush.bf16.msrb.mxu2 %v8502_v1  ;;  %v8382_v1 = vor.u32 %v9664_v44, %v8381_v43  ;;  %v9708_v43 = vld [vmem:[#allocation14 + $0x418] sm:$0xff] }
 0xc7a   : > { %v9716_v44 = vld [vmem:[#allocation14 + $0x458] sm:$0xff] }
 0xc7b   : > { %4984 = vmatpush.bf16.msrb.mxu0 %v8382_v1  ;;  %v9714_v1 = vld [vmem:[#allocation14 + $0x448] sm:$0xff] }
 0xc7c   : > { %4996 = vmatpush.bf16.msra.mxu1 %v8418_v21  ;;  %4972 = vmatpush.bf16.msra.mxu3 %v8346_v58  ;;  %v9732_v21 = vld [vmem:[#allocation14 + $0x4d8] sm:$0xff]  ;;  %v9751_v58 = vld [vmem:[#allocation14 + $0x570] sm:$0xff] }
 0xc7d   : > { %4955 = vmatpush.bf16.msrb.mxu2 %v8470_v7  ;;  %v8311_v7 = vld [vmem:[#allocation11 + $0x450] sm:$0xf0] }
 0xc7f   : > { %4985 = vmatpush.bf16.msrb.mxu0 %v8350_v63  ;;  %v9766_v63 = vld [vmem:[#allocation14 + $0x5e8] sm:$0xff] }
 0xc80   : > { %4997 = vmatpush.bf16.msra.mxu1 %v8386_v54  ;;  %v9705_v54 = vld [vmem:[#allocation14 + $0x400] sm:$0xff] }
 0xc81   : > { %4956 = vmatpush.bf16.msrb.mxu2 %v8438_v25 }
 0xc83   : > { %4986 = vmatpush.bf16.msrb.mxu0 %v8318_v18  ;;  %v9762_v18 = vld [vmem:[#allocation14 + $0x5c8] sm:$0xff] }
 0xc84   : > { %4998 = vmatpush.bf16.msra.mxu1 %v8354_v9  ;;  %v9741_v9 = vld [vmem:[#allocation14 + $0x520] sm:$0xff] }
 0xc85   : > { %4957 = vmatpush.bf16.msrb.mxu2 %v8406_v39  ;;  %v9710_v39 = vld [vmem:[#allocation14 + $0x428] sm:$0xff] }
 0xc89   : > { %4958 = vmatpush.bf16.msrb.mxu2 %v8374_v36  ;;  %v9722_v36 = vld [vmem:[#allocation14 + $0x488] sm:$0xff] }
 0xc8d   : > { %4959 = vmatpush.bf16.msrb.mxu2 %v8342_v61  ;;  %v9743_v61 = vld [vmem:[#allocation14 + $0x530] sm:$0xff] }
 0xc91   : > { %4960 = vmatpush.bf16.msrb.mxu2 %v8310_v53  ;;  %v9740_v53 = vld [vmem:[#allocation14 + $0x518] sm:$0xff] }
 0xcdd   : > { %v4472_v6 = vpop.xlane.xlu0 %4471 }
 0xcde   : > { %v4473_v12 = vmul.f32 %v4472_v6, %v10700_v16  ;;  %v9643_v6 = vld [vmem:[#allocation11 + $0x414] sm:$0xf] }
 0xcdf   : > { %v8314_v15 = vor.u32 %v9643_v6, %v8311_v7  ;;  %v9750_v6 = vld [vmem:[#allocation14 + $0x568] sm:$0xff]  ;;  %v9757_v7 = vld [vmem:[#allocation14 + $0x5a0] sm:$0xff] }
 0xce0   : > { %v10965_v22 = vadd.f32 1e-05, %v4473_v12  ;;  %v9644_v12 = vld [vmem:[#allocation11 + $0x41c] sm:$0xf] }
 0xce1   : > { %v8322_v23 = vor.u32 %v9644_v12, %v8319_v13  ;;  %4973 = vmatpush.bf16.msra.mxu3 %v8314_v15  ;;  %v9764_v12 = vld [vmem:[#allocation14 + $0x5d8] sm:$0xff]  ;;  %v9755_v13 = vld [vmem:[#allocation14 + $0x590] sm:$0xff] }
 0xce2   : > { %10108 = vrsqrt.f32 %v10965_v22  ;;  %vm4481_vm13 = vweird.f32 %v10965_v22  ;;  %v9748_v15 = vld [vmem:[#allocation14 + $0x558] sm:$0xff] }
 0xce3   : > { %4999 = vmatpush.bf16.msra.mxu1 %v8322_v23  ;;  %v9747_v23 = vld [vmem:[#allocation14 + $0x550] sm:$0xff] }
 0xce8   : > { %v10109_v33 = vpop.eup %10108 }
 0xce9   : > { %v4476_v48 = vmul.f32 %v10109_v33, %v10965_v22  ;;  %vm4482_vm12 = vweird.f32 %v10109_v33 }
 0xcea   : > { %vm4483_vm14 = vmor %vm4481_vm13, %vm4482_vm12 }
 0xceb   : > { %v4477_v28 = vmul.f32 %v10109_v33, %v4476_v48  ;;  %v9715_v48 = vld [vmem:[#allocation14 + $0x450] sm:$0xff] }
 0xced   : > { %v4478_v60 = vmul.f32 0.5, %v4477_v28  ;;  %v9768_v28 = vld [vmem:[#allocation14 + $0x5f8] sm:$0xff] }
 0xcef   : > { %v4479_v8 = vsub.f32 1.5, %v4478_v60  ;;  %v9767_v60 = vld [vmem:[#allocation14 + $0x5f0] sm:$0xff] }
 0xcf1   : > { %v4480_v14 = vmul.f32 %v10109_v33, %v4479_v8  ;;  %v9765_v8 = vld [vmem:[#allocation14 + $0x5e0] sm:$0xff] }
 0xcf3   : > { %v4484_v20 = vsel %vm4483_vm14, %v10109_v33, %v4480_v14  ;;  %v9723_v33 = vld [vmem:[#allocation14 + $0x490] sm:$0xff] }
 0xcf4   : > { %v4485_v22 = vmul.f32 %v4484_v20, %v10960_v51  ;;  %v9727_v51 = vld [vmem:[#allocation14 + $0x4b0] sm:$0xff] }
 0xcf5   : > { %v9763_v14 = vld [vmem:[#allocation14 + $0x5d0] sm:$0xff] }
 0xcf6   : > { %v4489_v25 = vmul.f32 %v10031_v17, %v4485_v22  ;;  %v9754_v17 = vld [vmem:[#allocation14 + $0x588] sm:$0xff]  ;;  %v9739_v20 = vld [vmem:[#allocation14 + $0x510] sm:$0xff]  ;;  %v9761_v22 = vld [vmem:[#allocation14 + $0x5c0] sm:$0xff] }
 0xcf8   : > { %v10977_v26 = vadd.f32 %v10032_v24, %v4489_v25  ;;  %v9753_v24 = vld [vmem:[#allocation14 + $0x580] sm:$0xff]  ;;  %v9738_v25 = vld [vmem:[#allocation14 + $0x508] sm:$0xff] }
 0xcfa   : > { %v10981_v47 = vpack.c.bf16 %v10977_v26, %v10977_v26 }
 0xcfc   : > { %4909 = vmatmul.bf16.vlgmr.msra.gmra.mxu2 %v10981_v47  ;;  %4922 = vmatmul.bf16.vlgmr.msrb.gmra.mxu3 %v10981_v47 }
 0xcfd   : > { %4935 = vmatmul.bf16.vlgmr.msra.gmra.mxu0 %v10981_v47  ;;  %4948 = vmatmul.bf16.vlgmr.msrb.gmra.mxu1 %v10981_v47 }
 0xcfe   : > { %5560 = vmatpush.bf16.msra.mxu0 %v9728_v27  ;;  %5573 = vmatpush.bf16.msrb.mxu1 %v9736_v31  ;;  %v9746_v27 = vld [vmem:[#allocation14 + $0x548] sm:$0xff]  ;;  %v9737_v31 = vld [vmem:[#allocation14 + $0x500] sm:$0xff] }
 0xcff   : > { %5534 = vmatpush.bf16.msra.mxu2 %v9712_v41  ;;  %5547 = vmatpush.bf16.msrb.mxu3 %v9720_v32  ;;  %v9745_v41 = vld [vmem:[#allocation14 + $0x540] sm:$0xff]  ;;  %v10991_v32 = vld [vmem:[#allocation13 + $0x10] sm:$0xff] }
 0xd02   : > { %5561 = vmatpush.bf16.msra.mxu0 %v9727_v51  ;;  %5574 = vmatpush.bf16.msrb.mxu1 %v9735_v34  ;;  %v4567_v51 = vperm.slane %v10991_v32, 2  ;;  %v4568_v34 = vperm.slane %v10991_v32, 3 }
 0xd03   : > { %5535 = vmatpush.bf16.msra.mxu2 %v9711_v30  ;;  %5548 = vmatpush.bf16.msrb.mxu3 %v9719_v35 }
 0xd06   : > { %5562 = vmatpush.bf16.msra.mxu0 %v9726_v37  ;;  %5575 = vmatpush.bf16.msrb.mxu1 %v9734_v38  ;;  %v9037_v37 = vld [vmem:[#allocation11 + $0x7a8] sm:$0xf] }
 0xd07   : > { %5536 = vmatpush.bf16.msra.mxu2 %v9710_v39  ;;  %5549 = vmatpush.bf16.msrb.mxu3 %v9718_v19  ;;  %v9830_v19 = vld [vmem:[#allocation11 + $0x7e4] sm:$0xf0] }
 0xd0a   : > { %5563 = vmatpush.bf16.msra.mxu0 %v9725_v40  ;;  %5576 = vmatpush.bf16.msrb.mxu1 %v9733_v42  ;;  %v9826_v40 = vld [vmem:[#allocation11 + $0x7ac] sm:$0xf] }
 0xd0b   : > { %5537 = vmatpush.bf16.msra.mxu2 %v9709_v62  ;;  %5550 = vmatpush.bf16.msrb.mxu3 %v9717_v2  ;;  %v9039_v42 = vld [vmem:[#allocation11 + $0x7e8] sm:$0xf0]  ;;  %v4565_v62 = vperm.slane %v10991_v32, 0  ;;  %v4566_v2 = vperm.slane %v10991_v32, 1 }
 0xd0c   : > { %4961 = vmatmul.bf16.vlgmr.msrb.gmra.mxu2 %v10981_v47  ;;  %4974 = vmatmul.bf16.vlgmr.msra.gmra.mxu3 %v10981_v47 }
 0xd0d   : > { %4987 = vmatmul.bf16.vlgmr.msrb.gmra.mxu0 %v10981_v47  ;;  %5000 = vmatmul.bf16.vlgmr.msra.gmra.mxu1 %v10981_v47 }
 0xd0e   : > { %5564 = vmatpush.bf16.msra.mxu0 %v9724_v0  ;;  %5577 = vmatpush.bf16.msrb.mxu1 %v9732_v21 }
 0xd0f   : > { %5538 = vmatpush.bf16.msra.mxu2 %v9708_v43  ;;  %5551 = vmatpush.bf16.msrb.mxu3 %v9716_v44  ;;  %v9038_v43 = vor.u32 %v9830_v19, %v9037_v37  ;;  %v9042_v44 = vor.u32 %v9826_v40, %v9039_v42  ;;  %v8909_v40 = vld [vmem:[#allocation11 + $0x5a8] sm:$0xf] }
 0xd12   : > { %5565 = vmatpush.bf16.msra.mxu0 %v9723_v33  ;;  %5578 = vmatpush.bf16.msrb.mxu1 %v9731_v45  ;;  %v9005_v33 = vld [vmem:[#allocation11 + $0x728] sm:$0xf] }
 0xd13   : > { %5539 = vmatpush.bf16.msra.mxu2 %v9707_v46  ;;  %5552 = vmatpush.bf16.msrb.mxu3 %v9715_v48 }
 0xd16   : > { %5566 = vmatpush.bf16.msra.mxu0 %v9722_v36  ;;  %5579 = vmatpush.bf16.msrb.mxu1 %v9730_v49  ;;  %v9822_v49 = vld [vmem:[#allocation11 + $0x764] sm:$0xf0] }
 0xd17   : > { %5540 = vmatpush.bf16.msra.mxu2 %v9706_v52  ;;  %5553 = vmatpush.bf16.msrb.mxu3 %v9714_v1  ;;  %v9818_v52 = vld [vmem:[#allocation11 + $0x72c] sm:$0xf] }
 0xd18   : > { %v9007_v1 = vld [vmem:[#allocation11 + $0x768] sm:$0xf0] }
 0xd1a   : > { %5567 = vmatpush.bf16.msra.mxu0 %v9721_v4  ;;  %5580 = vmatpush.bf16.msrb.mxu1 %v9729_v5 }
 0xd1b   : > { %5541 = vmatpush.bf16.msra.mxu2 %v9705_v54  ;;  %5554 = vmatpush.bf16.msrb.mxu3 %v9713_v55  ;;  %v9825_v54 = vld [vmem:[#allocation11 + $0x7a4] sm:$0xf] }
 0xd1c   : > { %v9031_v55 = vld [vmem:[#allocation11 + $0x7e0] sm:$0xf0] }
 0xd1e   : > { %5612 = vmatpush.bf16.msrb.mxu0 %v9760_v50  ;;  %5625 = vmatpush.bf16.msra.mxu1 %v9768_v28  ;;  %v9029_v50 = vld [vmem:[#allocation11 + $0x7a0] sm:$0xf] }
 0xd1f   : > { %5586 = vmatpush.bf16.msrb.mxu2 %v9744_v56  ;;  %5599 = vmatpush.bf16.msra.mxu3 %v9752_v57  ;;  %v9829_v28 = vld [vmem:[#allocation11 + $0x7dc] sm:$0xf0] }
 0xd22   : > { %5613 = vmatpush.bf16.msrb.mxu0 %v9759_v59  ;;  %5626 = vmatpush.bf16.msra.mxu1 %v9767_v60 }
 0xd23   : > { %5587 = vmatpush.bf16.msrb.mxu2 %v9743_v61  ;;  %5600 = vmatpush.bf16.msra.mxu3 %v9751_v58  ;;  %v9006_v61 = vor.u32 %v9822_v49, %v9005_v33  ;;  %v9010_v58 = vor.u32 %v9818_v52, %v9007_v1  ;;  %v4569_v33 = vperm.slane %v10991_v32, 4  ;;  %v9801_v52 = vld [vmem:[#allocation11 + $0x624] sm:$0xf] }
 0xd24   : > { %v8935_v1 = vld [vmem:[#allocation11 + $0x660] sm:$0xf0] }
 0xd26   : > { %5614 = vmatpush.bf16.msrb.mxu0 %v9758_v29  ;;  %5627 = vmatpush.bf16.msra.mxu1 %v9766_v63  ;;  %v8973_v29 = vld [vmem:[#allocation11 + $0x6a8] sm:$0xf] }
 0xd27   : > { %5588 = vmatpush.bf16.msrb.mxu2 %v9742_v3  ;;  %5601 = vmatpush.bf16.msra.mxu3 %v9750_v6  ;;  %v9814_v63 = vld [vmem:[#allocation11 + $0x6e4] sm:$0xf0]  ;;  %v9810_v3 = vld [vmem:[#allocation11 + $0x6ac] sm:$0xf] }
 0xd28   : > { %v8975_v6 = vld [vmem:[#allocation11 + $0x6e8] sm:$0xf0] }
 0xd2a   : > { %5615 = vmatpush.bf16.msrb.mxu0 %v9757_v7  ;;  %5628 = vmatpush.bf16.msra.mxu1 %v9765_v8 }
 0xd2b   : > { %5589 = vmatpush.bf16.msrb.mxu2 %v9741_v9  ;;  %5602 = vmatpush.bf16.msra.mxu3 %v9749_v10  ;;  %v9030_v9 = vor.u32 %v9829_v28, %v9029_v50  ;;  %v9034_v10 = vor.u32 %v9825_v54, %v9031_v55  ;;  %v8877_v50 = vld [vmem:[#allocation11 + $0x528] sm:$0xf] }
 0xd2e   : > { %5616 = vmatpush.bf16.msrb.mxu0 %v9756_v11  ;;  %5629 = vmatpush.bf16.msra.mxu1 %v9764_v12  ;;  %v8997_v11 = vld [vmem:[#allocation11 + $0x720] sm:$0xf] }
 0xd2f   : > { %5590 = vmatpush.bf16.msrb.mxu2 %v9740_v53  ;;  %5603 = vmatpush.bf16.msra.mxu3 %v9748_v15  ;;  %v9821_v12 = vld [vmem:[#allocation11 + $0x75c] sm:$0xf0]  ;;  %v8974_v53 = vor.u32 %v9814_v63, %v8973_v29  ;;  %v8978_v15 = vor.u32 %v9810_v3, %v8975_v6  ;;  %v8938_v29 = vor.u32 %v9801_v52, %v8935_v1  ;;  %v9793_v6 = vld [vmem:[#allocation11 + $0x5a4] sm:$0xf]  ;;  %v9824_v52 = vld [vmem:[#allocation11 + $0x774] sm:$0xf0] }
 0xd30   : > { %v8901_v63 = vld [vmem:[#allocation11 + $0x5a0] sm:$0xf]  ;;  %v9820_v1 = vld [vmem:[#allocation11 + $0x73c] sm:$0xf] }
 0xd31   : > { %v9797_v3 = vld [vmem:[#allocation11 + $0x5dc] sm:$0xf0] }
 0xd32   : > { %5617 = vmatpush.bf16.msrb.mxu0 %v9755_v13  ;;  %5630 = vmatpush.bf16.msra.mxu1 %v9763_v14  ;;  %v9817_v13 = vld [vmem:[#allocation11 + $0x724] sm:$0xf] }
 0xd33   : > { %5591 = vmatpush.bf16.msrb.mxu2 %v9739_v20  ;;  %5604 = vmatpush.bf16.msra.mxu3 %v9747_v23  ;;  %v8999_v14 = vld [vmem:[#allocation11 + $0x760] sm:$0xf0]  ;;  %v8941_v20 = vld [vmem:[#allocation11 + $0x628] sm:$0xf] }
 0xd36   : > { %5618 = vmatpush.bf16.msrb.mxu0 %v9754_v17  ;;  %5631 = vmatpush.bf16.msra.mxu1 %v9762_v18  ;;  %v4571_v17 = vperm.slane %v10991_v32, 6  ;;  %v4572_v18 = vperm.slane %v10991_v32, 7 }
 0xd37   : > { %5592 = vmatpush.bf16.msrb.mxu2 %v9738_v25  ;;  %5605 = vmatpush.bf16.msra.mxu3 %v9746_v27  ;;  %v9802_v25 = vld [vmem:[#allocation11 + $0x62c] sm:$0xf] }
 0xd38   : > { %v8943_v27 = vld [vmem:[#allocation11 + $0x668] sm:$0xf0] }
 0xd39   : > { %v8946_v19 = vor.u32 %v9802_v25, %v8943_v27  ;;  %v9789_v25 = vld [vmem:[#allocation11 + $0x55c] sm:$0xf0]  ;;  %v9785_v27 = vld [vmem:[#allocation11 + $0x524] sm:$0xf] }
 0xd3a   : > { %5619 = vmatpush.bf16.msrb.mxu0 %v9753_v24  ;;  %5632 = vmatpush.bf16.msra.mxu1 %v9761_v22  ;;  %v9806_v22 = vld [vmem:[#allocation11 + $0x664] sm:$0xf0] }
 0xd3b   : > { %5593 = vmatpush.bf16.msrb.mxu2 %v9737_v31  ;;  %5606 = vmatpush.bf16.msra.mxu3 %v9745_v41  ;;  %v8998_v31 = vor.u32 %v9821_v12, %v8997_v11  ;;  %v9002_v41 = vor.u32 %v9817_v13, %v8999_v14  ;;  %v8845_v14 = vld [vmem:[#allocation11 + $0x4a8] sm:$0xf] }
 0xd7a   : > { %v4936_v30 = vpop.f32.mrf.mxu0  ;;  %v4949_v35 = vpop.f32.mrf.mxu1 }
 0xd7b   : > { %v4937_v38 = vadd.f32 %v4936_v30, %v4567_v51  ;;  %v4950_v39 = vadd.f32 %v4949_v35, %v4568_v34  ;;  %v8965_v51 = vld [vmem:[#allocation11 + $0x6a0] sm:$0xf]  ;;  %v9809_v30 = vld [vmem:[#allocation11 + $0x6a4] sm:$0xf] }
 0xd7c   : > { %v9813_v34 = vld [vmem:[#allocation11 + $0x6dc] sm:$0xf0]  ;;  %v8967_v35 = vld [vmem:[#allocation11 + $0x6e0] sm:$0xf0] }
 0xd7d   : > { %v5007_v0 = vmax.f32 %v4937_v38, 0.0  ;;  %v5008_v21 = vmax.f32 %v4950_v39, 0.0  ;;  %v8942_v39 = vor.u32 %v9806_v22, %v8941_v20  ;;  %v8869_v22 = vld [vmem:[#allocation11 + $0x520] sm:$0xf] }
 0xd7f   : > { %v5015_v45 = vpack.c.bf16 %v5007_v0, %v5007_v0  ;;  %v5016_v46 = vpack.c.bf16 %v5008_v21, %v5008_v21  ;;  %v4910_v48 = vpop.f32.mrf.mxu2  ;;  %v4923_v36 = vpop.f32.mrf.mxu3  ;;  %v9794_v0 = vld [vmem:[#allocation11 + $0x5ac] sm:$0xf] }
 0xd80   : > { %v4911_v4 = vadd.f32 %v4910_v48, %v4565_v62  ;;  %v4924_v5 = vadd.f32 %v4923_v36, %v4566_v2  ;;  %v9798_v2 = vld [vmem:[#allocation11 + $0x5e4] sm:$0xf0]  ;;  %v8911_v21 = vld [vmem:[#allocation11 + $0x5e8] sm:$0xf0]  ;;  %v9805_v48 = vld [vmem:[#allocation11 + $0x65c] sm:$0xf0] }
 0xd81   : > { %5568 = vmatmul.bf16.vlgmr.msra.gmra.mxu0 %v5015_v45  ;;  %5581 = vmatmul.bf16.vlgmr.msrb.gmra.mxu1 %v5016_v46  ;;  %v4570_v45 = vperm.slane %v10991_v32, 5  ;;  %v8933_v46 = vld [vmem:[#allocation11 + $0x620] sm:$0xf] }
 0xd82   : > { %v5005_v56 = vmax.f32 %v4911_v4, 0.0  ;;  %v5006_v57 = vmax.f32 %v4924_v5, 0.0  ;;  %6070 = vmatpush.bf16.msra.mxu0 %v9038_v43  ;;  %6083 = vmatpush.bf16.msrb.mxu1 %v9042_v44  ;;  %v4938_v59 = vpop.f32.mrf.mxu0  ;;  %v4951_v60 = vpop.f32.mrf.mxu1  ;;  %v8966_v43 = vor.u32 %v9813_v34, %v8965_v51  ;;  %v8970_v44 = vor.u32 %v9809_v30, %v8967_v35  ;;  %v8813_v34 = vld [vmem:[#allocation11 + $0x428] sm:$0xf]  ;;  %v9770_v35 = vld [vmem:[#allocation11 + $0x42c] sm:$0xf] }
 0xd83   : > { %v8910_v4 = vor.u32 %v9798_v2, %v8909_v40  ;;  %v8914_v5 = vor.u32 %v9794_v0, %v8911_v21  ;;  %v9790_v59 = vld [vmem:[#allocation11 + $0x564] sm:$0xf0]  ;;  %v9786_v60 = vld [vmem:[#allocation11 + $0x52c] sm:$0xf]  ;;  %v9832_v40 = vld [vmem:[#allocation11 + $0x7f4] sm:$0xf0] }
 0xd84   : > { %v5013_v7 = vpack.c.bf16 %v5005_v56, %v5005_v56  ;;  %v5014_v8 = vpack.c.bf16 %v5006_v57, %v5006_v57  ;;  %v8934_v57 = vor.u32 %v9805_v48, %v8933_v46  ;;  %v8878_v12 = vor.u32 %v9790_v59, %v8877_v50  ;;  %v9774_v30 = vld [vmem:[#allocation11 + $0x464] sm:$0xf0]  ;;  %v9828_v2 = vld [vmem:[#allocation11 + $0x7bc] sm:$0xf]  ;;  %v8837_v21 = vld [vmem:[#allocation11 + $0x4a0] sm:$0xf] }
 0xd85   : > { %v9055_v0 = vld [vmem:[#allocation11 + $0x7f8] sm:$0xf0]  ;;  %v9831_v59 = vld [vmem:[#allocation11 + $0x7ec] sm:$0xf0] }
 0xd86   : > { %6071 = vmatpush.bf16.msra.mxu0 %v9006_v61  ;;  %6084 = vmatpush.bf16.msrb.mxu1 %v9010_v58  ;;  %v8879_v61 = vld [vmem:[#allocation11 + $0x568] sm:$0xf0]  ;;  %v9023_v50 = vld [vmem:[#allocation11 + $0x778] sm:$0xf0] }
 0xd87   : > { %5542 = vmatmul.bf16.vlgmr.msra.gmra.mxu2 %v5013_v7  ;;  %5555 = vmatmul.bf16.vlgmr.msrb.gmra.mxu3 %v5014_v8  ;;  %v4912_v23 = vpop.f32.mrf.mxu2  ;;  %v4925_v24 = vpop.f32.mrf.mxu3  ;;  %v8903_v7 = vld [vmem:[#allocation11 + $0x5e0] sm:$0xf0]  ;;  %v8882_v13 = vor.u32 %v9786_v60, %v8879_v61  ;;  %v9827_v60 = vld [vmem:[#allocation11 + $0x7b4] sm:$0xf] }
 0xd88   : > { %6044 = vmatpush.bf16.msra.mxu2 %v9030_v9  ;;  %6057 = vmatpush.bf16.msrb.mxu3 %v9034_v10  ;;  %v8906_v24 = vor.u32 %v9793_v6, %v8903_v7  ;;  %v9047_v61 = vld [vmem:[#allocation11 + $0x7f0] sm:$0xf0]  ;;  %v9816_v6 = vld [vmem:[#allocation11 + $0x6f4] sm:$0xf0]  ;;  %v9812_v7 = vld [vmem:[#allocation11 + $0x6bc] sm:$0xf] }
 0xd8a   : > { %6072 = vmatpush.bf16.msra.mxu0 %v8974_v53  ;;  %6085 = vmatpush.bf16.msrb.mxu1 %v8978_v15  ;;  %v4988_v37 = vpop.f32.mrf.mxu0  ;;  %v5001_v38 = vpop.f32.mrf.mxu1  ;;  %v8902_v53 = vor.u32 %v9797_v3, %v8901_v63  ;;  %v9782_v15 = vld [vmem:[#allocation11 + $0x4e4] sm:$0xf0] }
 0xd8b   : > { %v4989_v42 = vadd.f32 %v4988_v37, %v4571_v17  ;;  %v5002_v62 = vadd.f32 %v5001_v38, %v4572_v18  ;;  %v9778_v17 = vld [vmem:[#allocation11 + $0x4ac] sm:$0xf] }
 0xd8c   : > { %6045 = vmatpush.bf16.msra.mxu2 %v8998_v31  ;;  %6058 = vmatpush.bf16.msrb.mxu3 %v9002_v41  ;;  %v8847_v18 = vld [vmem:[#allocation11 + $0x4e8] sm:$0xf0]  ;;  %v8871_v31 = vld [vmem:[#allocation11 + $0x560] sm:$0xf0]  ;;  %v8846_v41 = vor.u32 %v9782_v15, %v8845_v14  ;;  %v9015_v14 = vld [vmem:[#allocation11 + $0x770] sm:$0xf0] }
 0xd8d   : > { %v5011_v36 = vmax.f32 %v4989_v42, 0.0  ;;  %v5012_v49 = vmax.f32 %v5002_v62, 0.0  ;;  %v8850_v51 = vor.u32 %v9778_v17, %v8847_v18  ;;  %v8870_v42 = vor.u32 %v9789_v25, %v8869_v22  ;;  %v8957_v17 = vld [vmem:[#allocation11 + $0x638] sm:$0xf]  ;;  %v8981_v25 = vld [vmem:[#allocation11 + $0x6b0] sm:$0xf] }
 0xd8e   : > { %6073 = vmatpush.bf16.msra.mxu0 %v8942_v39  ;;  %6086 = vmatpush.bf16.msrb.mxu1 %v8946_v19  ;;  %v8815_v39 = vld [vmem:[#allocation11 + $0x468] sm:$0xf0]  ;;  %v9053_v19 = vld [vmem:[#allocation11 + $0x7b8] sm:$0xf]  ;;  %v8874_v62 = vor.u32 %v9785_v27, %v8871_v31  ;;  %v9815_v27 = vld [vmem:[#allocation11 + $0x6ec] sm:$0xf0] }
 0xd8f   : > { %v5019_v28 = vpack.c.bf16 %v5011_v36, %v5011_v36  ;;  %v5020_v54 = vpack.c.bf16 %v5012_v49, %v5012_v49  ;;  %v4962_v55 = vpop.f32.mrf.mxu2  ;;  %v4975_v56 = vpop.f32.mrf.mxu3  ;;  %v8818_v46 = vor.u32 %v9770_v35, %v8815_v39  ;;  %v9054_v48 = vor.u32 %v9832_v40, %v9053_v19  ;;  %v9021_v49 = vld [vmem:[#allocation11 + $0x738] sm:$0xf]  ;;  %v9811_v31 = vld [vmem:[#allocation11 + $0x6b4] sm:$0xf]  ;;  %v8949_v40 = vld [vmem:[#allocation11 + $0x630] sm:$0xf] }
 0xd90   : > { %6046 = vmatpush.bf16.msra.mxu2 %v8966_v43  ;;  %6059 = vmatpush.bf16.msrb.mxu3 %v8970_v44  ;;  %v4963_v32 = vadd.f32 %v4962_v55, %v4569_v33  ;;  %v4976_v58 = vadd.f32 %v4975_v56, %v4570_v45  ;;  %v9781_v43 = vld [vmem:[#allocation11 + $0x4dc] sm:$0xf0]  ;;  %v9777_v44 = vld [vmem:[#allocation11 + $0x4a4] sm:$0xf]  ;;  %v8814_v45 = vor.u32 %v9774_v30, %v8813_v34  ;;  %v9808_v18 = vld [vmem:[#allocation11 + $0x674] sm:$0xf0] }
 0xd91   : > { %5620 = vmatmul.bf16.vlgmr.msrb.gmra.mxu0 %v5019_v28  ;;  %5633 = vmatmul.bf16.vlgmr.msra.gmra.mxu1 %v5020_v54  ;;  %v8839_v33 = vld [vmem:[#allocation11 + $0x4e0] sm:$0xf0]  ;;  %v9058_v36 = vor.u32 %v9828_v2, %v9055_v0  ;;  %v8805_v28 = vld [vmem:[#allocation11 + $0x420] sm:$0xf]  ;;  %v8925_v30 = vld [vmem:[#allocation11 + $0x5b8] sm:$0xf]  ;;  %v8982_v39 = vor.u32 %v9815_v27, %v8981_v25 }
 0xd92   : > { %v5009_v8 = vmax.f32 %v4963_v32, 0.0  ;;  %v5010_v9 = vmax.f32 %v4976_v58, 0.0  ;;  %6074 = vmatpush.bf16.msra.mxu0 %v8910_v4  ;;  %6087 = vmatpush.bf16.msrb.mxu1 %v8914_v5  ;;  %v4990_v10 = vpop.f32.mrf.mxu0  ;;  %v5003_v11 = vpop.f32.mrf.mxu1  ;;  %v8838_v4 = vor.u32 %v9781_v43, %v8837_v21  ;;  %v8842_v5 = vor.u32 %v9777_v44, %v8839_v33  ;;  %v9773_v54 = vld [vmem:[#allocation11 + $0x45c] sm:$0xf0]  ;;  %v9769_v55 = vld [vmem:[#allocation11 + $0x424] sm:$0xf] }
 0xd93   : > { %v8807_v56 = vld [vmem:[#allocation11 + $0x460] sm:$0xf0]  ;;  %v9022_v32 = vor.u32 %v9824_v52, %v9021_v49  ;;  %v9026_v58 = vor.u32 %v9820_v1, %v9023_v50  ;;  %v8806_v63 = vor.u32 %v9773_v54, %v8805_v28  ;;  %v9050_v10 = vor.u32 %v9827_v60, %v9047_v61  ;;  %v9013_v11 = vld [vmem:[#allocation11 + $0x730] sm:$0xf]  ;;  %v9800_v35 = vld [vmem:[#allocation11 + $0x5f4] sm:$0xf0] }
 0xd94   : > { %v5017_v20 = vpack.c.bf16 %v5009_v8, %v5009_v8  ;;  %v5018_v23 = vpack.c.bf16 %v5010_v9, %v5010_v9  ;;  %6047 = vmatpush.bf16.msra.mxu2 %v8934_v57  ;;  %6060 = vmatpush.bf16.msrb.mxu3 %v8938_v29  ;;  %v9045_v57 = vld [vmem:[#allocation11 + $0x7b0] sm:$0xf]  ;;  %v8989_v29 = vld [vmem:[#allocation11 + $0x6b8] sm:$0xf]  ;;  %v8810_v3 = vor.u32 %v9769_v55, %v8807_v56  ;;  %v8991_v8 = vld [vmem:[#allocation11 + $0x6f8] sm:$0xf0] }
 0xd95   : > { %v9046_v9 = vor.u32 %v9831_v59, %v9045_v57  ;;  %v8994_v15 = vor.u32 %v9812_v7, %v8991_v8  ;;  %v8951_v2 = vld [vmem:[#allocation11 + $0x670] sm:$0xf0]  ;;  %v8926_v0 = vor.u32 %v9800_v35, %v8925_v30  ;;  %v8893_v43 = vld [vmem:[#allocation11 + $0x538] sm:$0xf]  ;;  %v9788_v33 = vld [vmem:[#allocation11 + $0x53c] sm:$0xf] }
 0xd96   : > { %6075 = vmatpush.bf16.msra.mxu0 %v8878_v12  ;;  %6088 = vmatpush.bf16.msrb.mxu1 %v8882_v13  ;;  %v9823_v12 = vld [vmem:[#allocation11 + $0x76c] sm:$0xf0]  ;;  %v9819_v13 = vld [vmem:[#allocation11 + $0x734] sm:$0xf]  ;;  %v9792_v44 = vld [vmem:[#allocation11 + $0x574] sm:$0xf0] }
 0xd97   : > { %5594 = vmatmul.bf16.vlgmr.msrb.gmra.mxu2 %v5017_v20  ;;  %5607 = vmatmul.bf16.vlgmr.msra.gmra.mxu3 %v5018_v23  ;;  %v4964_v37 = vpop.f32.mrf.mxu2  ;;  %v4977_v38 = vpop.f32.mrf.mxu3  ;;  %v9804_v20 = vld [vmem:[#allocation11 + $0x63c] sm:$0xf]  ;;  %v9018_v22 = vor.u32 %v9819_v13, %v9015_v14  ;;  %v9799_v49 = vld [vmem:[#allocation11 + $0x5ec] sm:$0xf0]  ;;  %v9795_v52 = vld [vmem:[#allocation11 + $0x5b4] sm:$0xf] }
 0xd98   : > { %6048 = vmatpush.bf16.msra.mxu2 %v8902_v53  ;;  %6061 = vmatpush.bf16.msrb.mxu3 %v8906_v24  ;;  %v8990_v53 = vor.u32 %v9816_v6, %v8989_v29  ;;  %v8959_v23 = vld [vmem:[#allocation11 + $0x678] sm:$0xf0]  ;;  %v9014_v24 = vor.u32 %v9823_v12, %v9013_v11  ;;  %v8919_v1 = vld [vmem:[#allocation11 + $0x5f0] sm:$0xf0]  ;;  %v8861_v50 = vld [vmem:[#allocation11 + $0x4b8] sm:$0xf] }
 0xd99   : > { %v8962_v34 = vor.u32 %v9804_v20, %v8959_v23  ;;  %v9796_v37 = vld [vmem:[#allocation11 + $0x5bc] sm:$0xf]  ;;  %v9784_v28 = vld [vmem:[#allocation11 + $0x4f4] sm:$0xf0]  ;;  %v8922_v57 = vor.u32 %v9795_v52, %v8919_v1  ;;  %v8885_v59 = vld [vmem:[#allocation11 + $0x530] sm:$0xf] }
 0xd9a   : > { %6076 = vmatpush.bf16.msra.mxu0 %v8846_v41  ;;  %6089 = vmatpush.bf16.msrb.mxu1 %v8850_v51  ;;  %v8983_v41 = vld [vmem:[#allocation11 + $0x6f0] sm:$0xf0]  ;;  %v8958_v51 = vor.u32 %v9808_v18, %v8957_v17  ;;  %v8927_v38 = vld [vmem:[#allocation11 + $0x5f8] sm:$0xf0]  ;;  %v9791_v60 = vld [vmem:[#allocation11 + $0x56c] sm:$0xf0] }
 0xd9b   : > { %v8986_v19 = vor.u32 %v9811_v31, %v8983_v41  ;;  %v8930_v21 = vor.u32 %v9796_v37, %v8927_v38  ;;  %v9780_v54 = vld [vmem:[#allocation11 + $0x4bc] sm:$0xf]  ;;  %v9787_v61 = vld [vmem:[#allocation11 + $0x534] sm:$0xf]  ;;  %v8886_v8 = vor.u32 %v9791_v60, %v8885_v59  ;;  %v9783_v11 = vld [vmem:[#allocation11 + $0x4ec] sm:$0xf0] }
 0xd9c   : > { %6049 = vmatpush.bf16.msra.mxu2 %v8870_v42  ;;  %6062 = vmatpush.bf16.msrb.mxu3 %v8874_v62  ;;  %v9807_v42 = vld [vmem:[#allocation11 + $0x66c] sm:$0xf0]  ;;  %v9803_v62 = vld [vmem:[#allocation11 + $0x634] sm:$0xf]  ;;  %v8863_v55 = vld [vmem:[#allocation11 + $0x4f8] sm:$0xf0] }
 0xd9d   : > { %v8866_v29 = vor.u32 %v9780_v54, %v8863_v55  ;;  %v9772_v6 = vld [vmem:[#allocation11 + $0x43c] sm:$0xf]  ;;  %v9779_v12 = vld [vmem:[#allocation11 + $0x4b4] sm:$0xf]  ;;  %v8821_v18 = vld [vmem:[#allocation11 + $0x430] sm:$0xf] }
 0xd9e   : > { %6077 = vmatpush.bf16.msra.mxu0 %v8814_v45  ;;  %6090 = vmatpush.bf16.msrb.mxu1 %v8818_v46  ;;  %v8895_v45 = vld [vmem:[#allocation11 + $0x578] sm:$0xf0]  ;;  %v8950_v46 = vor.u32 %v9807_v42, %v8949_v40  ;;  %v8855_v13 = vld [vmem:[#allocation11 + $0x4f0] sm:$0xf0]  ;;  %v9775_v20 = vld [vmem:[#allocation11 + $0x46c] sm:$0xf0] }
 0xd9f   : > { %v8831_v7 = vld [vmem:[#allocation11 + $0x478] sm:$0xf0]  ;;  %v8858_v17 = vor.u32 %v9779_v12, %v8855_v13  ;;  %v9771_v23 = vld [vmem:[#allocation11 + $0x434] sm:$0xf]  ;;  %v9862_v30 = vld [vmem:[#allocation14 + $0x6e8] sm:$0xff] }
 0xda0   : > { %6050 = vmatpush.bf16.msra.mxu2 %v8838_v4  ;;  %6063 = vmatpush.bf16.msrb.mxu3 %v8842_v5  ;;  %v8894_v4 = vor.u32 %v9792_v44, %v8893_v43  ;;  %v8898_v5 = vor.u32 %v9788_v33, %v8895_v45  ;;  %v9856_v27 = vld [vmem:[#allocation14 + $0x6b8] sm:$0xff]  ;;  %v9855_v41 = vld [vmem:[#allocation14 + $0x6b0] sm:$0xff]  ;;  %v9853_v38 = vld [vmem:[#allocation14 + $0x6a0] sm:$0xff] }
 0xda1   : > { %6078 = vmatmul.bf16.vlgmr.msra.gmra.mxu0 %v10981_v47  ;;  %6091 = vmatmul.bf16.vlgmr.msrb.gmra.mxu1 %v10981_v47  ;;  %v9864_v31 = vld [vmem:[#allocation14 + $0x6f8] sm:$0xff]  ;;  %v9837_v33 = vld [vmem:[#allocation14 + $0x620] sm:$0xff]  ;;  %v9835_v54 = vld [vmem:[#allocation14 + $0x610] sm:$0xff] }
 0xda2   : > { %6122 = vmatpush.bf16.msrb.mxu0 %v9054_v48  ;;  %6135 = vmatpush.bf16.msra.mxu1 %v9058_v36  ;;  %v8954_v48 = vor.u32 %v9803_v62, %v8951_v2  ;;  %v8917_v36 = vld [vmem:[#allocation11 + $0x5b0] sm:$0xf]  ;;  %v9840_v35 = vld [vmem:[#allocation14 + $0x638] sm:$0xff]  ;;  %v9838_v62 = vld [vmem:[#allocation14 + $0x628] sm:$0xff] }
 0xda3   : > { %v8918_v56 = vor.u32 %v9799_v49, %v8917_v36  ;;  %v9848_v37 = vld [vmem:[#allocation14 + $0x678] sm:$0xff]  ;;  %v9846_v2 = vld [vmem:[#allocation14 + $0x668] sm:$0xff]  ;;  %v9845_v45 = vld [vmem:[#allocation14 + $0x660] sm:$0xff] }
 0xda4   : > { %6051 = vmatpush.bf16.msra.mxu2 %v8806_v63  ;;  %6064 = vmatpush.bf16.msrb.mxu3 %v8810_v3  ;;  %v8829_v63 = vld [vmem:[#allocation11 + $0x438] sm:$0xf]  ;;  %v9849_v52 = vld [vmem:[#allocation14 + $0x680] sm:$0xff]  ;;  %v9843_v55 = vld [vmem:[#allocation14 + $0x650] sm:$0xff] }
 0xda5   : > { %v9776_v3 = vld [vmem:[#allocation11 + $0x474] sm:$0xf0]  ;;  %v9857_v1 = vld [vmem:[#allocation14 + $0x6c0] sm:$0xff] }
 0xda6   : > { %6123 = vmatpush.bf16.msrb.mxu0 %v9022_v32  ;;  %6136 = vmatpush.bf16.msra.mxu1 %v9026_v58  ;;  %v8887_v32 = vld [vmem:[#allocation11 + $0x570] sm:$0xf0]  ;;  %v8862_v58 = vor.u32 %v9784_v28, %v8861_v50  ;;  %v8830_v14 = vor.u32 %v9776_v3, %v8829_v63  ;;  %v9852_v40 = vld [vmem:[#allocation14 + $0x698] sm:$0xff] }
 0xda7   : > { %6052 = vmatmul.bf16.vlgmr.msra.gmra.mxu2 %v10981_v47  ;;  %6065 = vmatmul.bf16.vlgmr.msrb.gmra.mxu3 %v10981_v47  ;;  %v9860_v42 = vld [vmem:[#allocation14 + $0x6d8] sm:$0xff] }
 0xda8   : > { %6096 = vmatpush.bf16.msrb.mxu2 %v9046_v9  ;;  %6109 = vmatpush.bf16.msra.mxu3 %v9050_v10  ;;  %v8890_v9 = vor.u32 %v9787_v61, %v8887_v32  ;;  %v8853_v10 = vld [vmem:[#allocation11 + $0x4b0] sm:$0xf]  ;;  %v9836_v36 = vld [vmem:[#allocation14 + $0x618] sm:$0xff]  ;;  %v9834_v32 = vld [vmem:[#allocation14 + $0x608] sm:$0xff] }
 0xda9   : > { %v9844_v49 = vld [vmem:[#allocation14 + $0x658] sm:$0xff] }
 0xdaa   : > { %6124 = vmatpush.bf16.msrb.mxu0 %v8990_v53  ;;  %6137 = vmatpush.bf16.msra.mxu1 %v8994_v15  ;;  %v8834_v53 = vor.u32 %v9772_v6, %v8831_v7  ;;  %v8854_v15 = vor.u32 %v9783_v11, %v8853_v10  ;;  %v9886_v7 = vld [vmem:[#allocation14 + $0x7a8] sm:$0xff]  ;;  %v9841_v10 = vld [vmem:[#allocation14 + $0x640] sm:$0xff]  ;;  %v9872_v11 = vld [vmem:[#allocation14 + $0x738] sm:$0xff] }
 0xdab   : > { %v9880_v12 = vld [vmem:[#allocation14 + $0x778] sm:$0xff] }
 0xdac   : > { %6097 = vmatpush.bf16.msrb.mxu2 %v9014_v24  ;;  %6110 = vmatpush.bf16.msra.mxu3 %v9018_v22  ;;  %v8823_v24 = vld [vmem:[#allocation11 + $0x470] sm:$0xf0]  ;;  %v8822_v22 = vor.u32 %v9775_v20, %v8821_v18 }
 0xdad   : > { %v8826_v25 = vor.u32 %v9771_v23, %v8823_v24  ;;  %v9879_v18 = vld [vmem:[#allocation14 + $0x770] sm:$0xff]  ;;  %v9884_v24 = vld [vmem:[#allocation14 + $0x798] sm:$0xff] }
 0xdae   : > { %6125 = vmatpush.bf16.msrb.mxu0 %v8958_v51  ;;  %6138 = vmatpush.bf16.msra.mxu1 %v8962_v34  ;;  %v9863_v51 = vld [vmem:[#allocation14 + $0x6f0] sm:$0xff]  ;;  %v9854_v34 = vld [vmem:[#allocation14 + $0x6a8] sm:$0xff] }
 0xdb0   : > { %6098 = vmatpush.bf16.msrb.mxu2 %v8982_v39  ;;  %6111 = vmatpush.bf16.msra.mxu3 %v8986_v19  ;;  %v9861_v39 = vld [vmem:[#allocation14 + $0x6e0] sm:$0xff]  ;;  %v9839_v19 = vld [vmem:[#allocation14 + $0x630] sm:$0xff] }
 0xdb2   : > { %6126 = vmatpush.bf16.msrb.mxu0 %v8926_v0  ;;  %6139 = vmatpush.bf16.msra.mxu1 %v8930_v21  ;;  %v9851_v0 = vld [vmem:[#allocation14 + $0x690] sm:$0xff] }
 0xdb3   : > { %v9859_v21 = vld [vmem:[#allocation14 + $0x6d0] sm:$0xff] }
 0xdb4   : > { %6099 = vmatpush.bf16.msrb.mxu2 %v8950_v46  ;;  %6112 = vmatpush.bf16.msra.mxu3 %v8954_v48  ;;  %v9850_v46 = vld [vmem:[#allocation14 + $0x688] sm:$0xff] }
 0xdb5   : > { %v9858_v48 = vld [vmem:[#allocation14 + $0x6c8] sm:$0xff] }
 0xdb6   : > { %6127 = vmatpush.bf16.msrb.mxu0 %v8894_v4  ;;  %6140 = vmatpush.bf16.msra.mxu1 %v8898_v5  ;;  %v9888_v4 = vld [vmem:[#allocation14 + $0x7b8] sm:$0xff] }
 0xdb7   : > { %v9896_v5 = vld [vmem:[#allocation14 + $0x7f8] sm:$0xff] }
 0xdb8   : > { %6100 = vmatpush.bf16.msrb.mxu2 %v8918_v56  ;;  %6113 = vmatpush.bf16.msra.mxu3 %v8922_v57  ;;  %v9887_v56 = vld [vmem:[#allocation14 + $0x7b0] sm:$0xff] }
 0xdb9   : > { %v9895_v57 = vld [vmem:[#allocation14 + $0x7f0] sm:$0xff] }
 0xdba   : > { %6128 = vmatpush.bf16.msrb.mxu0 %v8862_v58  ;;  %6141 = vmatpush.bf16.msra.mxu1 %v8866_v29  ;;  %v9842_v58 = vld [vmem:[#allocation14 + $0x648] sm:$0xff] }
 0xdbc   : > { %6101 = vmatpush.bf16.msrb.mxu2 %v8886_v8  ;;  %6114 = vmatpush.bf16.msra.mxu3 %v8890_v9  ;;  %v9894_v8 = vld [vmem:[#allocation14 + $0x7e8] sm:$0xff]  ;;  %v9833_v9 = vld [vmem:[#allocation14 + $0x600] sm:$0xff] }
 0xdbe   : > { %6129 = vmatpush.bf16.msrb.mxu0 %v8830_v14  ;;  %6142 = vmatpush.bf16.msra.mxu1 %v8834_v53  ;;  %v9885_v53 = vld [vmem:[#allocation14 + $0x7a0] sm:$0xff] }
 0xdc0   : > { %6102 = vmatpush.bf16.msrb.mxu2 %v8854_v15  ;;  %6115 = vmatpush.bf16.msra.mxu3 %v8858_v17  ;;  %v9893_v15 = vld [vmem:[#allocation14 + $0x7e0] sm:$0xff]  ;;  %v9871_v17 = vld [vmem:[#allocation14 + $0x730] sm:$0xff] }
 0xdc1   : > { %6130 = vmatmul.bf16.vlgmr.msrb.gmra.mxu0 %v10981_v47  ;;  %6143 = vmatmul.bf16.vlgmr.msra.gmra.mxu1 %v10981_v47 }
 0xdc2   : > { %6702 = vmatpush.bf16.msra.mxu0 %v9856_v27  ;;  %6715 = vmatpush.bf16.msrb.mxu1 %v9864_v31  ;;  %v9870_v27 = vld [vmem:[#allocation14 + $0x728] sm:$0xff] }
 0xdc3   : > { %v9878_v31 = vld [vmem:[#allocation14 + $0x768] sm:$0xff] }
 0xdc4   : > { %6103 = vmatpush.bf16.msrb.mxu2 %v8822_v22  ;;  %6116 = vmatpush.bf16.msra.mxu3 %v8826_v25  ;;  %v9892_v22 = vld [vmem:[#allocation14 + $0x7d8] sm:$0xff] }
 0xdc5   : > { %v11009_v25 = vld [vmem:[#allocation13 + $0x18] sm:$0xff] }
 0xdc6   : > { %6703 = vmatpush.bf16.msra.mxu0 %v9855_v41  ;;  %6716 = vmatpush.bf16.msrb.mxu1 %v9863_v51 }
 0xdc7   : > { %6104 = vmatmul.bf16.vlgmr.msrb.gmra.mxu2 %v10981_v47  ;;  %6117 = vmatmul.bf16.vlgmr.msra.gmra.mxu3 %v10981_v47  ;;  %v9847_v47 = vld [vmem:[#allocation14 + $0x670] sm:$0xff] }
 0xdc8   : > { %6676 = vmatpush.bf16.msra.mxu2 %v9840_v35  ;;  %6689 = vmatpush.bf16.msrb.mxu3 %v9848_v37  ;;  %v5710_v37 = vperm.slane %v11009_v25, 2 }
 0xdca   : > { %6704 = vmatpush.bf16.msra.mxu0 %v9854_v34  ;;  %6717 = vmatpush.bf16.msrb.mxu1 %v9862_v30  ;;  %v9883_v34 = vld [vmem:[#allocation14 + $0x790] sm:$0xff] }
 0xdcb   : > { %v9891_v30 = vld [vmem:[#allocation14 + $0x7d0] sm:$0xff] }
 0xdcc   : > { %6677 = vmatpush.bf16.msra.mxu2 %v9839_v19  ;;  %6690 = vmatpush.bf16.msrb.mxu3 %v9847_v47 }
 0xdce   : > { %6705 = vmatpush.bf16.msra.mxu0 %v9853_v38  ;;  %6718 = vmatpush.bf16.msrb.mxu1 %v9861_v39  ;;  %v5711_v38 = vperm.slane %v11009_v25, 3 }
 0xdd0   : > { %6678 = vmatpush.bf16.msra.mxu2 %v9838_v62  ;;  %6691 = vmatpush.bf16.msrb.mxu3 %v9846_v2  ;;  %v9869_v2 = vld [vmem:[#allocation14 + $0x720] sm:$0xff] }
 0xdd2   : > { %6706 = vmatpush.bf16.msra.mxu0 %v9852_v40  ;;  %6719 = vmatpush.bf16.msrb.mxu1 %v9860_v42 }
 0xdd4   : > { %6679 = vmatpush.bf16.msra.mxu2 %v9837_v33  ;;  %6692 = vmatpush.bf16.msrb.mxu3 %v9845_v45  ;;  %v9890_v45 = vld [vmem:[#allocation14 + $0x7c8] sm:$0xff] }
 0xdd6   : > { %6707 = vmatpush.bf16.msra.mxu0 %v9851_v0  ;;  %6720 = vmatpush.bf16.msrb.mxu1 %v9859_v21  ;;  %v9877_v0 = vld [vmem:[#allocation14 + $0x760] sm:$0xff]  ;;  %v9882_v21 = vld [vmem:[#allocation14 + $0x788] sm:$0xff] }
 0xdd8   : > { %6680 = vmatpush.bf16.msra.mxu2 %v9836_v36  ;;  %6693 = vmatpush.bf16.msrb.mxu3 %v9844_v49  ;;  %v9868_v36 = vld [vmem:[#allocation14 + $0x718] sm:$0xff] }
 0xdd9   : > { %v9876_v49 = vld [vmem:[#allocation14 + $0x758] sm:$0xff] }
 0xdda   : > { %6708 = vmatpush.bf16.msra.mxu0 %v9850_v46  ;;  %6721 = vmatpush.bf16.msrb.mxu1 %v9858_v48 }
 0xddc   : > { %6681 = vmatpush.bf16.msra.mxu2 %v9835_v54  ;;  %6694 = vmatpush.bf16.msrb.mxu3 %v9843_v55  ;;  %v9867_v54 = vld [vmem:[#allocation14 + $0x710] sm:$0xff] }
 0xddd   : > { %v9875_v55 = vld [vmem:[#allocation14 + $0x750] sm:$0xff] }
 0xdde   : > { %6709 = vmatpush.bf16.msra.mxu0 %v9849_v52  ;;  %6722 = vmatpush.bf16.msrb.mxu1 %v9857_v1 }
 0xde0   : > { %6682 = vmatpush.bf16.msra.mxu2 %v9834_v32  ;;  %6695 = vmatpush.bf16.msrb.mxu3 %v9842_v58  ;;  %v9866_v58 = vld [vmem:[#allocation14 + $0x708] sm:$0xff] }
 0xde2   : > { %6754 = vmatpush.bf16.msrb.mxu0 %v9888_v4  ;;  %6767 = vmatpush.bf16.msra.mxu1 %v9896_v5  ;;  %v9881_v4 = vld [vmem:[#allocation14 + $0x780] sm:$0xff] }
 0xde3   : > { %v9889_v5 = vld [vmem:[#allocation14 + $0x7c0] sm:$0xff] }
 0xde4   : > { %6683 = vmatpush.bf16.msra.mxu2 %v9833_v9  ;;  %6696 = vmatpush.bf16.msrb.mxu3 %v9841_v10 }
 0xde6   : > { %6755 = vmatpush.bf16.msrb.mxu0 %v9887_v56  ;;  %6768 = vmatpush.bf16.msra.mxu1 %v9895_v57  ;;  %v5708_v56 = vperm.slane %v11009_v25, 0  ;;  %v5709_v57 = vperm.slane %v11009_v25, 1 }
 0xde8   : > { %6728 = vmatpush.bf16.msrb.mxu2 %v9872_v11  ;;  %6741 = vmatpush.bf16.msra.mxu3 %v9880_v12  ;;  %v5714_v12 = vperm.slane %v11009_v25, 6 }
 0xdea   : > { %6756 = vmatpush.bf16.msrb.mxu0 %v9886_v7  ;;  %6769 = vmatpush.bf16.msra.mxu1 %v9894_v8  ;;  %v9873_v7 = vld [vmem:[#allocation14 + $0x740] sm:$0xff] }
 0xdec   : > { %6729 = vmatpush.bf16.msrb.mxu2 %v9871_v17  ;;  %6742 = vmatpush.bf16.msra.mxu3 %v9879_v18 }
 0xdee   : > { %6757 = vmatpush.bf16.msrb.mxu0 %v9885_v53  ;;  %6770 = vmatpush.bf16.msra.mxu1 %v9893_v15 }
 0xdf0   : > { %6730 = vmatpush.bf16.msrb.mxu2 %v9870_v27  ;;  %6743 = vmatpush.bf16.msra.mxu3 %v9878_v31  ;;  %v5712_v31 = vperm.slane %v11009_v25, 4 }
 0xdf2   : > { %6758 = vmatpush.bf16.msrb.mxu0 %v9884_v24  ;;  %6771 = vmatpush.bf16.msra.mxu1 %v9892_v22 }
 0xdf4   : > { %6731 = vmatpush.bf16.msrb.mxu2 %v9869_v2  ;;  %6744 = vmatpush.bf16.msra.mxu3 %v9877_v0 }
 0xdf6   : > { %6759 = vmatpush.bf16.msrb.mxu0 %v9883_v34  ;;  %6772 = vmatpush.bf16.msra.mxu1 %v9891_v30 }
 0xdf8   : > { %6732 = vmatpush.bf16.msrb.mxu2 %v9868_v36  ;;  %6745 = vmatpush.bf16.msra.mxu3 %v9876_v49 }
 0xdfa   : > { %6760 = vmatpush.bf16.msrb.mxu0 %v9882_v21  ;;  %6773 = vmatpush.bf16.msra.mxu1 %v9890_v45 }
 0xdfc   : > { %6733 = vmatpush.bf16.msrb.mxu2 %v9867_v54  ;;  %6746 = vmatpush.bf16.msra.mxu3 %v9875_v55  ;;  %v10033_v54 = vld [vmem:[%s11121_s8 + $0x1] ss:$0 sm:$0xff] }
 0xdfe   : > { %v5569_v43 = vpop.f32.mrf.mxu0  ;;  %v5582_v44 = vpop.f32.mrf.mxu1  ;;  %6761 = vmatpush.bf16.msrb.mxu0 %v9881_v4  ;;  %6774 = vmatpush.bf16.msra.mxu1 %v9889_v5 }
 0xe00   : > { %6734 = vmatpush.bf16.msrb.mxu2 %v9866_v58 }
 0xe06   : > { %v5571_v50 = vpop.f32.mrf.mxu0  ;;  %v5584_v28 = vpop.f32.mrf.mxu1 }
 0xe0a   : > { %v5543_v59 = vpop.f32.mrf.mxu2  ;;  %v5556_v60 = vpop.f32.mrf.mxu3 }
 0xe0b   : > { %v5557_v61 = vadd.f32 %v5556_v60, %v5543_v59 }
 0xe0d   : > { %v5570_v29 = vadd.f32 %v5569_v43, %v5557_v61 }
 0xe0e   : > { %v5621_v63 = vpop.f32.mrf.mxu0  ;;  %v5634_v3 = vpop.f32.mrf.mxu1 }
 0xe0f   : > { %v5583_v6 = vadd.f32 %v5582_v44, %v5570_v29  ;;  %v9874_v29 = vld [vmem:[#allocation14 + $0x748] sm:$0xff] }
 0xe10   : > { %6747 = vmatpush.bf16.msra.mxu3 %v9874_v29 }
 0xe12   : > { %v5545_v13 = vpop.f32.mrf.mxu2  ;;  %v5558_v14 = vpop.f32.mrf.mxu3 }
 0xe13   : > { %v5715_v13 = vperm.slane %v11009_v25, 7 }
 0xe14   : > { %6748 = vmatpush.bf16.msra.mxu3 %v9873_v7 }
 0xe16   : > { %v5623_v20 = vpop.f32.mrf.mxu0  ;;  %v5636_v23 = vpop.f32.mrf.mxu1 }
 0xe1a   : > { %v5595_v41 = vpop.f32.mrf.mxu2  ;;  %v5608_v51 = vpop.f32.mrf.mxu3 }
 0xe1b   : > { %v5596_v35 = vadd.f32 %v5595_v41, %v5583_v6  ;;  %v9865_v6 = vld [vmem:[#allocation14 + $0x700] sm:$0xff]  ;;  %v5713_v41 = vperm.slane %v11009_v25, 5 }
 0xe1c   : > { %6735 = vmatpush.bf16.msrb.mxu2 %v9865_v6 }
 0xe1d   : > { %v5609_v39 = vadd.f32 %v5608_v51, %v5596_v35 }
 0xe1e   : > { %v6079_v19 = vpop.f32.mrf.mxu0  ;;  %v6092_v47 = vpop.f32.mrf.mxu1 }
 0xe1f   : > { %v5622_v40 = vadd.f32 %v5621_v63, %v5609_v39  ;;  %v6080_v42 = vadd.f32 %v6079_v19, %v5710_v37  ;;  %v6093_v62 = vadd.f32 %v6092_v47, %v5711_v38 }
 0xe21   : > { %v11013_v43 = vadd.f32 %v5634_v3, %v5622_v40  ;;  %v6150_v44 = vmax.f32 %v6080_v42, 0.0  ;;  %v6151_v33 = vmax.f32 %v6093_v62, 0.0 }
 0xe22   : > { %v5597_v46 = vpop.f32.mrf.mxu2  ;;  %v5610_v48 = vpop.f32.mrf.mxu3 }
 0xe23   : > { %v6158_v52 = vpack.c.bf16 %v6150_v44, %v6150_v44  ;;  %v6159_v1 = vpack.c.bf16 %v6151_v33, %v6151_v33 }
 0xe25   : > { %6710 = vmatmul.bf16.vlgmr.msra.gmra.mxu0 %v6158_v52  ;;  %6723 = vmatmul.bf16.vlgmr.msrb.gmra.mxu1 %v6159_v1 }
 0xe26   : > { %v6081_v50 = vpop.f32.mrf.mxu0  ;;  %v6094_v28 = vpop.f32.mrf.mxu1 }
 0xe2a   : > { %v6053_v59 = vpop.f32.mrf.mxu2  ;;  %v6066_v60 = vpop.f32.mrf.mxu3 }
 0xe2b   : > { %v6054_v61 = vadd.f32 %v6053_v59, %v5708_v56  ;;  %v6067_v32 = vadd.f32 %v6066_v60, %v5709_v57  ;;  %v5641_v57 = vadd.f32 %v10033_v54, %v11013_v43 }
 0xe2d   : > { %v6148_v63 = vmax.f32 %v6054_v61, 0.0  ;;  %v6149_v3 = vmax.f32 %v6067_v32, 0.0 }
 0xe2f   : > { %v6156_v8 = vpack.c.bf16 %v6148_v63, %v6148_v63  ;;  %v6157_v9 = vpack.c.bf16 %v6149_v3, %v6149_v3 }
 0xe31   : > { %6684 = vmatmul.bf16.vlgmr.msra.gmra.mxu2 %v6156_v8  ;;  %6697 = vmatmul.bf16.vlgmr.msrb.gmra.mxu3 %v6157_v9 }
 0xe32   : > { %v6055_v10 = vpop.f32.mrf.mxu2  ;;  %v6068_v11 = vpop.f32.mrf.mxu3 }
 0xe3e   : > { %v6131_v14 = vpop.f32.mrf.mxu0  ;;  %v6144_v53 = vpop.f32.mrf.mxu1 }
 0xe3f   : > { %v6132_v15 = vadd.f32 %v6131_v14, %v5714_v12  ;;  %v6145_v17 = vadd.f32 %v6144_v53, %v5715_v13  ;;  %v10034_v13 = vld [vmem:[%s11122_s9 + $0x1] ss:$0 sm:$0xff] }
 0xe40   : > { %v10035_v53 = vld [vmem:[%s11123_s13 + $0x1] ss:$0 sm:$0xff] }
 0xe41   : > { %v6154_v18 = vmax.f32 %v6132_v15, 0.0  ;;  %v6155_v20 = vmax.f32 %v6145_v17, 0.0 }
 0xe43   : > { %v6162_v23 = vpack.c.bf16 %v6154_v18, %v6154_v18  ;;  %v6163_v24 = vpack.c.bf16 %v6155_v20, %v6155_v20 }
 0xe45   : > { %6762 = vmatmul.bf16.vlgmr.msrb.gmra.mxu0 %v6162_v23  ;;  %6775 = vmatmul.bf16.vlgmr.msra.gmra.mxu1 %v6163_v24 }
 0xe46   : > { %v6133_v22 = vpop.f32.mrf.mxu0  ;;  %v6146_v27 = vpop.f32.mrf.mxu1 }
 0xe4a   : > { %v6105_v51 = vpop.f32.mrf.mxu2  ;;  %v6118_v34 = vpop.f32.mrf.mxu3 }
 0xe4b   : > { %v6106_v30 = vadd.f32 %v6105_v51, %v5712_v31  ;;  %v6119_v35 = vadd.f32 %v6118_v34, %v5713_v41 }
 0xe4d   : > { %v6152_v37 = vmax.f32 %v6106_v30, 0.0  ;;  %v6153_v38 = vmax.f32 %v6119_v35, 0.0 }
 0xe4f   : > { %v6160_v39 = vpack.c.bf16 %v6152_v37, %v6152_v37  ;;  %v6161_v19 = vpack.c.bf16 %v6153_v38, %v6153_v38 }
 0xe51   : > { %6736 = vmatmul.bf16.vlgmr.msrb.gmra.mxu2 %v6160_v39  ;;  %6749 = vmatmul.bf16.vlgmr.msra.gmra.mxu3 %v6161_v19 }
 0xe52   : > { %v6107_v47 = vpop.f32.mrf.mxu2  ;;  %v6120_v40 = vpop.f32.mrf.mxu3 }
 0xea2   : > { %v6711_v42 = vpop.f32.mrf.mxu0  ;;  %v6724_v62 = vpop.f32.mrf.mxu1 }
 0xeaa   : > { %v6713_v2 = vpop.f32.mrf.mxu0  ;;  %v6726_v0 = vpop.f32.mrf.mxu1 }
 0xeb4   : > { %v6685_v21 = vpop.f32.mrf.mxu2  ;;  %v6698_v44 = vpop.f32.mrf.mxu3 }
 0xeb5   : > { %v6699_v49 = vadd.f32 %v6698_v44, %v6685_v21 }
 0xeb7   : > { %v6712_v52 = vadd.f32 %v6711_v42, %v6699_v49 }
 0xeb9   : > { %v6725_v1 = vadd.f32 %v6724_v62, %v6712_v52 }
 0xebc   : > { %v6687_v33 = vpop.f32.mrf.mxu2  ;;  %v6700_v25 = vpop.f32.mrf.mxu3 }
 0xec2   : > { %v6763_v45 = vpop.f32.mrf.mxu0  ;;  %v6776_v46 = vpop.f32.mrf.mxu1 }
 0xeca   : > { %v6765_v48 = vpop.f32.mrf.mxu0  ;;  %v6778_v36 = vpop.f32.mrf.mxu1 }
 0xed4   : > { %v6737_v4 = vpop.f32.mrf.mxu2  ;;  %v6750_v5 = vpop.f32.mrf.mxu3 }
 0xed5   : > { %v6738_v50 = vadd.f32 %v6737_v4, %v6725_v1 }
 0xed7   : > { %v6751_v28 = vadd.f32 %v6750_v5, %v6738_v50 }
 0xed9   : > { %v6764_v55 = vadd.f32 %v6763_v45, %v6751_v28 }
 0xedb   : > { %v6777_v56 = vadd.f32 %v6776_v46, %v6764_v55 }
 0xedc   : > { %v6739_v59 = vpop.f32.mrf.mxu2  ;;  %v6752_v60 = vpop.f32.mrf.mxu3 }
 0xedd   : > { %v6780_v61 = vadd.f32 %v6777_v56, %v5641_v57 }
 0xedf   : > { %v6781_v32 = vadd.f32 %v6780_v61, %v10977_v26 }
 0xee1   : > { %6786 = vadd.xlane.f32.xlu1 %v6781_v32 }
 0xf54   : > { %v6787_v58 = vpop.xlane.xlu1 %6786 }
 0xf55   : > { %v6788_v29 = vmul.f32 %v6787_v58, %v10700_v16 }
 0xf57   : > { %v6789_v63 = vsub.f32 %v6781_v32, %v6788_v29 }
 0xf59   : > { %v6790_v3 = vmul.f32 %v6789_v63, %v6789_v63 }
 0xf5b   : > { %6791 = vadd.xlane.f32.xlu2 %v6790_v3 }
 0xfce   : > { %v6792_v6 = vpop.xlane.xlu2 %6791 }
 0xfcf   : > { %v6793_v7 = vmul.f32 %v6792_v6, %v10700_v16 }
 0xfd1   : > { %v6794_v8 = vadd.f32 1e-05, %v6793_v7 }
 0xfd3   : > { %10110 = vrsqrt.f32 %v6794_v8  ;;  %vm6801_vm0 = vweird.f32 %v6794_v8 }
 0xfd9   : > { %v10111_v43 = vpop.eup %10110 }
 0xfda   : > { %v6796_v9 = vmul.f32 %v10111_v43, %v6794_v8  ;;  %vm6802_vm15 = vweird.f32 %v10111_v43 }
 0xfdb   : > { %vm6803_vm1 = vmor %vm6801_vm0, %vm6802_vm15 }
 0xfdc   : > { %v6797_v10 = vmul.f32 %v10111_v43, %v6796_v9 }
 0xfde   : > { %v6798_v11 = vmul.f32 0.5, %v6797_v10 }
 0xfe0   : > { %v6799_v12 = vsub.f32 1.5, %v6798_v11 }
 0xfe2   : > { %v6800_v26 = vmul.f32 %v10111_v43, %v6799_v12 }
 0xfe4   : > { %v6804_v16 = vsel %vm6803_vm1, %v10111_v43, %v6800_v26 }
 0xfe5   : > { %v6805_v14 = vmul.f32 %v6804_v16, %v6789_v63 }
 0xfe7   : > { %v6809_v15 = vmul.f32 %v10034_v13, %v6805_v14 }
 0xfe9   : > { %v6813_v17 = vadd.f32 %v10035_v53, %v6809_v15 }
 0xfeb   : > { %6814 = vst [vmem:[%s650_s28] sm:$0xff] %v6813_v17 }
 0xfec   : > { %10379 = shalt.err (!%p10376_p9)
}
 0xfed   : > { %9927 = dma.vmem_to_hbm [thread:$0]  (%p10643_p5), %s6829_s20, 128, %s6831_s1, %s6816_s2  }
 0xfee PF: > { %s6842_s27 = sand.u32 1, %s10422_s21   ;;  %p11125_p10 = scmp.ge.s32.totalorder %s10434_s24, 2 }
 0xfef   : > { %s6843_s3 = scalar_lea.sflag [#allocation4], %s6842_s27 }
 0xff0   : > { %p9956_p13 = pnand %p11125_p10, %p10647_p6 }
 0xff2   : > { %p9957_p11 = pneg %p9956_p13 }
 0xff4   : > { %10417 = dma.done.wait (%p9957_p11), %s6843_s3, 128  }
 0xff5   : > { %10419 = vsyncadd (%p9957_p11), %s6843_s3, 4294967168  ;;  %p33_p0 = scmp.ge.s32.totalorder %s10617_s16, 4   ;;  %s11126_s21 = smov %s10426_s22 }
 0xff6   : > { %s11127_s22 = smov %s10430_s23  ;;  %s11128_s23 = smov %s10628_s18 }
 0xff7   : > { %s11129_s24 = smov %s10617_s16  ;;  %35 = sbr.rel (!%p33_p0) target bundleno = 23 (0x17), region = 169 }
 0xffc   :  { %6849 = vsyncpa [#allocation3], 1 }
 0xffd   :  { %6851 = vsyncpa [#allocation3 + $0x1], 1 }
 0xffe   :  { %6852 = vsyncpa [#allocation6], 1 }
 0xfff   :  { %6853 = vsyncpa [#allocation9], 1 }
0x1000   :  { %6854 = vsyncpa [#allocation12], 1 }
0x1001   :  { %6855 = vsyncpa [#allocation15], 1 }
0x1002   :  { %6856 = vsyncpa [#allocation4], 1 }
0x1003   :  { %6858 = vsyncpa [#allocation4 + $0x1], 1 }

</bundles_post_ra>
